<compile_context>
chip_gen: v7x
topology: tpu7x:2x2x1
jax: 0.10.0
libtpu: 0.0.40
codegen_flags: <defaults>
</compile_context>

<pallas_src>
import numpy as np
import jax
import jax.numpy as jnp
from jax.experimental import pallas as pl
from jax.experimental.pallas import tpu as pltpu

KH = KW = 7
H = W = 14
OH = OW = 8                     # 14 - 7 + 1
PH = PW = 4                     # after 2x2 max-pool
NPOS = OH * OW                  # 64 conv output positions
KSZ = KH * KW                   # 49
COUT = 32
NB_HIDDEN = 70
POOL_SLAB = COUT * PH * PW      # 512  (one pool-window candidate slab)
CONV_COLS = 4 * POOL_SLAB       # 2048 (4 candidates per pooled cell)
FEAT_HALF = POOL_SLAB           # 512 features per path
FEAT = 2 * FEAT_HALF            # 1024
HPAD = 128                      # fc1 hidden padded to lane width
OPAD = 128                      # fc2 output padded to lane width


def _round_up(n, m):
    return ((n + m - 1) // m) * m


# ----------------------------- Pallas kernel -------------------------------

def _fused_kernel(x1_ref, x2_ref, wexp_ref, bexp_ref,
                  w1a_ref, w1b_ref, b1_ref, w2_ref, b2_ref, o_ref):
    """conv(+bias for x1) -> ReLU -> 2x2 max-pool -> fc1 -> sigmoid -> fc2."""
    wexp = wexp_ref[...]                                                # (196, 2048)
    c1 = jnp.dot(x1_ref[...], wexp, preferred_element_type=jnp.float32) + bexp_ref[...]
    c2 = jnp.dot(x2_ref[...], wexp, preferred_element_type=jnp.float32)
    c1 = jnp.maximum(c1, 0.0)                                           # ReLU
    c2 = jnp.maximum(c2, 0.0)

    def pool(c):
        # columns are s*512 + (co*16 + cell): the four 2x2-window candidates of
        # every (channel, cell) live in four contiguous lane-aligned slabs.
        return jnp.maximum(
            jnp.maximum(c[:, 0:POOL_SLAB], c[:, POOL_SLAB:2 * POOL_SLAB]),
            jnp.maximum(c[:, 2 * POOL_SLAB:3 * POOL_SLAB], c[:, 3 * POOL_SLAB:]))

    p1 = pool(c1)                                                       # (Bt, 512)
    p2 = pool(c2)                                                       # torch .view order

    h = (jnp.dot(p1, w1a_ref[...], preferred_element_type=jnp.float32)
         + jnp.dot(p2, w1b_ref[...], preferred_element_type=jnp.float32)
         + b1_ref[...])
    h = 1.0 / (1.0 + jnp.exp(-h))                                       # sigmoid
    o_ref[...] = (jnp.dot(h, w2_ref[...], preferred_element_type=jnp.float32)
                  + b2_ref[...])


# ------------------------------- glue (JAX) --------------------------------

def _build_expanded_conv_weight(conv_w, conv_b):
    """Fold im2col + pool-friendly column ordering into the conv weight.

    Returns:
      wexp: (196, 2048) so that (x_flat @ wexp)[:, s*512 + co*16 + cell] is the
            conv output at spatial position (2*ci+si, 2*cj+sj), channel co,
            with cell = ci*4+cj and s = si*2+sj.
      bexp: (1, 2048) conv bias broadcast into the same column order.
    """
    w_mat = conv_w.reshape(COUT, KSZ)                 # (32, 49), k = r*7 + c
    j_idx = np.zeros((NPOS, KSZ), np.int32)           # flat image index per (pos, k)
    col_base = np.zeros((NPOS,), np.int32)            # col = col_base + 16 * co
    p = 0
    for si in range(2):
        for sj in range(2):
            s = si * 2 + sj
            for ci in range(PH):
                for cj in range(PW):
                    cell = ci * PW + cj
                    oy, ox = 2 * ci + si, 2 * cj + sj
                    for r in range(KH):
                        for c in range(KW):
                            j_idx[p, r * KW + c] = (oy + r) * W + (ox + c)
                    col_base[p] = s * POOL_SLAB + cell
                    p += 1

    rows = jnp.asarray(j_idx)[:, :, None]                                    # (64,49,1)
    cols = (jnp.asarray(col_base)[:, None, None]
            + 16 * jnp.arange(COUT, dtype=jnp.int32)[None, None, :])         # (64,1,32)
    vals = jnp.broadcast_to(w_mat.T[None, :, :], (NPOS, KSZ, COUT))          # (64,49,32)
    wexp = jnp.zeros((H * W, CONV_COLS), jnp.float32).at[rows, cols].add(vals)
    bexp = jnp.tile(jnp.repeat(conv_b, PH * PW), 4).reshape(1, CONV_COLS)
    return wexp, bexp


def convnet1_ws_forward(x, params, *, images_per_tile=32):
    B = x.shape[0]
    Bt = min(_round_up(images_per_tile, 8), _round_up(B, 8))   # multiple of 8
    B_pad = _round_up(B, Bt)
    n_tiles = B_pad // Bt

    x1 = x[:, 0].reshape(B, H * W)
    x2 = x[:, 1].reshape(B, H * W)
    if B_pad != B:
        pad = ((0, B_pad - B), (0, 0))
        x1 = jnp.pad(x1, pad)
        x2 = jnp.pad(x2, pad)

    wexp, bexp = _build_expanded_conv_weight(params["conv_w"], params["conv_b"])

    fc1_w, fc1_b = params["fc1_w"], params["fc1_b"]            # (70, 1024), (70,)
    fc2_w, fc2_b = params["fc2_w"], params["fc2_b"]            # (2, 70),   (2,)
    w1a = jnp.zeros((FEAT_HALF, HPAD), jnp.float32).at[:, :NB_HIDDEN].set(fc1_w[:, :FEAT_HALF].T)
    w1b = jnp.zeros((FEAT_HALF, HPAD), jnp.float32).at[:, :NB_HIDDEN].set(fc1_w[:, FEAT_HALF:].T)
    b1p = jnp.zeros((1, HPAD), jnp.float32).at[0, :NB_HIDDEN].set(fc1_b)
    w2p = jnp.zeros((HPAD, OPAD), jnp.float32).at[:NB_HIDDEN, :2].set(fc2_w.T)
    b2p = jnp.zeros((1, OPAD), jnp.float32).at[0, :2].set(fc2_b)

    flops = B_pad * (2 * (H * W) * CONV_COLS * 2
                     + 2 * FEAT_HALF * HPAD * 2
                     + HPAD * OPAD * 2)
    bytes_accessed = 4 * (x1.size + x2.size + wexp.size + bexp.size
                          + 2 * w1a.size + b1p.size + w2p.size + b2p.size
                          + B_pad * OPAD)

    out = pl.pallas_call(
        _fused_kernel,
        out_shape=jax.ShapeDtypeStruct((B_pad, OPAD), jnp.float32),
        grid_spec=pltpu.PrefetchScalarGridSpec(
            num_scalar_prefetch=0,
            grid=(n_tiles,),
            in_specs=[
                pl.BlockSpec((Bt, H * W), lambda i: (i, 0)),          # x1 tile
                pl.BlockSpec((Bt, H * W), lambda i: (i, 0)),          # x2 tile
                pl.BlockSpec((H * W, CONV_COLS), lambda i: (0, 0)),   # wexp (resident)
                pl.BlockSpec((1, CONV_COLS), lambda i: (0, 0)),       # bexp
                pl.BlockSpec((FEAT_HALF, HPAD), lambda i: (0, 0)),    # fc1 half (x1)
                pl.BlockSpec((FEAT_HALF, HPAD), lambda i: (0, 0)),    # fc1 half (x2)
                pl.BlockSpec((1, HPAD), lambda i: (0, 0)),            # fc1 bias
                pl.BlockSpec((HPAD, OPAD), lambda i: (0, 0)),         # fc2 w (padded)
                pl.BlockSpec((1, OPAD), lambda i: (0, 0)),            # fc2 bias
            ],
            out_specs=pl.BlockSpec((Bt, OPAD), lambda i: (i, 0)),
        ),
        compiler_params=pltpu.CompilerParams(dimension_semantics=("parallel",)),
        cost_estimate=pl.CostEstimate(flops=flops,
                                      transcendentals=B_pad * HPAD,
                                      bytes_accessed=bytes_accessed),
    )(x1, x2, wexp, bexp, w1a, w1b, b1p, w2p, b2p)

    return out[:B, :2]


# ----------------------------- pure-JAX reference --------------------------

def reference_forward(x, params):
    conv_w, conv_b = params["conv_w"], params["conv_b"]

    def conv_path(xc, bias):
        y = jax.lax.conv_general_dilated(
            xc[:, None], conv_w, (1, 1), "VALID",
            dimension_numbers=("NCHW", "OIHW", "NCHW"))
        if bias is not None:
            y = y + bias[None, :, None, None]
        y = jnp.maximum(y, 0.0)
        y = jax.lax.reduce_window(y, -jnp.inf, jax.lax.max,
                                  (1, 1, 2, 2), (1, 1, 2, 2), "VALID")
        return y.reshape(y.shape[0], -1)

    f1 = conv_path(x[:, 0], conv_b)
    f2 = conv_path(x[:, 1], None)
    f = jnp.concatenate([f1, f2], axis=1)
    h = jax.nn.sigmoid(f @ params["fc1_w"].T + params["fc1_b"])
    return h @ params["fc2_w"].T + params["fc2_b"]


# --------------------------------- params ----------------------------------

def init_params(key):
    ks = jax.random.split(key, 6)
    return dict(
        conv_w=jax.random.normal(ks[0], (COUT, 1, KH, KW), jnp.float32) * 0.1,
        conv_b=jax.random.normal(ks[1], (COUT,), jnp.float32) * 0.1,
        fc1_w=jax.random.normal(ks[2], (NB_HIDDEN, FEAT), jnp.float32) * 0.05,
        fc1_b=jax.random.normal(ks[3], (NB_HIDDEN,), jnp.float32) * 0.05,
        fc2_w=jax.random.normal(ks[4], (2, NB_HIDDEN), jnp.float32) * 0.1,
        fc2_b=jax.random.normal(ks[5], (2,), jnp.float32) * 0.1,
    )


if __name__ == "__main__":
    key = jax.random.PRNGKey(0)
    kx, kp = jax.random.split(key)
    B = 50                      # matches mini_batch_size in the PyTorch module
    x = jax.random.normal(kx, (B, 2, H, W), jnp.float32)
    params = init_params(kp)

    out = jax.jit(convnet1_ws_forward)(x, params)
    jax.block_until_ready(out)
    assert out.shape == (B, 2) and out.dtype == jnp.float32

    ref = reference_forward(x, params)
    assert jnp.allclose(out, ref, atol=1e-4, rtol=1e-4), "mismatch vs JAX reference"

    print("KERNEL_OK")
</pallas_src>

<mosaic_0001>
module attributes {stable_mosaic.version = 11 : i64} {
  func.func private @main(%arg0: i32) attributes {dimension_semantics = [#tpu.dimension_semantics<core_parallel>], iteration_bounds = array<i64: 2>, tpu.core_type = #tpu.core_type<sc_scalar_subcore>, window_params = []} {
    return
  }
}

module attributes {stable_mosaic.version = 11 : i64} {
  func.func private @main(%arg0: i32) attributes {dimension_semantics = [#tpu.dimension_semantics<core_parallel>], iteration_bounds = array<i64: 2>, tpu.core_type = #tpu.core_type<sc_scalar_subcore>, window_params = []} {
    return
  }
}

module attributes {stable_mosaic.version = 11 : i64} {
  func.func @_fused_kernel(%arg0: i32, %arg1: memref<32x196xf32, #tpu.memory_space<vmem>>, %arg2: memref<32x196xf32, #tpu.memory_space<vmem>>, %arg3: memref<196x2048xf32, #tpu.memory_space<vmem>>, %arg4: memref<1x2048xf32, #tpu.memory_space<vmem>>, %arg5: memref<512x128xf32, #tpu.memory_space<vmem>>, %arg6: memref<512x128xf32, #tpu.memory_space<vmem>>, %arg7: memref<1x128xf32, #tpu.memory_space<vmem>>, %arg8: memref<128x128xf32, #tpu.memory_space<vmem>>, %arg9: memref<1x128xf32, #tpu.memory_space<vmem>>, %arg10: memref<32x128xf32, #tpu.memory_space<vmem>>) attributes {dimension_semantics = [#tpu.dimension_semantics<parallel>], iteration_bounds = array<i64: 2>, scalar_prefetch = 0 : i64, scratch_operands = 0 : i64, tpu.core_type = #tpu.core_type<tc>, window_params = [{transform_indices = @transform_0, window_bounds = array<i64: 32, 196>}, {transform_indices = @transform_1, window_bounds = array<i64: 32, 196>}, {pipeline_mode = #tpu.pipeline_mode<synchronous>, transform_indices = @transform_2, window_bounds = array<i64: 196, 2048>}, {pipeline_mode = #tpu.pipeline_mode<synchronous>, transform_indices = @transform_3, window_bounds = array<i64: 1, 2048>}, {pipeline_mode = #tpu.pipeline_mode<synchronous>, transform_indices = @transform_4, window_bounds = array<i64: 512, 128>}, {pipeline_mode = #tpu.pipeline_mode<synchronous>, transform_indices = @transform_5, window_bounds = array<i64: 512, 128>}, {pipeline_mode = #tpu.pipeline_mode<synchronous>, transform_indices = @transform_6, window_bounds = array<i64: 1, 128>}, {pipeline_mode = #tpu.pipeline_mode<synchronous>, transform_indices = @transform_7, window_bounds = array<i64: 128, 128>}, {pipeline_mode = #tpu.pipeline_mode<synchronous>, transform_indices = @transform_8, window_bounds = array<i64: 1, 128>}, {transform_indices = @transform_9, window_bounds = array<i64: 32, 128>}]} {
    %c0 = arith.constant 0 : index
    %c0_0 = arith.constant 0 : index
    %0 = vector.load %arg3[%c0, %c0_0] : memref<196x2048xf32, #tpu.memory_space<vmem>>, vector<196x2048xf32>
    %c0_1 = arith.constant 0 : index
    %c0_2 = arith.constant 0 : index
    %1 = vector.load %arg1[%c0_1, %c0_2] : memref<32x196xf32, #tpu.memory_space<vmem>>, vector<32x196xf32>
    %cst = arith.constant dense<0.000000e+00> : vector<32x2048xf32>
    %2 = tpu.matmul %1, %0, %cst {dimension_numbers = #tpu.dot_dimension_numbers<[1], [0], [0], [1], [0, 0, 1, 1], [], []>} : vector<32x196xf32>, vector<196x2048xf32>, vector<32x2048xf32> -> vector<32x2048xf32>
    %c0_3 = arith.constant 0 : index
    %c0_4 = arith.constant 0 : index
    %3 = vector.load %arg4[%c0_3, %c0_4] : memref<1x2048xf32, #tpu.memory_space<vmem>>, vector<1x2048xf32>
    %4 = vector.broadcast %3 : vector<1x2048xf32> to vector<32x2048xf32>
    %5 = arith.addf %2, %4 : vector<32x2048xf32>
    %c0_5 = arith.constant 0 : index
    %c0_6 = arith.constant 0 : index
    %6 = vector.load %arg2[%c0_5, %c0_6] : memref<32x196xf32, #tpu.memory_space<vmem>>, vector<32x196xf32>
    %cst_7 = arith.constant dense<0.000000e+00> : vector<32x2048xf32>
    %7 = tpu.matmul %6, %0, %cst_7 {dimension_numbers = #tpu.dot_dimension_numbers<[1], [0], [0], [1], [0, 0, 1, 1], [], []>} : vector<32x196xf32>, vector<196x2048xf32>, vector<32x2048xf32> -> vector<32x2048xf32>
    %cst_8 = arith.constant 0.000000e+00 : f32
    %8 = vector.broadcast %cst_8 : f32 to vector<32x2048xf32>
    %9 = arith.maximumf %5, %8 : vector<32x2048xf32>
    %cst_9 = arith.constant 0.000000e+00 : f32
    %10 = vector.broadcast %cst_9 : f32 to vector<32x2048xf32>
    %11 = arith.maximumf %7, %10 : vector<32x2048xf32>
    %12 = vector.extract_strided_slice %9 {offsets = [0, 0], sizes = [32, 512], strides = [1, 1]} : vector<32x2048xf32> to vector<32x512xf32>
    %13 = vector.extract_strided_slice %9 {offsets = [0, 512], sizes = [32, 512], strides = [1, 1]} : vector<32x2048xf32> to vector<32x512xf32>
    %14 = arith.maximumf %12, %13 : vector<32x512xf32>
    %15 = vector.extract_strided_slice %9 {offsets = [0, 1024], sizes = [32, 512], strides = [1, 1]} : vector<32x2048xf32> to vector<32x512xf32>
    %16 = vector.extract_strided_slice %9 {offsets = [0, 1536], sizes = [32, 512], strides = [1, 1]} : vector<32x2048xf32> to vector<32x512xf32>
    %17 = arith.maximumf %15, %16 : vector<32x512xf32>
    %18 = arith.maximumf %14, %17 : vector<32x512xf32>
    %19 = vector.extract_strided_slice %11 {offsets = [0, 0], sizes = [32, 512], strides = [1, 1]} : vector<32x2048xf32> to vector<32x512xf32>
    %20 = vector.extract_strided_slice %11 {offsets = [0, 512], sizes = [32, 512], strides = [1, 1]} : vector<32x2048xf32> to vector<32x512xf32>
    %21 = arith.maximumf %19, %20 : vector<32x512xf32>
    %22 = vector.extract_strided_slice %11 {offsets = [0, 1024], sizes = [32, 512], strides = [1, 1]} : vector<32x2048xf32> to vector<32x512xf32>
    %23 = vector.extract_strided_slice %11 {offsets = [0, 1536], sizes = [32, 512], strides = [1, 1]} : vector<32x2048xf32> to vector<32x512xf32>
    %24 = arith.maximumf %22, %23 : vector<32x512xf32>
    %25 = arith.maximumf %21, %24 : vector<32x512xf32>
    %c0_10 = arith.constant 0 : index
    %c0_11 = arith.constant 0 : index
    %26 = vector.load %arg5[%c0_10, %c0_11] : memref<512x128xf32, #tpu.memory_space<vmem>>, vector<512x128xf32>
    %cst_12 = arith.constant dense<0.000000e+00> : vector<32x128xf32>
    %27 = tpu.matmul %18, %26, %cst_12 {dimension_numbers = #tpu.dot_dimension_numbers<[1], [0], [0], [1], [0, 0, 1, 1], [], []>} : vector<32x512xf32>, vector<512x128xf32>, vector<32x128xf32> -> vector<32x128xf32>
    %c0_13 = arith.constant 0 : index
    %c0_14 = arith.constant 0 : index
    %28 = vector.load %arg6[%c0_13, %c0_14] : memref<512x128xf32, #tpu.memory_space<vmem>>, vector<512x128xf32>
    %cst_15 = arith.constant dense<0.000000e+00> : vector<32x128xf32>
    %29 = tpu.matmul %25, %28, %cst_15 {dimension_numbers = #tpu.dot_dimension_numbers<[1], [0], [0], [1], [0, 0, 1, 1], [], []>} : vector<32x512xf32>, vector<512x128xf32>, vector<32x128xf32> -> vector<32x128xf32>
    %30 = arith.addf %27, %29 : vector<32x128xf32>
    %c0_16 = arith.constant 0 : index
    %c0_17 = arith.constant 0 : index
    %31 = vector.load %arg7[%c0_16, %c0_17] : memref<1x128xf32, #tpu.memory_space<vmem>>, vector<1x128xf32>
    %32 = vector.broadcast %31 : vector<1x128xf32> to vector<32x128xf32>
    %33 = arith.addf %30, %32 : vector<32x128xf32>
    %cst_18 = arith.constant 0.000000e+00 : f32
    %34 = vector.broadcast %cst_18 : f32 to vector<32x128xf32>
    %35 = arith.subf %34, %33 : vector<32x128xf32>
    %36 = math.exp %35 : vector<32x128xf32>
    %cst_19 = arith.constant 1.000000e+00 : f32
    %37 = vector.broadcast %cst_19 : f32 to vector<32x128xf32>
    %38 = arith.addf %37, %36 : vector<32x128xf32>
    %cst_20 = arith.constant 1.000000e+00 : f32
    %39 = vector.broadcast %cst_20 : f32 to vector<32x128xf32>
    %40 = arith.divf %39, %38 : vector<32x128xf32>
    %c0_21 = arith.constant 0 : index
    %c0_22 = arith.constant 0 : index
    %41 = vector.load %arg8[%c0_21, %c0_22] : memref<128x128xf32, #tpu.memory_space<vmem>>, vector<128x128xf32>
    %cst_23 = arith.constant dense<0.000000e+00> : vector<32x128xf32>
    %42 = tpu.matmul %40, %41, %cst_23 {dimension_numbers = #tpu.dot_dimension_numbers<[1], [0], [0], [1], [0, 0, 1, 1], [], []>} : vector<32x128xf32>, vector<128x128xf32>, vector<32x128xf32> -> vector<32x128xf32>
    %c0_24 = arith.constant 0 : index
    %c0_25 = arith.constant 0 : index
    %43 = vector.load %arg9[%c0_24, %c0_25] : memref<1x128xf32, #tpu.memory_space<vmem>>, vector<1x128xf32>
    %44 = vector.broadcast %43 : vector<1x128xf32> to vector<32x128xf32>
    %45 = arith.addf %42, %44 : vector<32x128xf32>
    %c0_26 = arith.constant 0 : index
    %c0_27 = arith.constant 0 : index
    %46 = vector.load %arg10[%c0_26, %c0_27] : memref<32x128xf32, #tpu.memory_space<vmem>>, vector<32x128xf32>
    tpu.vector_store %arg10[%c0_26, %c0_27], %45 {strides = array<i32>} : memref<32x128xf32, #tpu.memory_space<vmem>>, vector<32x128xf32>,
    return
  }
  func.func @transform_0(%arg0: i32) -> (i32, i32) {
    %c0_i32 = arith.constant 0 : i32
    %c0_i32_0 = arith.constant 0 : i32
    return %arg0, %c0_i32 : i32, i32
  }
  func.func @transform_1(%arg0: i32) -> (i32, i32) {
    %c0_i32 = arith.constant 0 : i32
    %c0_i32_0 = arith.constant 0 : i32
    return %arg0, %c0_i32 : i32, i32
  }
  func.func @transform_2(%arg0: i32) -> (i32, i32) {
    %c0_i32 = arith.constant 0 : i32
    %c0_i32_0 = arith.constant 0 : i32
    %c0_i32_1 = arith.constant 0 : i32
    return %c0_i32, %c0_i32_0 : i32, i32
  }
  func.func @transform_3(%arg0: i32) -> (i32, i32) {
    %c0_i32 = arith.constant 0 : i32
    %c0_i32_0 = arith.constant 0 : i32
    %c0_i32_1 = arith.constant 0 : i32
    return %c0_i32, %c0_i32_0 : i32, i32
  }
  func.func @transform_4(%arg0: i32) -> (i32, i32) {
    %c0_i32 = arith.constant 0 : i32
    %c0_i32_0 = arith.constant 0 : i32
    %c0_i32_1 = arith.constant 0 : i32
    return %c0_i32, %c0_i32_0 : i32, i32
  }
  func.func @transform_5(%arg0: i32) -> (i32, i32) {
    %c0_i32 = arith.constant 0 : i32
    %c0_i32_0 = arith.constant 0 : i32
    %c0_i32_1 = arith.constant 0 : i32
    return %c0_i32, %c0_i32_0 : i32, i32
  }
  func.func @transform_6(%arg0: i32) -> (i32, i32) {
    %c0_i32 = arith.constant 0 : i32
    %c0_i32_0 = arith.constant 0 : i32
    %c0_i32_1 = arith.constant 0 : i32
    return %c0_i32, %c0_i32_0 : i32, i32
  }
  func.func @transform_7(%arg0: i32) -> (i32, i32) {
    %c0_i32 = arith.constant 0 : i32
    %c0_i32_0 = arith.constant 0 : i32
    %c0_i32_1 = arith.constant 0 : i32
    return %c0_i32, %c0_i32_0 : i32, i32
  }
  func.func @transform_8(%arg0: i32) -> (i32, i32) {
    %c0_i32 = arith.constant 0 : i32
    %c0_i32_0 = arith.constant 0 : i32
    %c0_i32_1 = arith.constant 0 : i32
    return %c0_i32, %c0_i32_0 : i32, i32
  }
  func.func @transform_9(%arg0: i32) -> (i32, i32) {
    %c0_i32 = arith.constant 0 : i32
    %c0_i32_0 = arith.constant 0 : i32
    return %arg0, %c0_i32 : i32, i32
  }
}

</mosaic_0001>

<bundles_post_ra>
// kernel: squeeze.2
= control target key start
LH: loop header
LB: loop body
LE: loop exit
PB: predicated region body
PF: predicated region fallthrough
CT: control target
= control target key end

     0   :  { %vm3_vm0 = vcmask 408576   ;;  %s400_s0 = inlined_call_operand.vmem [shape: f32[50,14,14], index: 0, kind: input, shape index: {}]   ;;  %s401_s1 = inlined_call_operand.vmem [shape: f32[50,196], index: 1, kind: output, shape index: {}]  }
   0x1   :  { %v2_v0 = vld [vmem:[%s400_s0] sm:$0xff]   ;;  %v140_v1 = vld [vmem:[%s400_s0 + $0x8] sm:$0x3f]   ;;  %v142_v2 = vld [vmem:[%s400_s0 + $0x10] sm:$0xff]  }
   0x2   :  { %4 = vst.msk [vmem:[%s401_s1] sm:$0xff] %vm3_vm0, %v2_v0   ;;  %141 = vst.msk [vmem:[%s401_s1 + $0x8] sm:$0x3f] %vm3_vm0, %v140_v1   ;;  %v144_v3 = vld [vmem:[%s400_s0 + $0x18] sm:$0x3f]   ;;  %v146_v4 = vld [vmem:[%s400_s0 + $0x20] sm:$0xff]  }
   0x3   :  { %143 = vst.msk [vmem:[%s401_s1 + $0xe] sm:$0xff] %vm3_vm0, %v142_v2   ;;  %v148_v5 = vld [vmem:[%s400_s0 + $0x28] sm:$0x3f]   ;;  %145 = vst.msk [vmem:[%s401_s1 + $0x16] sm:$0x3f] %vm3_vm0, %v144_v3   ;;  %v150_v6 = vld [vmem:[%s400_s0 + $0x30] sm:$0xff]  }
   0x4   :  { %147 = vst.msk [vmem:[%s401_s1 + $0x1c] sm:$0xff] %vm3_vm0, %v146_v4   ;;  %149 = vst.msk [vmem:[%s401_s1 + $0x24] sm:$0x3f] %vm3_vm0, %v148_v5   ;;  %v152_v7 = vld [vmem:[%s400_s0 + $0x38] sm:$0x3f]   ;;  %v154_v8 = vld [vmem:[%s400_s0 + $0x40] sm:$0xff]  }
   0x5   :  { %151 = vst.msk [vmem:[%s401_s1 + $0x2a] sm:$0xff] %vm3_vm0, %v150_v6   ;;  %153 = vst.msk [vmem:[%s401_s1 + $0x32] sm:$0x3f] %vm3_vm0, %v152_v7   ;;  %v156_v9 = vld [vmem:[%s400_s0 + $0x48] sm:$0x3f]   ;;  %v158_v10 = vld [vmem:[%s400_s0 + $0x50] sm:$0xff]  }
   0x6   :  { %155 = vst.msk [vmem:[%s401_s1 + $0x38] sm:$0xff] %vm3_vm0, %v154_v8   ;;  %v160_v11 = vld [vmem:[%s400_s0 + $0x58] sm:$0x3f]   ;;  %157 = vst.msk [vmem:[%s401_s1 + $0x40] sm:$0x3f] %vm3_vm0, %v156_v9   ;;  %v162_v12 = vld [vmem:[%s400_s0 + $0x60] sm:$0xff]  }
   0x7   :  { %159 = vst.msk [vmem:[%s401_s1 + $0x46] sm:$0xff] %vm3_vm0, %v158_v10   ;;  %161 = vst.msk [vmem:[%s401_s1 + $0x4e] sm:$0x3f] %vm3_vm0, %v160_v11   ;;  %v164_v13 = vld [vmem:[%s400_s0 + $0x68] sm:$0x3f]   ;;  %v166_v14 = vld [vmem:[%s400_s0 + $0x70] sm:$0xff]  }
   0x8   :  { %163 = vst.msk [vmem:[%s401_s1 + $0x54] sm:$0xff] %vm3_vm0, %v162_v12   ;;  %165 = vst.msk [vmem:[%s401_s1 + $0x5c] sm:$0x3f] %vm3_vm0, %v164_v13   ;;  %v168_v15 = vld [vmem:[%s400_s0 + $0x78] sm:$0x3f]   ;;  %v170_v16 = vld [vmem:[%s400_s0 + $0x80] sm:$0xff]  }
   0x9   :  { %167 = vst.msk [vmem:[%s401_s1 + $0x62] sm:$0xff] %vm3_vm0, %v166_v14   ;;  %v172_v17 = vld [vmem:[%s400_s0 + $0x88] sm:$0x3f]   ;;  %169 = vst.msk [vmem:[%s401_s1 + $0x6a] sm:$0x3f] %vm3_vm0, %v168_v15   ;;  %v174_v18 = vld [vmem:[%s400_s0 + $0x90] sm:$0xff]  }
   0xa   :  { %171 = vst.msk [vmem:[%s401_s1 + $0x70] sm:$0xff] %vm3_vm0, %v170_v16   ;;  %173 = vst.msk [vmem:[%s401_s1 + $0x78] sm:$0x3f] %vm3_vm0, %v172_v17   ;;  %v176_v19 = vld [vmem:[%s400_s0 + $0x98] sm:$0x3f]   ;;  %v178_v20 = vld [vmem:[%s400_s0 + $0xa0] sm:$0xff]  }
   0xb   :  { %175 = vst.msk [vmem:[%s401_s1 + $0x7e] sm:$0xff] %vm3_vm0, %v174_v18   ;;  %177 = vst.msk [vmem:[%s401_s1 + $0x86] sm:$0x3f] %vm3_vm0, %v176_v19   ;;  %v180_v21 = vld [vmem:[%s400_s0 + $0xa8] sm:$0x3f]   ;;  %v182_v22 = vld [vmem:[%s400_s0 + $0xb0] sm:$0xff]  }
   0xc   :  { %179 = vst.msk [vmem:[%s401_s1 + $0x8c] sm:$0xff] %vm3_vm0, %v178_v20   ;;  %v184_v23 = vld [vmem:[%s400_s0 + $0xb8] sm:$0x3f]   ;;  %181 = vst.msk [vmem:[%s401_s1 + $0x94] sm:$0x3f] %vm3_vm0, %v180_v21   ;;  %v186_v24 = vld [vmem:[%s400_s0 + $0xc0] sm:$0xff]  }
   0xd   :  { %183 = vst.msk [vmem:[%s401_s1 + $0x9a] sm:$0xff] %vm3_vm0, %v182_v22   ;;  %185 = vst.msk [vmem:[%s401_s1 + $0xa2] sm:$0x3f] %vm3_vm0, %v184_v23   ;;  %v188_v25 = vld [vmem:[%s400_s0 + $0xc8] sm:$0x3f]   ;;  %v190_v26 = vld [vmem:[%s400_s0 + $0xd0] sm:$0xff]  }
   0xe   :  { %187 = vst.msk [vmem:[%s401_s1 + $0xa8] sm:$0xff] %vm3_vm0, %v186_v24   ;;  %189 = vst.msk [vmem:[%s401_s1 + $0xb0] sm:$0x3f] %vm3_vm0, %v188_v25   ;;  %v192_v27 = vld [vmem:[%s400_s0 + $0xd8] sm:$0x3f]  }
   0xf   :  { %191 = vst.msk [vmem:[%s401_s1 + $0xb6] sm:$0xff] %vm3_vm0, %v190_v26   ;;  %193 = vst.msk [vmem:[%s401_s1 + $0xbe] sm:$0x3f] %vm3_vm0, %v192_v27  }

// kernel: tile.5
= control target key start
LH: loop header
LB: loop body
LE: loop exit
PB: predicated region body
PF: predicated region fallthrough
CT: control target
= control target key end

     0   :  { %s67_s8 = smov 112   ;;  %s68_s11 = smov 80   ;;  %vm3_vm0 = vcmask 130048   ;;  %vm9_vm1 = vcmask 1048448   ;;  %vm15_vm2 = vcmask 917248   ;;  %vm21_vm3 = vcmask 786048   ;;  %s111_s0 = inlined_call_operand.vmem [shape: f32[32,16], index: 0, kind: input, shape index: {}]   ;;  %s112_s1 = inlined_call_operand.vmem [shape: f32[512], index: 1, kind: output, shape index: {}]  }
   0x1   :  { %v53_v0 = vld [vmem:[%s111_s0 + $0x7] ss:$8 sm:$0xf]   ;;  %v55_v1 = vld [vmem:[%s111_s0 + $0x5] ss:$8 sm:$0xf]  }
   0x2   :  { %7 = vrot.lane.b32.xlu0 %v53_v0, %s67_s8  ;;  %19 = vrot.lane.b32.xlu1 %v55_v1, %s68_s11  ;;  %v54_v2 = vld [vmem:[%s111_s0 + $0x6] ss:$8 sm:$0xf]   ;;  %v56_v3 = vld [vmem:[%s111_s0 + $0x4] ss:$8 sm:$0xf]  }
   0x3   :  { %s69_s16 = smov 96   ;;  %v2_v4 = vld [vmem:[%s111_s0] ss:$8 sm:$0xf]   ;;  %s70_s19 = smov 64   ;;  %vm27_vm4 = vcmask 654848  }
   0x4   :  { %v57_v5 = vld [vmem:[%s111_s0 + $0x3] ss:$8 sm:$0xf]   ;;  %4 = vst.msk [vmem:[#allocation0] sm:$0xf] %vm3_vm0, %v2_v4   ;;  %s71_s24 = smov 48  }
   0x5   :  { %v58_v6 = vld [vmem:[%s111_s0 + $0x2] ss:$8 sm:$0xf]   ;;  %s72_s25 = smov 32   ;;  %vm33_vm5 = vcmask 523648   ;;  %vm39_vm6 = vcmask 392448  }
   0x6   :  { %13 = vrot.lane.b32.xlu0 %v54_v2, %s69_s16  ;;  %25 = vrot.lane.b32.xlu1 %v56_v3, %s70_s19  ;;  %v59_v7 = vld [vmem:[%s111_s0 + $0x1] ss:$8 sm:$0xf]   ;;  %s73_s0 = smov 16   ;;  %vm45_vm7 = vcmask 261248  }
   0xa   :  { %31 = vrot.lane.b32.xlu0 %v57_v5, %s71_s24  ;;  %37 = vrot.lane.b32.xlu1 %v58_v6, %s72_s25 }
   0xe   :  { %43 = vrot.lane.b32.xlu0 %v59_v7, %s73_s0 }
  0x74   :  { %v8_v8 = vpop.permute.xlu0 %7   ;;  %v20_v9 = vpop.permute.xlu1 %19  }
  0x75   :  { %10 = vst.msk [vmem:[#allocation0] sm:$0xf] %vm9_vm1, %v8_v8  }
  0x78   :  { %v14_v10 = vpop.permute.xlu0 %13   ;;  %v26_v11 = vpop.permute.xlu1 %25  }
  0x79   :  { %16 = vst.msk [vmem:[#allocation0] sm:$0xf] %vm15_vm2, %v14_v10  }
  0x7a   :  { %22 = vst.msk [vmem:[#allocation0] sm:$0xf] %vm21_vm3, %v20_v9  }
  0x7b   :  { %28 = vst.msk [vmem:[#allocation0] sm:$0xf] %vm27_vm4, %v26_v11  }
  0x7c   :  { %v32_v12 = vpop.permute.xlu0 %31   ;;  %v38_v13 = vpop.permute.xlu1 %37  }
  0x7d   :  { %34 = vst.msk [vmem:[#allocation0] sm:$0xf] %vm33_vm5, %v32_v12  }
  0x7e   :  { %40 = vst.msk [vmem:[#allocation0] sm:$0xf] %vm39_vm6, %v38_v13  }
  0x80   :  { %v44_v14 = vpop.permute.xlu0 %43  }
  0x81   :  { %46 = vst.msk [vmem:[#allocation0] sm:$0xf] %vm45_vm7, %v44_v14  }
  0x88   :  { %v50_v15 = vld [vmem:[#allocation0] sm:$0xf] }
  0x89   :  { %52 = vst [vmem:[%s112_s1] sm:$0xf] %v50_v15 }

// kernel: convnet1_ws_forward.1
= control target key start
LH: loop header
LB: loop body
LE: loop exit
PB: predicated region body
PF: predicated region fallthrough
CT: control target
= control target key end

     0   :  { %s4664_s30 = smov 0   ;;  %s8109_s0 = inlined_call_operand.vmem [shape: f32[64,196], index: 0, kind: input, shape index: {}]   ;;  %s8110_s1 = inlined_call_operand.vmem [shape: f32[64,196], index: 1, kind: input, shape index: {}]   ;;  %s8111_s2 = inlined_call_operand.vmem [shape: f32[196,2048], index: 2, kind: input, shape index: {}]   ;;  %s8112_s3 = inlined_call_operand.vmem [shape: f32[1,2048], index: 3, kind: input, shape index: {}]   ;;  %s8113_s4 = inlined_call_operand.vmem [shape: f32[512,128], index: 4, kind: input, shape index: {}]   ;;  %s8114_s5 = inlined_call_operand.vmem [shape: f32[512,128], index: 5, kind: input, shape index: {}]   ;;  %s8115_s6 = inlined_call_operand.vmem [shape: f32[1,128], index: 6, kind: input, shape index: {}]   ;;  %s8116_s7 = inlined_call_operand.vmem [shape: f32[128,128], index: 7, kind: input, shape index: {}]   ;;  %s8117_s8 = inlined_call_operand.vmem [shape: f32[1,128], index: 8, kind: input, shape index: {}]   ;;  %s8118_s9 = inlined_call_operand.vmem [shape: f32[64,128], index: 9, kind: output, shape index: {}]  }
   0x1 LB: > { %s3269_s10 = sadd.s32 4294967295, %s4612_s30   ;;  %p3273_p0 = scmp.ge.s32.totalorder %s4612_s30, 1  ;;  %s4612_s30 = sphi %s4664_s30, %s19_s30  }
   0x2   : > { %p301_p1 = scmp.lt.s32.totalorder %s4612_s30, 3 }
   0x4   : > { %p302_p2 = pnand %p3273_p0, %p301_p1 }
   0x6   : > { %305 = sbr.rel (%p302_p2) target bundleno = 1156 (0x484), region = 56 }
   0xd   : > { %v365_v0 = vld [vmem:[%s8111_s2 + $0x8] sm:$0xff]  ;;  %v367_v2 = vld [vmem:[%s8111_s2 + $0x18] sm:$0xff]  ;;  %v364_v5 = vld [vmem:[%s8111_s2] sm:$0xff]  ;;  %s4859_s23 = sshll.u32 %s3269_s10, 2  ;;  %vm856_vm0 = vcmask 556032   ;;  %vm869_vm1 = vcmask 1043456  }
   0xe   : > { %v381_v1 = vld [vmem:[%s8111_s2 + $0x88] sm:$0xff]  ;;  %v383_v4 = vld [vmem:[%s8111_s2 + $0x98] sm:$0xff]  ;;  %v380_v6 = vld [vmem:[%s8111_s2 + $0x80] sm:$0xff]  ;;  %p345_p3 = scmp.lt.s32.totalorder %s4859_s23, 7 }
   0xf   : > { %v4681_v3 = vpack.c.bf16 %v381_v1, %v365_v0  ;;  %v4692_v7 = vpack.c.bf16 %v383_v4, %v367_v2  ;;  %v4694_v8 = vpack.c.bf16 %v380_v6, %v364_v5  ;;  %v366_v9 = vld [vmem:[%s8111_s2 + $0x10] sm:$0xff]  ;;  %v397_v11 = vld [vmem:[%s8111_s2 + $0x108] sm:$0xff]  ;;  %v399_v14 = vld [vmem:[%s8111_s2 + $0x118] sm:$0xff] }
  0x10   : > { %v382_v10 = vld [vmem:[%s8111_s2 + $0x90] sm:$0xff]  ;;  %v413_v13 = vld [vmem:[%s8111_s2 + $0x188] sm:$0xff]  ;;  %v415_v15 = vld [vmem:[%s8111_s2 + $0x198] sm:$0xff]  ;;  %s8708_s23 = smov (!%p345_p3, %s4859_s23), 7 }
  0x11   : > { %3619 = vmatprep.subr.bf16.mxu0 %v4681_v3  ;;  %v4706_v12 = vpack.c.bf16 %v382_v10, %v366_v9  ;;  %3667 = vmatprep.subr.bf16.mxu1 %v4692_v7  ;;  %v4719_v16 = vpack.c.bf16 %v413_v13, %v397_v11  ;;  %v4721_v17 = vpack.c.bf16 %v415_v15, %v399_v14  ;;  %v396_v18 = vld [vmem:[%s8111_s2 + $0x100] sm:$0xff]  ;;  %v398_v20 = vld [vmem:[%s8111_s2 + $0x110] sm:$0xff]  ;;  %v429_v23 = vld [vmem:[%s8111_s2 + $0x208] sm:$0xff]  ;;  %s3382_s14 = sshll.u32 %s8708_s23, 4  ;;  %s3281_s16 = sshll.u32 %s8708_s23, 3 }
  0x12   : > { %3621 = vmatpush1.bf16.msra.mxu0 %v4694_v8  ;;  %v412_v19 = vld [vmem:[%s8111_s2 + $0x180] sm:$0xff]  ;;  %v414_v22 = vld [vmem:[%s8111_s2 + $0x190] sm:$0xff]  ;;  %v445_v24 = vld [vmem:[%s8111_s2 + $0x288] sm:$0xff]  ;;  %s5008_s29 = scalar_lea.vmem %s8109_s0, %s3382_s14  ;;  %s6618_s20 = scalar_lea.vmem %s8110_s1, %s3382_s14 }
  0x13   : > { %3669 = vmatpush1.bf16.msra.mxu1 %v4706_v12  ;;  %v4733_v21 = vpack.c.bf16 %v412_v19, %v396_v18  ;;  %3623 = vmatprep.subr.bf16.mxu0 %v4719_v16  ;;  %v4746_v25 = vpack.c.bf16 %v414_v22, %v398_v20  ;;  %v4748_v26 = vpack.c.bf16 %v445_v24, %v429_v23  ;;  %v431_v27 = vld [vmem:[%s8111_s2 + $0x218] sm:$0xff]  ;;  %v428_v29 = vld [vmem:[%s8111_s2 + $0x200] sm:$0xff]  ;;  %v430_v32 = vld [vmem:[%s8111_s2 + $0x210] sm:$0xff]  ;;  %s362_s14 = scalar_lea.vmem %s8118_s9, %s3281_s16 }
  0x14   : > { %3671 = vmatprep.subr.bf16.mxu1 %v4721_v17  ;;  %v447_v28 = vld [vmem:[%s8111_s2 + $0x298] sm:$0xff]  ;;  %v444_v31 = vld [vmem:[%s8111_s2 + $0x280] sm:$0xff]  ;;  %v446_v33 = vld [vmem:[%s8111_s2 + $0x290] sm:$0xff] }
  0x15   : > { %v4759_v30 = vpack.c.bf16 %v447_v28, %v431_v27  ;;  %v4771_v34 = vpack.c.bf16 %v444_v31, %v428_v29  ;;  %v461_v35 = vld [vmem:[%s8111_s2 + $0x308] sm:$0xff]  ;;  %v463_v37 = vld [vmem:[%s8111_s2 + $0x318] sm:$0xff]  ;;  %v4784_v38 = vpack.c.bf16 %v446_v33, %v430_v32  ;;  %v460_v41 = vld [vmem:[%s8111_s2 + $0x300] sm:$0xff] }
  0x16   : > { %3625 = vmatpush1.bf16.msra.mxu0 %v4733_v21  ;;  %v477_v36 = vld [vmem:[%s8111_s2 + $0x388] sm:$0xff]  ;;  %v479_v40 = vld [vmem:[%s8111_s2 + $0x398] sm:$0xff]  ;;  %v476_v42 = vld [vmem:[%s8111_s2 + $0x380] sm:$0xff] }
  0x17   : > { %3673 = vmatpush1.bf16.msra.mxu1 %v4746_v25  ;;  %3627 = vmatprep.subr.bf16.mxu0 %v4748_v26  ;;  %v4786_v39 = vpack.c.bf16 %v477_v36, %v461_v35  ;;  %v4798_v43 = vpack.c.bf16 %v479_v40, %v463_v37  ;;  %v462_v44 = vld [vmem:[%s8111_s2 + $0x310] sm:$0xff]  ;;  %v493_v46 = vld [vmem:[%s8111_s2 + $0x408] sm:$0xff]  ;;  %v495_v48 = vld [vmem:[%s8111_s2 + $0x418] sm:$0xff]  ;;  %v4819_v50 = vpack.c.bf16 %v476_v42, %v460_v41 }
  0x18   : > { %3675 = vmatprep.subr.bf16.mxu1 %v4759_v30  ;;  %v478_v45 = vld [vmem:[%s8111_s2 + $0x390] sm:$0xff]  ;;  %v509_v47 = vld [vmem:[%s8111_s2 + $0x488] sm:$0xff]  ;;  %v511_v49 = vld [vmem:[%s8111_s2 + $0x498] sm:$0xff] }
  0x19   : > { %v4823_v51 = vpack.c.bf16 %v478_v45, %v462_v44  ;;  %v4825_v52 = vpack.c.bf16 %v509_v47, %v493_v46  ;;  %v492_v53 = vld [vmem:[%s8111_s2 + $0x400] sm:$0xff]  ;;  %v494_v55 = vld [vmem:[%s8111_s2 + $0x410] sm:$0xff]  ;;  %v4837_v56 = vpack.c.bf16 %v511_v49, %v495_v48  ;;  %v525_v58 = vld [vmem:[%s8111_s2 + $0x508] sm:$0xff] }
  0x1a   : > { %3629 = vmatpush1.bf16.msra.mxu0 %v4771_v34  ;;  %v508_v54 = vld [vmem:[%s8111_s2 + $0x480] sm:$0xff]  ;;  %v510_v57 = vld [vmem:[%s8111_s2 + $0x490] sm:$0xff]  ;;  %v541_v59 = vld [vmem:[%s8111_s2 + $0x588] sm:$0xff] }
  0x1b   : > { %3677 = vmatpush1.bf16.msra.mxu1 %v4784_v38  ;;  %3631 = vmatprep.subr.bf16.mxu0 %v4786_v39  ;;  %v527_v60 = vld [vmem:[%s8111_s2 + $0x518] sm:$0xff]  ;;  %v4855_v62 = vpack.c.bf16 %v508_v54, %v492_v53  ;;  %v4863_v63 = vpack.c.bf16 %v510_v57, %v494_v55  ;;  %v4865_v0 = vpack.c.bf16 %v541_v59, %v525_v58  ;;  %v524_v1 = vld [vmem:[%s8111_s2 + $0x500] sm:$0xff]  ;;  %v526_v4 = vld [vmem:[%s8111_s2 + $0x510] sm:$0xff] }
  0x1c   : > { %3679 = vmatprep.subr.bf16.mxu1 %v4798_v43  ;;  %v543_v61 = vld [vmem:[%s8111_s2 + $0x598] sm:$0xff]  ;;  %v540_v2 = vld [vmem:[%s8111_s2 + $0x580] sm:$0xff]  ;;  %v542_v6 = vld [vmem:[%s8111_s2 + $0x590] sm:$0xff] }
  0x1d   : > { %v4877_v5 = vpack.c.bf16 %v543_v61, %v527_v60  ;;  %v557_v9 = vld [vmem:[%s8111_s2 + $0x608] sm:$0xff]  ;;  %v559_v11 = vld [vmem:[%s8111_s2 + $0x618] sm:$0xff]  ;;  %v4896_v14 = vpack.c.bf16 %v540_v2, %v524_v1  ;;  %v4900_v15 = vpack.c.bf16 %v542_v6, %v526_v4  ;;  %v556_v19 = vld [vmem:[%s8111_s2 + $0x600] sm:$0xff] }
  0x1e   : > { %3633 = vmatpush1.bf16.msra.mxu0 %v4819_v50  ;;  %v573_v10 = vld [vmem:[%s8111_s2 + $0x688] sm:$0xff]  ;;  %v575_v13 = vld [vmem:[%s8111_s2 + $0x698] sm:$0xff]  ;;  %v572_v20 = vld [vmem:[%s8111_s2 + $0x680] sm:$0xff] }
  0x1f   : > { %3681 = vmatpush1.bf16.msra.mxu1 %v4823_v51  ;;  %3635 = vmatprep.subr.bf16.mxu0 %v4825_v52  ;;  %v4902_v18 = vpack.c.bf16 %v573_v10, %v557_v9  ;;  %v558_v22 = vld [vmem:[%s8111_s2 + $0x610] sm:$0xff]  ;;  %v4914_v23 = vpack.c.bf16 %v575_v13, %v559_v11  ;;  %v589_v27 = vld [vmem:[%s8111_s2 + $0x708] sm:$0xff]  ;;  %v591_v29 = vld [vmem:[%s8111_s2 + $0x718] sm:$0xff]  ;;  %v4937_v32 = vpack.c.bf16 %v572_v20, %v556_v19 }
  0x20   : > { %3683 = vmatprep.subr.bf16.mxu1 %v4837_v56  ;;  %v574_v24 = vld [vmem:[%s8111_s2 + $0x690] sm:$0xff]  ;;  %v605_v28 = vld [vmem:[%s8111_s2 + $0x788] sm:$0xff]  ;;  %v607_v31 = vld [vmem:[%s8111_s2 + $0x798] sm:$0xff] }
  0x21   : > { %v4941_v33 = vpack.c.bf16 %v574_v24, %v558_v22  ;;  %v4943_v35 = vpack.c.bf16 %v605_v28, %v589_v27  ;;  %v588_v36 = vld [vmem:[%s8111_s2 + $0x700] sm:$0xff]  ;;  %v590_v40 = vld [vmem:[%s8111_s2 + $0x710] sm:$0xff]  ;;  %v4955_v41 = vpack.c.bf16 %v607_v31, %v591_v29  ;;  %v621_v44 = vld [vmem:[%s8111_s2 + $0x808] sm:$0xff] }
  0x22   : > { %3637 = vmatpush1.bf16.msra.mxu0 %v4855_v62  ;;  %v604_v37 = vld [vmem:[%s8111_s2 + $0x780] sm:$0xff]  ;;  %v606_v42 = vld [vmem:[%s8111_s2 + $0x790] sm:$0xff]  ;;  %v637_v45 = vld [vmem:[%s8111_s2 + $0x888] sm:$0xff] }
  0x23   : > { %3685 = vmatpush1.bf16.msra.mxu1 %v4863_v63  ;;  %3639 = vmatprep.subr.bf16.mxu0 %v4865_v0  ;;  %v623_v46 = vld [vmem:[%s8111_s2 + $0x818] sm:$0xff]  ;;  %v4974_v48 = vpack.c.bf16 %v604_v37, %v588_v36  ;;  %v4978_v49 = vpack.c.bf16 %v606_v42, %v590_v40  ;;  %v4980_v53 = vpack.c.bf16 %v637_v45, %v621_v44  ;;  %v620_v54 = vld [vmem:[%s8111_s2 + $0x800] sm:$0xff]  ;;  %v622_v57 = vld [vmem:[%s8111_s2 + $0x810] sm:$0xff] }
  0x24   : > { %3687 = vmatprep.subr.bf16.mxu1 %v4877_v5  ;;  %v639_v47 = vld [vmem:[%s8111_s2 + $0x898] sm:$0xff]  ;;  %v636_v55 = vld [vmem:[%s8111_s2 + $0x880] sm:$0xff]  ;;  %v638_v59 = vld [vmem:[%s8111_s2 + $0x890] sm:$0xff] }
  0x25   : > { %v4992_v58 = vpack.c.bf16 %v639_v47, %v623_v46  ;;  %v653_v60 = vld [vmem:[%s8111_s2 + $0x908] sm:$0xff]  ;;  %v655_v1 = vld [vmem:[%s8111_s2 + $0x918] sm:$0xff]  ;;  %v5017_v4 = vpack.c.bf16 %v636_v55, %v620_v54  ;;  %v652_v6 = vld [vmem:[%s8111_s2 + $0x900] sm:$0xff]  ;;  %v5024_v9 = vpack.c.bf16 %v638_v59, %v622_v57 }
  0x26   : > { %3641 = vmatpush1.bf16.msra.mxu0 %v4896_v14  ;;  %v669_v61 = vld [vmem:[%s8111_s2 + $0x988] sm:$0xff]  ;;  %v671_v2 = vld [vmem:[%s8111_s2 + $0x998] sm:$0xff]  ;;  %v668_v11 = vld [vmem:[%s8111_s2 + $0x980] sm:$0xff] }
  0x27   : > { %3689 = vmatpush1.bf16.msra.mxu1 %v4900_v15  ;;  %3643 = vmatprep.subr.bf16.mxu0 %v4902_v18  ;;  %v5026_v10 = vpack.c.bf16 %v669_v61, %v653_v60  ;;  %v654_v13 = vld [vmem:[%s8111_s2 + $0x910] sm:$0xff]  ;;  %v5035_v19 = vld [vmem:[%s5008_s29 + $0x8] sm:$0xff]  ;;  %v5038_v20 = vpack.c.bf16 %v671_v2, %v655_v1  ;;  %v687_v28 = vld [vmem:[%s8111_s2 + $0xa18] sm:$0xff]  ;;  %v5060_v31 = vpack.c.bf16 %v668_v11, %v652_v6 }
  0x28   : > { %3691 = vmatprep.subr.bf16.mxu1 %v4914_v23  ;;  %v670_v22 = vld [vmem:[%s8111_s2 + $0x990] sm:$0xff]  ;;  %v685_v24 = vld [vmem:[%s8111_s2 + $0xa08] sm:$0xff]  ;;  %3284 = vmatprep.mubr.msk.f32.mxu0 %vm856_vm0, %v5035_v19  ;;  %v703_v29 = vld [vmem:[%s8111_s2 + $0xa98] sm:$0xff] }
  0x29   : > { %8306 = vst [vmem:[#allocation2_spill] sm:$0xff] %v5038_v20  ;;  %v701_v27 = vld [vmem:[%s8111_s2 + $0xa88] sm:$0xff]  ;;  %3290 = vmatprep.mubr.msk.f32.mxu1 %vm856_vm0, %v5035_v19  ;;  %8307 = vst [vmem:[#allocation3_spill] sm:$0xff] %v5060_v31  ;;  %v5064_v36 = vpack.c.bf16 %v670_v22, %v654_v13  ;;  %v684_v40 = vld [vmem:[%s8111_s2 + $0xa00] sm:$0xff]  ;;  %v5078_v45 = vpack.c.bf16 %v703_v29, %v687_v28 }
  0x2a   : > { %3645 = vmatpush1.bf16.msra.mxu0 %v4937_v32  ;;  %v5066_v37 = vpack.c.bf16 %v701_v27, %v685_v24  ;;  %v700_v42 = vld [vmem:[%s8111_s2 + $0xa80] sm:$0xff]  ;;  %v686_v44 = vld [vmem:[%s8111_s2 + $0xa10] sm:$0xff]  ;;  %v717_v47 = vld [vmem:[%s8111_s2 + $0xb08] sm:$0xff] }
  0x2b   : > { %3693 = vmatpush1.bf16.msra.mxu1 %v4941_v33  ;;  %3647 = vmatprep.subr.bf16.mxu0 %v4943_v35  ;;  %8308 = vst [vmem:[#allocation4_spill] sm:$0xff] %v5064_v36  ;;  %8310 = vst [vmem:[#allocation6_spill] sm:$0xff] %v5078_v45  ;;  %v702_v46 = vld [vmem:[%s8111_s2 + $0xa90] sm:$0xff]  ;;  %v733_v54 = vld [vmem:[%s8111_s2 + $0xb88] sm:$0xff]  ;;  %v5096_v59 = vpack.c.bf16 %v700_v42, %v684_v40 }
  0x2c   : > { %3695 = vmatprep.subr.bf16.mxu1 %v4955_v41  ;;  %8309 = vst [vmem:[#allocation5_spill] sm:$0xff] %v5066_v37  ;;  %v719_v55 = vld [vmem:[%s8111_s2 + $0xb18] sm:$0xff]  ;;  %v5100_v60 = vpack.c.bf16 %v702_v46, %v686_v44  ;;  %v5102_v61 = vpack.c.bf16 %v733_v54, %v717_v47  ;;  %v716_v1 = vld [vmem:[%s8111_s2 + $0xb00] sm:$0xff]  ;;  %v718_v11 = vld [vmem:[%s8111_s2 + $0xb10] sm:$0xff] }
  0x2d   : > { %v735_v57 = vld [vmem:[%s8111_s2 + $0xb98] sm:$0xff]  ;;  %8311 = vst [vmem:[#allocation7_spill] sm:$0xff] %v5096_v59  ;;  %v732_v2 = vld [vmem:[%s8111_s2 + $0xb80] sm:$0xff]  ;;  %v734_v13 = vld [vmem:[%s8111_s2 + $0xb90] sm:$0xff] }
  0x2e   : > { %3649 = vmatpush1.bf16.msra.mxu0 %v4974_v48  ;;  %8312 = vst [vmem:[#allocation8_spill] sm:$0xff] %v5100_v60  ;;  %8313 = vst [vmem:[#allocation9_spill] sm:$0xff] %v5102_v61  ;;  %v5111_v6 = vpack.c.bf16 %v735_v57, %v719_v55  ;;  %v5120_v22 = vpack.c.bf16 %v732_v2, %v716_v1  ;;  %v5124_v24 = vpack.c.bf16 %v734_v13, %v718_v11  ;;  %v749_v27 = vld [vmem:[%s8111_s2 + $0xc08] sm:$0xf]  ;;  %v751_v28 = vld [vmem:[%s8111_s2 + $0xc18] sm:$0xf] }
  0x2f   : > { %3697 = vmatpush1.bf16.msra.mxu1 %v4978_v49  ;;  %3651 = vmatprep.subr.bf16.mxu0 %v4980_v53  ;;  %v369_v29 = vld [vmem:[%s8111_s2 + $0x28] sm:$0xff]  ;;  %v748_v40 = vld [vmem:[%s8111_s2 + $0xc00] sm:$0xf]  ;;  %v371_v44 = vld [vmem:[%s8111_s2 + $0x38] sm:$0xff] }
  0x30   : > { %3699 = vmatprep.subr.bf16.mxu1 %v4992_v58  ;;  %8314 = vst [vmem:[#allocation10_spill] sm:$0xff] %v5111_v6  ;;  %8315 = vst [vmem:[#allocation11_spill] sm:$0xff] %v5120_v22  ;;  %v385_v42 = vld [vmem:[%s8111_s2 + $0xa8] sm:$0xff]  ;;  %v387_v46 = vld [vmem:[%s8111_s2 + $0xb8] sm:$0xff] }
  0x31   : > { %8316 = vst [vmem:[#allocation12_spill] sm:$0xff] %v5124_v24  ;;  %v750_v47 = vld [vmem:[%s8111_s2 + $0xc10] sm:$0xf]  ;;  %v368_v54 = vld [vmem:[%s8111_s2 + $0x20] sm:$0xff]  ;;  %v401_v2 = vld [vmem:[%s8111_s2 + $0x128] sm:$0xff] }
  0x32   : > { %3653 = vmatpush1.bf16.msra.mxu0 %v5017_v4  ;;  %v384_v55 = vld [vmem:[%s8111_s2 + $0xa0] sm:$0xff]  ;;  %v370_v57 = vld [vmem:[%s8111_s2 + $0x30] sm:$0xff]  ;;  %v417_v11 = vld [vmem:[%s8111_s2 + $0x1a8] sm:$0xff] }
  0x33   : > { %3701 = vmatpush1.bf16.msra.mxu1 %v5024_v9  ;;  %3655 = vmatprep.subr.bf16.mxu0 %v5026_v10  ;;  %v386_v1 = vld [vmem:[%s8111_s2 + $0xb0] sm:$0xff]  ;;  %v5174_v13 = vld [vmem:[%s5008_s29] sm:$0xff] }
  0x34   : > { %3703 = vmatprep.subr.bf16.mxu1 %v5038_v20 }
  0x36   : > { %3657 = vmatpush1.bf16.msra.mxu0 %v5060_v31 }
  0x37   : > { %3705 = vmatpush1.bf16.msra.mxu1 %v5064_v36  ;;  %3659 = vmatprep.subr.bf16.mxu0 %v5066_v37  ;;  %v528_v37 = vld [vmem:[%s8111_s2 + $0x520] sm:$0xff] }
  0x38   : > { %3707 = vmatprep.subr.bf16.mxu1 %v5078_v45  ;;  %v608_v36 = vld [vmem:[%s8111_s2 + $0x7a0] sm:$0xff] }
  0x3a   : > { %3661 = vmatpush1.bf16.msra.mxu0 %v5096_v59 }
  0x3b   : > { %3709 = vmatpush1.bf16.msra.mxu1 %v5100_v60  ;;  %3663 = vmatprep.subr.bf16.mxu0 %v5102_v61  ;;  %v5186_v61 = vpack.c.bf16 %v384_v55, %v368_v54  ;;  %v5189_v60 = vpack.c.bf16 %v386_v1, %v370_v57  ;;  %v433_v54 = vld [vmem:[%s8111_s2 + $0x228] sm:$0xff] }
  0x3c   : > { %3711 = vmatprep.subr.bf16.mxu1 %v5111_v6  ;;  %v419_v6 = vld [vmem:[%s8111_s2 + $0x1b8] sm:$0xff]  ;;  %v449_v55 = vld [vmem:[%s8111_s2 + $0x2a8] sm:$0xff] }
  0x3d   : > { %8319 = vst [vmem:[#allocation15_spill] sm:$0xff] %v5186_v61  ;;  %8320 = vst [vmem:[#allocation16_spill] sm:$0xff] %v5189_v60 }
  0x3e   : > { %3665 = vmatpush1.bf16.msra.mxu0 %v5120_v22  ;;  %v5176_v22 = vpack.c.bf16 %v385_v42, %v369_v29  ;;  %v400_v29 = vld [vmem:[%s8111_s2 + $0x120] sm:$0xff] }
  0x3f   : > { %3713 = vmatpush1.bf16.msra.mxu1 %v5124_v24  ;;  %3282 = vmatprep.subr.msk.mxu0 %vm869_vm1, %v749_v27  ;;  %v5178_v24 = vpack.c.bf16 %v387_v46, %v371_v44  ;;  %v403_v27 = vld [vmem:[%s8111_s2 + $0x138] sm:$0xff]  ;;  %v416_v42 = vld [vmem:[%s8111_s2 + $0x1a0] sm:$0xff]  ;;  %v402_v44 = vld [vmem:[%s8111_s2 + $0x130] sm:$0xff] }
  0x40   : > { %3288 = vmatprep.subr.msk.mxu1 %vm869_vm1, %v751_v28  ;;  %8317 = vst [vmem:[#allocation13_spill] sm:$0xff] %v5176_v22  ;;  %v5191_v28 = vpack.c.bf16 %v417_v11, %v401_v2  ;;  %v418_v46 = vld [vmem:[%s8111_s2 + $0x1b0] sm:$0xff]  ;;  %v5225_v57 = vpack.c.bf16 %v416_v42, %v400_v29  ;;  %v5231_v2 = vpack.c.bf16 %v449_v55, %v433_v54  ;;  %v432_v11 = vld [vmem:[%s8111_s2 + $0x220] sm:$0xff]  ;;  %v481_v54 = vld [vmem:[%s8111_s2 + $0x3a8] sm:$0xff] }
  0x41   : > { %8318 = vst [vmem:[#allocation14_spill] sm:$0xff] %v5178_v24  ;;  %v5229_v1 = vpack.c.bf16 %v418_v46, %v402_v44  ;;  %v434_v29 = vld [vmem:[%s8111_s2 + $0x230] sm:$0xff]  ;;  %v465_v46 = vld [vmem:[%s8111_s2 + $0x328] sm:$0xff]  ;;  %v467_v55 = vld [vmem:[%s8111_s2 + $0x338] sm:$0xff] }
  0x42   : > { %3283 = vmatpush1.msk.msra.mxu0 %vm869_vm1, %v748_v40  ;;  %8321 = vst [vmem:[#allocation17_spill] sm:$0xff] %v5191_v28  ;;  %v5204_v40 = vpack.c.bf16 %v419_v6, %v403_v27  ;;  %v435_v6 = vld [vmem:[%s8111_s2 + $0x238] sm:$0xff]  ;;  %8323 = vst [vmem:[#allocation19_spill] sm:$0xff] %v5225_v57  ;;  %v448_v27 = vld [vmem:[%s8111_s2 + $0x2a0] sm:$0xff] }
  0x43   : > { %3289 = vmatpush1.msk.msra.mxu1 %vm869_vm1, %v750_v47  ;;  %983 = vmatmul.mubr.f32.vlgmr.msra.gmra.mrb[0].mxu0 %v5174_v13  ;;  %v451_v47 = vld [vmem:[%s8111_s2 + $0x2b8] sm:$0xff]  ;;  %8324 = vst [vmem:[#allocation20_spill] sm:$0xff] %v5229_v1  ;;  %8325 = vst [vmem:[#allocation21_spill] sm:$0xff] %v5231_v2  ;;  %v450_v44 = vld [vmem:[%s8111_s2 + $0x2b0] sm:$0xff] }
  0x44   : > { %8322 = vst [vmem:[#allocation18_spill] sm:$0xff] %v5204_v40  ;;  %3715 = vmatprep.subr.bf16.mxu0 %v5176_v22  ;;  %3763 = vmatprep.subr.bf16.mxu1 %v5178_v24  ;;  %v5243_v42 = vpack.c.bf16 %v451_v47, %v435_v6  ;;  %v483_v6 = vld [vmem:[%s8111_s2 + $0x3b8] sm:$0xff]  ;;  %v5261_v47 = vpack.c.bf16 %v448_v27, %v432_v11  ;;  %v480_v11 = vld [vmem:[%s8111_s2 + $0x3a0] sm:$0xff]  ;;  %v466_v27 = vld [vmem:[%s8111_s2 + $0x330] sm:$0xff] }
  0x45   : > { %1072 = vmatmul.mubr.f32.vlgmr.msra.gmra.mrb[0].mxu1 %v5174_v13  ;;  %3717 = vmatpush1.bf16.msra.mxu0 %v5186_v61  ;;  %v5273_v61 = vpack.c.bf16 %v481_v54, %v465_v46  ;;  %v5296_v46 = vld [vmem:[%s5008_s29 + $0x10] sm:$0xff]  ;;  %v499_v54 = vld [vmem:[%s8111_s2 + $0x438] sm:$0xff] }
  0x46   : > { %3765 = vmatpush1.bf16.msra.mxu1 %v5189_v60  ;;  %3719 = vmatprep.subr.bf16.mxu0 %v5191_v28  ;;  %8326 = vst [vmem:[#allocation22_spill] sm:$0xff] %v5243_v42  ;;  %8327 = vst [vmem:[#allocation23_spill] sm:$0xff] %v5261_v47  ;;  %v5267_v28 = vld [vmem:[%s5008_s29 + $0x18] sm:$0xff]  ;;  %v5271_v60 = vpack.c.bf16 %v450_v44, %v434_v29  ;;  %v497_v29 = vld [vmem:[%s8111_s2 + $0x428] sm:$0xff] }
  0x47   : > { %3767 = vmatprep.subr.bf16.mxu1 %v5204_v40  ;;  %v464_v40 = vld [vmem:[%s8111_s2 + $0x320] sm:$0xff]  ;;  %8329 = vst [vmem:[#allocation25_spill] sm:$0xff] %v5273_v61  ;;  %v513_v44 = vld [vmem:[%s8111_s2 + $0x4a8] sm:$0xff]  ;;  %3285 = vmatprep.mubr.msk.f32.mxu0 %vm856_vm0, %v5267_v28 }
  0x48   : > { %8328 = vst [vmem:[#allocation24_spill] sm:$0xff] %v5271_v60  ;;  %3291 = vmatprep.mubr.msk.f32.mxu1 %vm856_vm0, %v5267_v28  ;;  %989 = vmatmul.mubr.f32.gmra.mrb[2].mxu0 %v5296_v46  ;;  %v5321_v22 = vpack.c.bf16 %v513_v44, %v497_v29  ;;  %v545_v29 = vld [vmem:[%s8111_s2 + $0x5a8] sm:$0xff]  ;;  %v531_v44 = vld [vmem:[%s8111_s2 + $0x538] sm:$0xff] }
  0x49   : > { %3721 = vmatpush1.bf16.msra.mxu0 %v5225_v57  ;;  %v482_v57 = vld [vmem:[%s8111_s2 + $0x3b0] sm:$0xff]  ;;  %1078 = vmatmul.mubr.f32.gmra.mrb[2].mxu1 %v5296_v46 }
  0x4a   : > { %3769 = vmatpush1.bf16.msra.mxu1 %v5229_v1  ;;  %3723 = vmatprep.subr.bf16.mxu0 %v5231_v2  ;;  %v5285_v2 = vpack.c.bf16 %v483_v6, %v467_v55  ;;  %v515_v55 = vld [vmem:[%s8111_s2 + $0x4b8] sm:$0xff]  ;;  %v5308_v6 = vld [vmem:[%s5008_s29 + $0x28] sm:$0xff]  ;;  %v496_v1 = vld [vmem:[%s8111_s2 + $0x420] sm:$0xff]  ;;  %v5319_v24 = vpack.c.bf16 %v482_v57, %v466_v27  ;;  %8333 = vst [vmem:[#allocation29_spill] sm:$0xff] %v5321_v22 }
  0x4b   : > { %3771 = vmatprep.subr.bf16.mxu1 %v5243_v42  ;;  %v5311_v42 = vpack.c.bf16 %v480_v11, %v464_v40  ;;  %v512_v40 = vld [vmem:[%s8111_s2 + $0x4a0] sm:$0xff]  ;;  %v498_v11 = vld [vmem:[%s8111_s2 + $0x430] sm:$0xff]  ;;  %v529_v27 = vld [vmem:[%s8111_s2 + $0x528] sm:$0xff]  ;;  %3286 = vmatprep.mubr.msk.f32.mxu0 %vm856_vm0, %v5308_v6 }
  0x4c   : > { %8330 = vst [vmem:[#allocation26_spill] sm:$0xff] %v5285_v2  ;;  %8332 = vst [vmem:[#allocation28_spill] sm:$0xff] %v5319_v24  ;;  %v514_v57 = vld [vmem:[%s8111_s2 + $0x4b0] sm:$0xff]  ;;  %3292 = vmatprep.mubr.msk.f32.mxu1 %vm856_vm0, %v5308_v6  ;;  %v5369_v45 = vpack.c.bf16 %v545_v29, %v529_v27  ;;  %v577_v27 = vld [vmem:[%s8111_s2 + $0x6a8] sm:$0xff] }
  0x4d   : > { %3725 = vmatpush1.bf16.msra.mxu0 %v5261_v47  ;;  %8331 = vst [vmem:[#allocation27_spill] sm:$0xff] %v5311_v42  ;;  %v5330_v47 = vld [vmem:[%s5008_s29 + $0x20] sm:$0xff]  ;;  %v5367_v59 = vpack.c.bf16 %v514_v57, %v498_v11  ;;  %v546_v11 = vld [vmem:[%s8111_s2 + $0x5b0] sm:$0xff]  ;;  %v561_v57 = vld [vmem:[%s8111_s2 + $0x628] sm:$0xff] }
  0x4e   : > { %3773 = vmatpush1.bf16.msra.mxu1 %v5271_v60  ;;  %3727 = vmatprep.subr.bf16.mxu0 %v5273_v61  ;;  %v5333_v60 = vpack.c.bf16 %v515_v55, %v499_v54  ;;  %v547_v54 = vld [vmem:[%s8111_s2 + $0x5b8] sm:$0xff]  ;;  %v5363_v61 = vld [vmem:[%s5008_s29 + $0x30] sm:$0xff]  ;;  %8337 = vst [vmem:[#allocation33_spill] sm:$0xff] %v5369_v45 }
  0x4f   : > { %3775 = vmatprep.subr.bf16.mxu1 %v5285_v2  ;;  %995 = vmatmul.mubr.f32.gmra.mrb[4].mxu0 %v5330_v47  ;;  %v5356_v55 = vld [vmem:[%s5008_s29 + $0x38] sm:$0xff]  ;;  %v5359_v2 = vpack.c.bf16 %v512_v40, %v496_v1  ;;  %8336 = vst [vmem:[#allocation32_spill] sm:$0xff] %v5367_v59  ;;  %v544_v1 = vld [vmem:[%s8111_s2 + $0x5a0] sm:$0xff]  ;;  %v530_v40 = vld [vmem:[%s8111_s2 + $0x530] sm:$0xff] }
  0x50   : > { %8334 = vst [vmem:[#allocation30_spill] sm:$0xff] %v5333_v60  ;;  %1084 = vmatmul.mubr.f32.gmra.mrb[4].mxu1 %v5330_v47  ;;  %3287 = vmatprep.mubr.msk.f32.mxu0 %vm856_vm0, %v5356_v55  ;;  %v563_v29 = vld [vmem:[%s8111_s2 + $0x638] sm:$0xff] }
  0x51   : > { %3729 = vmatpush1.bf16.msra.mxu0 %v5311_v42  ;;  %8335 = vst [vmem:[#allocation31_spill] sm:$0xff] %v5359_v2  ;;  %3293 = vmatprep.mubr.msk.f32.mxu1 %vm856_vm0, %v5356_v55  ;;  %v560_v42 = vld [vmem:[%s8111_s2 + $0x620] sm:$0xff] }
  0x52   : > { %3777 = vmatpush1.bf16.msra.mxu1 %v5319_v24  ;;  %3731 = vmatprep.subr.bf16.mxu0 %v5321_v22  ;;  %v5381_v24 = vpack.c.bf16 %v547_v54, %v531_v44  ;;  %v579_v44 = vld [vmem:[%s8111_s2 + $0x6b8] sm:$0xff]  ;;  %v5404_v54 = vpack.c.bf16 %v544_v1, %v528_v37  ;;  %v5411_v22 = vpack.c.bf16 %v577_v27, %v561_v57  ;;  %v562_v37 = vld [vmem:[%s8111_s2 + $0x630] sm:$0xff]  ;;  %v609_v57 = vld [vmem:[%s8111_s2 + $0x7a8] sm:$0xff] }
  0x53   : > { %3779 = vmatprep.subr.bf16.mxu1 %v5333_v60  ;;  %1001 = vmatmul.mubr.f32.gmra.mrb[6].mxu0 %v5363_v61  ;;  %v5409_v60 = vpack.c.bf16 %v546_v11, %v530_v40  ;;  %v5423_v1 = vpack.c.bf16 %v579_v44, %v563_v29  ;;  %v578_v40 = vld [vmem:[%s8111_s2 + $0x6b0] sm:$0xff]  ;;  %v593_v11 = vld [vmem:[%s8111_s2 + $0x728] sm:$0xff]  ;;  %v595_v27 = vld [vmem:[%s8111_s2 + $0x738] sm:$0xff] }
  0x54   : > { %8338 = vst [vmem:[#allocation34_spill] sm:$0xff] %v5381_v24  ;;  %8339 = vst [vmem:[#allocation35_spill] sm:$0xff] %v5404_v54  ;;  %1090 = vmatmul.mubr.f32.gmra.mrb[6].mxu1 %v5363_v61  ;;  %3296 = vmatprep.mubr.msk.f32.mxu0 %vm856_vm0, %v5035_v19  ;;  %v611_v29 = vld [vmem:[%s8111_s2 + $0x7b8] sm:$0xff] }
  0x55   : > { %3733 = vmatpush1.bf16.msra.mxu0 %v5359_v2  ;;  %8340 = vst [vmem:[#allocation36_spill] sm:$0xff] %v5409_v60  ;;  %8341 = vst [vmem:[#allocation37_spill] sm:$0xff] %v5411_v22  ;;  %v576_v2 = vld [vmem:[%s8111_s2 + $0x6a0] sm:$0xff]  ;;  %3302 = vmatprep.mubr.msk.f32.mxu1 %vm856_vm0, %v5035_v19 }
  0x56   : > { %3781 = vmatpush1.bf16.msra.mxu1 %v5367_v59  ;;  %3735 = vmatprep.subr.bf16.mxu0 %v5369_v45  ;;  %8342 = vst [vmem:[#allocation38_spill] sm:$0xff] %v5423_v1  ;;  %v5445_v44 = vpack.c.bf16 %v576_v2, %v560_v42  ;;  %v5451_v45 = vpack.c.bf16 %v609_v57, %v593_v11  ;;  %v592_v59 = vld [vmem:[%s8111_s2 + $0x720] sm:$0xff]  ;;  %v594_v2 = vld [vmem:[%s8111_s2 + $0x730] sm:$0xff]  ;;  %v641_v11 = vld [vmem:[%s8111_s2 + $0x8a8] sm:$0xff] }
  0x57   : > { %3783 = vmatprep.subr.bf16.mxu1 %v5381_v24  ;;  %v5449_v24 = vpack.c.bf16 %v578_v40, %v562_v37  ;;  %v5463_v42 = vpack.c.bf16 %v611_v29, %v595_v27  ;;  %v610_v37 = vld [vmem:[%s8111_s2 + $0x7b0] sm:$0xff]  ;;  %v625_v40 = vld [vmem:[%s8111_s2 + $0x828] sm:$0xff]  ;;  %v627_v57 = vld [vmem:[%s8111_s2 + $0x838] sm:$0xff]  ;;  %v5481_v29 = vpack.c.bf16 %v608_v36, %v592_v59 }
  0x58   : > { %8343 = vst [vmem:[#allocation39_spill] sm:$0xff] %v5445_v44  ;;  %8345 = vst [vmem:[#allocation41_spill] sm:$0xff] %v5451_v45  ;;  %v643_v27 = vld [vmem:[%s8111_s2 + $0x8b8] sm:$0xff]  ;;  %v626_v36 = vld [vmem:[%s8111_s2 + $0x830] sm:$0xff] }
  0x59   : > { %3737 = vmatpush1.bf16.msra.mxu0 %v5404_v54  ;;  %8344 = vst [vmem:[#allocation40_spill] sm:$0xff] %v5449_v24  ;;  %8346 = vst [vmem:[#allocation42_spill] sm:$0xff] %v5463_v42  ;;  %v640_v54 = vld [vmem:[%s8111_s2 + $0x8a0] sm:$0xff]  ;;  %v5499_v59 = vpack.c.bf16 %v643_v27, %v627_v57  ;;  %v675_v57 = vld [vmem:[%s8111_s2 + $0x9b8] sm:$0xff] }
  0x5a   : > { %3785 = vmatpush1.bf16.msra.mxu1 %v5409_v60  ;;  %3739 = vmatprep.subr.bf16.mxu0 %v5411_v22  ;;  %8347 = vst [vmem:[#allocation43_spill] sm:$0xff] %v5481_v29  ;;  %v5487_v22 = vpack.c.bf16 %v641_v11, %v625_v40  ;;  %v624_v60 = vld [vmem:[%s8111_s2 + $0x820] sm:$0xff]  ;;  %v673_v40 = vld [vmem:[%s8111_s2 + $0x9a8] sm:$0xff]  ;;  %v659_v11 = vld [vmem:[%s8111_s2 + $0x938] sm:$0xff] }
  0x5b   : > { %3787 = vmatprep.subr.bf16.mxu1 %v5423_v1  ;;  %v5485_v1 = vpack.c.bf16 %v610_v37, %v594_v2  ;;  %8350 = vst [vmem:[#allocation46_spill] sm:$0xff] %v5499_v59  ;;  %v642_v2 = vld [vmem:[%s8111_s2 + $0x8b0] sm:$0xff]  ;;  %v657_v37 = vld [vmem:[%s8111_s2 + $0x928] sm:$0xff]  ;;  %v5517_v27 = vpack.c.bf16 %v640_v54, %v624_v60  ;;  %v5535_v54 = vpack.c.bf16 %v675_v57, %v659_v11  ;;  %v707_v11 = vld [vmem:[%s8111_s2 + $0xab8] sm:$0xff] }
  0x5c   : > { %8349 = vst [vmem:[#allocation45_spill] sm:$0xff] %v5487_v22  ;;  %v658_v60 = vld [vmem:[%s8111_s2 + $0x930] sm:$0xff] }
  0x5d   : > { %3741 = vmatpush1.bf16.msra.mxu0 %v5445_v44  ;;  %8348 = vst [vmem:[#allocation44_spill] sm:$0xff] %v5485_v1  ;;  %8351 = vst [vmem:[#allocation47_spill] sm:$0xff] %v5517_v27  ;;  %v672_v44 = vld [vmem:[%s8111_s2 + $0x9a0] sm:$0xff] }
  0x5e   : > { %3789 = vmatpush1.bf16.msra.mxu1 %v5449_v24  ;;  %3743 = vmatprep.subr.bf16.mxu0 %v5451_v45  ;;  %v5523_v45 = vpack.c.bf16 %v673_v40, %v657_v37  ;;  %v656_v24 = vld [vmem:[%s8111_s2 + $0x920] sm:$0xff]  ;;  %8354 = vst [vmem:[#allocation50_spill] sm:$0xff] %v5535_v54  ;;  %v705_v37 = vld [vmem:[%s8111_s2 + $0xaa8] sm:$0xff]  ;;  %v691_v40 = vld [vmem:[%s8111_s2 + $0xa38] sm:$0xff] }
  0x5f   : > { %3791 = vmatprep.subr.bf16.mxu1 %v5463_v42  ;;  %v5521_v42 = vpack.c.bf16 %v642_v2, %v626_v36  ;;  %v674_v36 = vld [vmem:[%s8111_s2 + $0x9b0] sm:$0xff]  ;;  %v689_v2 = vld [vmem:[%s8111_s2 + $0xa28] sm:$0xff]  ;;  %v5553_v57 = vpack.c.bf16 %v672_v44, %v656_v24  ;;  %v5571_v44 = vpack.c.bf16 %v707_v11, %v691_v40  ;;  %v739_v40 = vld [vmem:[%s8111_s2 + $0xbb8] sm:$0xff] }
  0x60   : > { %8353 = vst [vmem:[#allocation49_spill] sm:$0xff] %v5523_v45  ;;  %v690_v24 = vld [vmem:[%s8111_s2 + $0xa30] sm:$0xff] }
  0x61   : > { %3745 = vmatpush1.bf16.msra.mxu0 %v5481_v29  ;;  %8352 = vst [vmem:[#allocation48_spill] sm:$0xff] %v5521_v42  ;;  %8355 = vst [vmem:[#allocation51_spill] sm:$0xff] %v5553_v57  ;;  %v704_v29 = vld [vmem:[%s8111_s2 + $0xaa0] sm:$0xff] }
  0x62   : > { %3793 = vmatpush1.bf16.msra.mxu1 %v5485_v1  ;;  %3747 = vmatprep.subr.bf16.mxu0 %v5487_v22  ;;  %v5559_v22 = vpack.c.bf16 %v705_v37, %v689_v2  ;;  %v688_v1 = vld [vmem:[%s8111_s2 + $0xa20] sm:$0xff]  ;;  %8358 = vst [vmem:[#allocation54_spill] sm:$0xff] %v5571_v44  ;;  %v737_v2 = vld [vmem:[%s8111_s2 + $0xba8] sm:$0xff]  ;;  %v723_v37 = vld [vmem:[%s8111_s2 + $0xb38] sm:$0xff] }
  0x63   : > { %3795 = vmatprep.subr.bf16.mxu1 %v5499_v59  ;;  %v5557_v59 = vpack.c.bf16 %v674_v36, %v658_v60  ;;  %v706_v60 = vld [vmem:[%s8111_s2 + $0xab0] sm:$0xff]  ;;  %v721_v36 = vld [vmem:[%s8111_s2 + $0xb28] sm:$0xff]  ;;  %v5589_v11 = vpack.c.bf16 %v704_v29, %v688_v1  ;;  %v5604_v1 = vpack.c.bf16 %v739_v40, %v723_v37  ;;  %v755_v37 = vld [vmem:[%s8111_s2 + $0xc38] sm:$0xf] }
  0x64   : > { %8357 = vst [vmem:[#allocation53_spill] sm:$0xff] %v5559_v22  ;;  %v722_v29 = vld [vmem:[%s8111_s2 + $0xb30] sm:$0xff]  ;;  %v375_v40 = vld [vmem:[%s8111_s2 + $0x58] sm:$0xff] }
  0x65   : > { %3749 = vmatpush1.bf16.msra.mxu0 %v5517_v27  ;;  %8356 = vst [vmem:[#allocation52_spill] sm:$0xff] %v5557_v59  ;;  %8359 = vst [vmem:[#allocation55_spill] sm:$0xff] %v5589_v11  ;;  %v736_v27 = vld [vmem:[%s8111_s2 + $0xba0] sm:$0xff] }
  0x66   : > { %3797 = vmatpush1.bf16.msra.mxu1 %v5521_v42  ;;  %3751 = vmatprep.subr.bf16.mxu0 %v5523_v45  ;;  %v5595_v45 = vpack.c.bf16 %v737_v2, %v721_v36  ;;  %v720_v42 = vld [vmem:[%s8111_s2 + $0xb20] sm:$0xff]  ;;  %8362 = vst [vmem:[#allocation58_spill] sm:$0xff] %v5604_v1  ;;  %v753_v2 = vld [vmem:[%s8111_s2 + $0xc28] sm:$0xf] }
  0x67   : > { %3799 = vmatprep.subr.bf16.mxu1 %v5535_v54  ;;  %v5593_v54 = vpack.c.bf16 %v706_v60, %v690_v24  ;;  %v738_v24 = vld [vmem:[%s8111_s2 + $0xbb0] sm:$0xff]  ;;  %v5613_v60 = vpack.c.bf16 %v736_v27, %v720_v42  ;;  %v373_v42 = vld [vmem:[%s8111_s2 + $0x48] sm:$0xff] }
  0x68   : > { %8361 = vst [vmem:[#allocation57_spill] sm:$0xff] %v5595_v45  ;;  %v5617_v36 = vpack.c.bf16 %v738_v24, %v722_v29  ;;  %v389_v27 = vld [vmem:[%s8111_s2 + $0xc8] sm:$0xff]  ;;  %v391_v29 = vld [vmem:[%s8111_s2 + $0xd8] sm:$0xff]  ;;  %v372_v24 = vld [vmem:[%s8111_s2 + $0x40] sm:$0xff] }
  0x69   : > { %3753 = vmatpush1.bf16.msra.mxu0 %v5553_v57  ;;  %8360 = vst [vmem:[#allocation56_spill] sm:$0xff] %v5593_v54  ;;  %8363 = vst [vmem:[#allocation59_spill] sm:$0xff] %v5613_v60  ;;  %v453_v57 = vld [vmem:[%s8111_s2 + $0x2c8] sm:$0xff] }
  0x6a   : > { %3801 = vmatpush1.bf16.msra.mxu1 %v5557_v59  ;;  %3755 = vmatprep.subr.bf16.mxu0 %v5559_v22  ;;  %8364 = vst [vmem:[#allocation60_spill] sm:$0xff] %v5617_v36  ;;  %v405_v22 = vld [vmem:[%s8111_s2 + $0x148] sm:$0xff] }
  0x6b   : > { %3803 = vmatprep.subr.bf16.mxu1 %v5571_v44  ;;  %v421_v59 = vld [vmem:[%s8111_s2 + $0x1c8] sm:$0xff] }
  0x6d   : > { %3757 = vmatpush1.bf16.msra.mxu0 %v5589_v11  ;;  %v5660_v11 = vpack.c.bf16 %v389_v27, %v373_v42  ;;  %v404_v27 = vld [vmem:[%s8111_s2 + $0x140] sm:$0xff] }
  0x6e   : > { %3805 = vmatpush1.bf16.msra.mxu1 %v5593_v54  ;;  %3759 = vmatprep.subr.bf16.mxu0 %v5595_v45  ;;  %v374_v45 = vld [vmem:[%s8111_s2 + $0x50] sm:$0xff] }
  0x6f   : > { %3807 = vmatprep.subr.bf16.mxu1 %v5604_v1  ;;  %v388_v1 = vld [vmem:[%s8111_s2 + $0xc0] sm:$0xff]  ;;  %v390_v54 = vld [vmem:[%s8111_s2 + $0xd0] sm:$0xff]  ;;  %8365 = vst [vmem:[#allocation61_spill] sm:$0xff] %v5660_v11 }
  0x70   : > { %v5664_v44 = vpack.c.bf16 %v388_v1, %v372_v24  ;;  %v5676_v42 = vpack.c.bf16 %v390_v54, %v374_v45  ;;  %v423_v1 = vld [vmem:[%s8111_s2 + $0x1d8] sm:$0xff]  ;;  %v406_v45 = vld [vmem:[%s8111_s2 + $0x150] sm:$0xff]  ;;  %v437_v24 = vld [vmem:[%s8111_s2 + $0x248] sm:$0xff] }
  0x71   : > { %3761 = vmatpush1.bf16.msra.mxu0 %v5613_v60  ;;  %v752_v60 = vld [vmem:[%s8111_s2 + $0xc20] sm:$0xf]  ;;  %v422_v54 = vld [vmem:[%s8111_s2 + $0x1d0] sm:$0xff] }
  0x72   : > { %3809 = vmatpush1.bf16.msra.mxu1 %v5617_v36  ;;  %3294 = vmatprep.subr.msk.mxu0 %vm869_vm1, %v753_v2  ;;  %v754_v36 = vld [vmem:[%s8111_s2 + $0xc30] sm:$0xf]  ;;  %v5662_v2 = vpack.c.bf16 %v391_v29, %v375_v40  ;;  %8367 = vst [vmem:[#allocation63_spill] sm:$0xff] %v5664_v44  ;;  %8368 = vst [vmem:[#allocation64_spill] sm:$0xff] %v5676_v42  ;;  %v420_v40 = vld [vmem:[%s8111_s2 + $0x1c0] sm:$0xff] }
  0x73   : > { %3300 = vmatprep.subr.msk.mxu1 %vm869_vm1, %v755_v37  ;;  %v407_v37 = vld [vmem:[%s8111_s2 + $0x158] sm:$0xff]  ;;  %v5703_v29 = vpack.c.bf16 %v420_v40, %v404_v27  ;;  %v452_v27 = vld [vmem:[%s8111_s2 + $0x2c0] sm:$0xff]  ;;  %v438_v40 = vld [vmem:[%s8111_s2 + $0x250] sm:$0xff] }
  0x74   : > { %8366 = vst [vmem:[#allocation62_spill] sm:$0xff] %v5662_v2 }
  0x75   : > { %3295 = vmatpush1.msk.msra.mxu0 %vm869_vm1, %v752_v60  ;;  %v5697_v60 = vpack.c.bf16 %v421_v59, %v405_v22  ;;  %8371 = vst [vmem:[#allocation67_spill] sm:$0xff] %v5703_v29  ;;  %v439_v22 = vld [vmem:[%s8111_s2 + $0x258] sm:$0xff]  ;;  %v5717_v59 = vpack.c.bf16 %v422_v54, %v406_v45  ;;  %v454_v45 = vld [vmem:[%s8111_s2 + $0x2d0] sm:$0xff]  ;;  %v5739_v54 = vpack.c.bf16 %v453_v57, %v437_v24 }
  0x76   : > { %3301 = vmatpush1.msk.msra.mxu1 %vm869_vm1, %v754_v36  ;;  %1161 = vmatmul.mubr.f32.vlgmr.msra.gmra.mrb[8].mxu0 %v5174_v13  ;;  %v5701_v36 = vpack.c.bf16 %v423_v1, %v407_v37  ;;  %v455_v37 = vld [vmem:[%s8111_s2 + $0x2d8] sm:$0xff]  ;;  %v436_v1 = vld [vmem:[%s8111_s2 + $0x240] sm:$0xff] }
  0x77   : > { %1250 = vmatmul.mubr.f32.vlgmr.msra.gmra.mrb[8].mxu1 %v5174_v13  ;;  %3811 = vmatprep.subr.bf16.mxu0 %v5660_v11  ;;  %8369 = vst [vmem:[#allocation65_spill] sm:$0xff] %v5697_v60  ;;  %8372 = vst [vmem:[#allocation68_spill] sm:$0xff] %v5717_v59  ;;  %v485_v11 = vld [vmem:[%s8111_s2 + $0x3c8] sm:$0xff]  ;;  %v471_v57 = vld [vmem:[%s8111_s2 + $0x358] sm:$0xff] }
  0x78   : > { %3859 = vmatprep.subr.bf16.mxu1 %v5662_v2  ;;  %3813 = vmatpush1.bf16.msra.mxu0 %v5664_v44  ;;  %8370 = vst [vmem:[#allocation66_spill] sm:$0xff] %v5701_v36  ;;  %8373 = vst [vmem:[#allocation69_spill] sm:$0xff] %v5739_v54  ;;  %v5746_v44 = vpack.c.bf16 %v455_v37, %v439_v22  ;;  %v5748_v2 = vpack.c.bf16 %v452_v27, %v436_v1  ;;  %v487_v24 = vld [vmem:[%s8111_s2 + $0x3d8] sm:$0xff]  ;;  %v468_v37 = vld [vmem:[%s8111_s2 + $0x340] sm:$0xff] }
  0x79   : > { %3861 = vmatpush1.bf16.msra.mxu1 %v5676_v42  ;;  %3297 = vmatprep.mubr.msk.f32.mxu0 %vm856_vm0, %v5267_v28  ;;  %v469_v42 = vld [vmem:[%s8111_s2 + $0x348] sm:$0xff]  ;;  %v5762_v22 = vpack.c.bf16 %v454_v45, %v438_v40  ;;  %v484_v1 = vld [vmem:[%s8111_s2 + $0x3c0] sm:$0xff]  ;;  %v470_v27 = vld [vmem:[%s8111_s2 + $0x350] sm:$0xff]  ;;  %v5797_v31 = vpack.c.bf16 %v487_v24, %v471_v57 }
  0x7a   : > { %3303 = vmatprep.mubr.msk.f32.mxu1 %vm856_vm0, %v5267_v28  ;;  %1167 = vmatmul.mubr.f32.gmra.mrb[10].mxu0 %v5296_v46  ;;  %8374 = vst [vmem:[#allocation70_spill] sm:$0xff] %v5748_v2  ;;  %v486_v40 = vld [vmem:[%s8111_s2 + $0x3d0] sm:$0xff]  ;;  %v501_v45 = vld [vmem:[%s8111_s2 + $0x448] sm:$0xff]  ;;  %v5799_v20 = vpack.c.bf16 %v484_v1, %v468_v37  ;;  %v516_v57 = vld [vmem:[%s8111_s2 + $0x4c0] sm:$0xff] }
  0x7b   : > { %1256 = vmatmul.mubr.f32.gmra.mrb[10].mxu1 %v5296_v46  ;;  %3815 = vmatprep.subr.bf16.mxu0 %v5697_v60  ;;  %8375 = vst [vmem:[#allocation71_spill] sm:$0xff] %v5762_v22  ;;  %v519_v60 = vld [vmem:[%s8111_s2 + $0x4d8] sm:$0xff]  ;;  %8377 = vst [vmem:[#allocation73_spill] sm:$0xff] %v5797_v31  ;;  %v502_v24 = vld [vmem:[%s8111_s2 + $0x450] sm:$0xff] }
  0x7c   : > { %3863 = vmatprep.subr.bf16.mxu1 %v5701_v36  ;;  %3817 = vmatpush1.bf16.msra.mxu0 %v5703_v29  ;;  %v5787_v29 = vpack.c.bf16 %v485_v11, %v469_v42  ;;  %v503_v36 = vld [vmem:[%s8111_s2 + $0x458] sm:$0xff]  ;;  %8378 = vst [vmem:[#allocation74_spill] sm:$0xff] %v5799_v20  ;;  %v5804_v11 = vpack.c.bf16 %v486_v40, %v470_v27  ;;  %v533_v1 = vld [vmem:[%s8111_s2 + $0x548] sm:$0xff] }
  0x7d   : > { %3865 = vmatpush1.bf16.msra.mxu1 %v5717_v59  ;;  %3298 = vmatprep.mubr.msk.f32.mxu0 %vm856_vm0, %v5308_v6  ;;  %v517_v59 = vld [vmem:[%s8111_s2 + $0x4c8] sm:$0xff]  ;;  %v5820_v37 = vpack.c.bf16 %v519_v60, %v503_v36  ;;  %v535_v60 = vld [vmem:[%s8111_s2 + $0x558] sm:$0xff] }
  0x7e   : > { %3304 = vmatprep.mubr.msk.f32.mxu1 %vm856_vm0, %v5308_v6  ;;  %1173 = vmatmul.mubr.f32.gmra.mrb[12].mxu0 %v5330_v47  ;;  %8376 = vst [vmem:[#allocation72_spill] sm:$0xff] %v5787_v29  ;;  %8379 = vst [vmem:[#allocation75_spill] sm:$0xff] %v5804_v11  ;;  %v5806_v42 = vpack.c.bf16 %v517_v59, %v501_v45  ;;  %v518_v59 = vld [vmem:[%s8111_s2 + $0x4d0] sm:$0xff]  ;;  %v549_v27 = vld [vmem:[%s8111_s2 + $0x5c8] sm:$0xff] }
  0x7f   : > { %1262 = vmatmul.mubr.f32.gmra.mrb[12].mxu1 %v5330_v47  ;;  %3819 = vmatprep.subr.bf16.mxu0 %v5739_v54  ;;  %v500_v54 = vld [vmem:[%s8111_s2 + $0x440] sm:$0xff]  ;;  %8381 = vst [vmem:[#allocation77_spill] sm:$0xff] %v5820_v37  ;;  %v551_v36 = vld [vmem:[%s8111_s2 + $0x5d8] sm:$0xff]  ;;  %v5845_v45 = vpack.c.bf16 %v518_v59, %v502_v24  ;;  %v550_v24 = vld [vmem:[%s8111_s2 + $0x5d0] sm:$0xff] }
  0x80   : > { %3867 = vmatprep.subr.bf16.mxu1 %v5746_v44  ;;  %3821 = vmatpush1.bf16.msra.mxu0 %v5748_v2  ;;  %8380 = vst [vmem:[#allocation76_spill] sm:$0xff] %v5806_v42  ;;  %v5841_v40 = vpack.c.bf16 %v516_v57, %v500_v54  ;;  %v534_v54 = vld [vmem:[%s8111_s2 + $0x550] sm:$0xff]  ;;  %v5859_v57 = vpack.c.bf16 %v551_v36, %v535_v60  ;;  %v565_v59 = vld [vmem:[%s8111_s2 + $0x648] sm:$0xff]  ;;  %v583_v60 = vld [vmem:[%s8111_s2 + $0x6d8] sm:$0xff] }
  0x81   : > { %3869 = vmatpush1.bf16.msra.mxu1 %v5762_v22  ;;  %3299 = vmatprep.mubr.msk.f32.mxu0 %vm856_vm0, %v5356_v55  ;;  %8383 = vst [vmem:[#allocation79_spill] sm:$0xff] %v5845_v45  ;;  %v532_v22 = vld [vmem:[%s8111_s2 + $0x540] sm:$0xff] }
  0x82   : > { %3305 = vmatprep.mubr.msk.f32.mxu1 %vm856_vm0, %v5356_v55  ;;  %1179 = vmatmul.mubr.f32.gmra.mrb[14].mxu0 %v5363_v61  ;;  %8382 = vst [vmem:[#allocation78_spill] sm:$0xff] %v5841_v40  ;;  %8385 = vst [vmem:[#allocation81_spill] sm:$0xff] %v5859_v57 }
  0x83   : > { %1268 = vmatmul.mubr.f32.gmra.mrb[14].mxu1 %v5363_v61  ;;  %3823 = vmatprep.subr.bf16.mxu0 %v5787_v29  ;;  %v5847_v29 = vpack.c.bf16 %v549_v27, %v533_v1  ;;  %v581_v1 = vld [vmem:[%s8111_s2 + $0x6c8] sm:$0xff]  ;;  %v567_v27 = vld [vmem:[%s8111_s2 + $0x658] sm:$0xff] }
  0x84   : > { %3871 = vmatprep.subr.bf16.mxu1 %v5797_v31  ;;  %3825 = vmatpush1.bf16.msra.mxu0 %v5799_v20  ;;  %v548_v31 = vld [vmem:[%s8111_s2 + $0x5c0] sm:$0xff] }
  0x85   : > { %3873 = vmatpush1.bf16.msra.mxu1 %v5804_v11  ;;  %3827 = vmatprep.subr.bf16.mxu0 %v5806_v42  ;;  %8384 = vst [vmem:[#allocation80_spill] sm:$0xff] %v5847_v29  ;;  %v5881_v36 = vpack.c.bf16 %v548_v31, %v532_v22  ;;  %v5887_v42 = vpack.c.bf16 %v581_v1, %v565_v59  ;;  %v564_v11 = vld [vmem:[%s8111_s2 + $0x640] sm:$0xff]  ;;  %v566_v31 = vld [vmem:[%s8111_s2 + $0x650] sm:$0xff]  ;;  %v613_v59 = vld [vmem:[%s8111_s2 + $0x7c8] sm:$0xff] }
  0x86   : > { %3875 = vmatprep.subr.bf16.mxu1 %v5820_v37  ;;  %3308 = vmatprep.mubr.msk.f32.mxu0 %vm856_vm0, %v5035_v19  ;;  %v5885_v37 = vpack.c.bf16 %v550_v24, %v534_v54  ;;  %v5899_v22 = vpack.c.bf16 %v583_v60, %v567_v27  ;;  %v582_v54 = vld [vmem:[%s8111_s2 + $0x6d0] sm:$0xff]  ;;  %v597_v24 = vld [vmem:[%s8111_s2 + $0x748] sm:$0xff]  ;;  %v599_v1 = vld [vmem:[%s8111_s2 + $0x758] sm:$0xff] }
  0x87   : > { %3314 = vmatprep.mubr.msk.f32.mxu1 %vm856_vm0, %v5035_v19  ;;  %8386 = vst [vmem:[#allocation82_spill] sm:$0xff] %v5881_v36  ;;  %8388 = vst [vmem:[#allocation84_spill] sm:$0xff] %v5887_v42  ;;  %v580_v19 = vld [vmem:[%s8111_s2 + $0x6c0] sm:$0xff]  ;;  %v615_v27 = vld [vmem:[%s8111_s2 + $0x7d8] sm:$0xff] }
  0x88   : > { %3829 = vmatpush1.bf16.msra.mxu0 %v5841_v40  ;;  %8387 = vst [vmem:[#allocation83_spill] sm:$0xff] %v5885_v37  ;;  %8389 = vst [vmem:[#allocation85_spill] sm:$0xff] %v5899_v22  ;;  %v5917_v60 = vpack.c.bf16 %v580_v19, %v564_v11  ;;  %v612_v40 = vld [vmem:[%s8111_s2 + $0x7c0] sm:$0xff]  ;;  %v598_v11 = vld [vmem:[%s8111_s2 + $0x750] sm:$0xff]  ;;  %v5935_v19 = vpack.c.bf16 %v615_v27, %v599_v1 }
  0x89   : > { %3877 = vmatpush1.bf16.msra.mxu1 %v5845_v45  ;;  %3831 = vmatprep.subr.bf16.mxu0 %v5847_v29  ;;  %v5923_v29 = vpack.c.bf16 %v613_v59, %v597_v24  ;;  %v596_v45 = vld [vmem:[%s8111_s2 + $0x740] sm:$0xff]  ;;  %v645_v24 = vld [vmem:[%s8111_s2 + $0x8c8] sm:$0xff]  ;;  %v631_v59 = vld [vmem:[%s8111_s2 + $0x858] sm:$0xff] }
  0x8a   : > { %3879 = vmatprep.subr.bf16.mxu1 %v5859_v57  ;;  %8390 = vst [vmem:[#allocation86_spill] sm:$0xff] %v5917_v60  ;;  %v5921_v57 = vpack.c.bf16 %v582_v54, %v566_v31  ;;  %8393 = vst [vmem:[#allocation89_spill] sm:$0xff] %v5935_v19  ;;  %v614_v31 = vld [vmem:[%s8111_s2 + $0x7d0] sm:$0xff]  ;;  %v629_v54 = vld [vmem:[%s8111_s2 + $0x848] sm:$0xff]  ;;  %v5953_v27 = vpack.c.bf16 %v612_v40, %v596_v45 }
  0x8b   : > { %8392 = vst [vmem:[#allocation88_spill] sm:$0xff] %v5923_v29  ;;  %v647_v1 = vld [vmem:[%s8111_s2 + $0x8d8] sm:$0xff]  ;;  %v630_v40 = vld [vmem:[%s8111_s2 + $0x850] sm:$0xff] }
  0x8c   : > { %3833 = vmatpush1.bf16.msra.mxu0 %v5881_v36  ;;  %8391 = vst [vmem:[#allocation87_spill] sm:$0xff] %v5921_v57  ;;  %8394 = vst [vmem:[#allocation90_spill] sm:$0xff] %v5953_v27  ;;  %v644_v36 = vld [vmem:[%s8111_s2 + $0x8c0] sm:$0xff]  ;;  %v5971_v45 = vpack.c.bf16 %v647_v1, %v631_v59  ;;  %v679_v59 = vld [vmem:[%s8111_s2 + $0x9d8] sm:$0xff] }
  0x8d   : > { %3881 = vmatpush1.bf16.msra.mxu1 %v5885_v37  ;;  %3835 = vmatprep.subr.bf16.mxu0 %v5887_v42  ;;  %v5959_v42 = vpack.c.bf16 %v645_v24, %v629_v54  ;;  %v628_v37 = vld [vmem:[%s8111_s2 + $0x840] sm:$0xff]  ;;  %v677_v54 = vld [vmem:[%s8111_s2 + $0x9c8] sm:$0xff]  ;;  %v663_v24 = vld [vmem:[%s8111_s2 + $0x958] sm:$0xff] }
  0x8e   : > { %3883 = vmatprep.subr.bf16.mxu1 %v5899_v22  ;;  %v5957_v22 = vpack.c.bf16 %v614_v31, %v598_v11  ;;  %8397 = vst [vmem:[#allocation93_spill] sm:$0xff] %v5971_v45  ;;  %v646_v11 = vld [vmem:[%s8111_s2 + $0x8d0] sm:$0xff]  ;;  %v661_v31 = vld [vmem:[%s8111_s2 + $0x948] sm:$0xff]  ;;  %v5989_v1 = vpack.c.bf16 %v644_v36, %v628_v37  ;;  %v6007_v36 = vpack.c.bf16 %v679_v59, %v663_v24  ;;  %v711_v24 = vld [vmem:[%s8111_s2 + $0xad8] sm:$0xff] }
  0x8f   : > { %8396 = vst [vmem:[#allocation92_spill] sm:$0xff] %v5959_v42  ;;  %v662_v37 = vld [vmem:[%s8111_s2 + $0x950] sm:$0xff] }
  0x90   : > { %3837 = vmatpush1.bf16.msra.mxu0 %v5917_v60  ;;  %8395 = vst [vmem:[#allocation91_spill] sm:$0xff] %v5957_v22  ;;  %8398 = vst [vmem:[#allocation94_spill] sm:$0xff] %v5989_v1  ;;  %v676_v60 = vld [vmem:[%s8111_s2 + $0x9c0] sm:$0xff] }
  0x91   : > { %3885 = vmatpush1.bf16.msra.mxu1 %v5921_v57  ;;  %3839 = vmatprep.subr.bf16.mxu0 %v5923_v29  ;;  %v5995_v29 = vpack.c.bf16 %v677_v54, %v661_v31  ;;  %v660_v57 = vld [vmem:[%s8111_s2 + $0x940] sm:$0xff]  ;;  %8401 = vst [vmem:[#allocation97_spill] sm:$0xff] %v6007_v36  ;;  %v709_v31 = vld [vmem:[%s8111_s2 + $0xac8] sm:$0xff]  ;;  %v695_v54 = vld [vmem:[%s8111_s2 + $0xa58] sm:$0xff] }
  0x92   : > { %3887 = vmatprep.subr.bf16.mxu1 %v5935_v19  ;;  %v5993_v19 = vpack.c.bf16 %v646_v11, %v630_v40  ;;  %v678_v40 = vld [vmem:[%s8111_s2 + $0x9d0] sm:$0xff]  ;;  %v693_v11 = vld [vmem:[%s8111_s2 + $0xa48] sm:$0xff]  ;;  %v6025_v59 = vpack.c.bf16 %v676_v60, %v660_v57  ;;  %v6043_v60 = vpack.c.bf16 %v711_v24, %v695_v54  ;;  %v743_v54 = vld [vmem:[%s8111_s2 + $0xbd8] sm:$0xff] }
  0x93   : > { %8400 = vst [vmem:[#allocation96_spill] sm:$0xff] %v5995_v29  ;;  %v694_v57 = vld [vmem:[%s8111_s2 + $0xa50] sm:$0xff] }
  0x94   : > { %3841 = vmatpush1.bf16.msra.mxu0 %v5953_v27  ;;  %8399 = vst [vmem:[#allocation95_spill] sm:$0xff] %v5993_v19  ;;  %8402 = vst [vmem:[#allocation98_spill] sm:$0xff] %v6025_v59  ;;  %v708_v27 = vld [vmem:[%s8111_s2 + $0xac0] sm:$0xff] }
  0x95   : > { %3889 = vmatpush1.bf16.msra.mxu1 %v5957_v22  ;;  %3843 = vmatprep.subr.bf16.mxu0 %v5959_v42  ;;  %v6031_v42 = vpack.c.bf16 %v709_v31, %v693_v11  ;;  %v692_v22 = vld [vmem:[%s8111_s2 + $0xa40] sm:$0xff]  ;;  %8405 = vst [vmem:[#allocation101_spill] sm:$0xff] %v6043_v60  ;;  %v741_v11 = vld [vmem:[%s8111_s2 + $0xbc8] sm:$0xff]  ;;  %v727_v31 = vld [vmem:[%s8111_s2 + $0xb58] sm:$0xff] }
  0x96   : > { %3891 = vmatprep.subr.bf16.mxu1 %v5971_v45  ;;  %v6029_v45 = vpack.c.bf16 %v678_v40, %v662_v37  ;;  %v710_v37 = vld [vmem:[%s8111_s2 + $0xad0] sm:$0xff]  ;;  %v725_v40 = vld [vmem:[%s8111_s2 + $0xb48] sm:$0xff]  ;;  %v6061_v24 = vpack.c.bf16 %v708_v27, %v692_v22  ;;  %v6076_v22 = vpack.c.bf16 %v743_v54, %v727_v31  ;;  %v759_v31 = vld [vmem:[%s8111_s2 + $0xc58] sm:$0xf] }
  0x97   : > { %8404 = vst [vmem:[#allocation100_spill] sm:$0xff] %v6031_v42  ;;  %v726_v27 = vld [vmem:[%s8111_s2 + $0xb50] sm:$0xff]  ;;  %v393_v54 = vld [vmem:[%s8111_s2 + $0xe8] sm:$0xff] }
  0x98   : > { %3845 = vmatpush1.bf16.msra.mxu0 %v5989_v1  ;;  %8403 = vst [vmem:[#allocation99_spill] sm:$0xff] %v6029_v45  ;;  %8406 = vst [vmem:[#allocation102_spill] sm:$0xff] %v6061_v24  ;;  %v740_v1 = vld [vmem:[%s8111_s2 + $0xbc0] sm:$0xff] }
  0x99   : > { %3893 = vmatpush1.bf16.msra.mxu1 %v5993_v19  ;;  %3847 = vmatprep.subr.bf16.mxu0 %v5995_v29  ;;  %v6067_v29 = vpack.c.bf16 %v741_v11, %v725_v40  ;;  %v724_v19 = vld [vmem:[%s8111_s2 + $0xb40] sm:$0xff]  ;;  %8409 = vst [vmem:[#allocation105_spill] sm:$0xff] %v6076_v22  ;;  %v757_v11 = vld [vmem:[%s8111_s2 + $0xc48] sm:$0xf] }
  0x9a   : > { %3895 = vmatprep.subr.bf16.mxu1 %v6007_v36  ;;  %v6065_v36 = vpack.c.bf16 %v710_v37, %v694_v57  ;;  %v742_v57 = vld [vmem:[%s8111_s2 + $0xbd0] sm:$0xff]  ;;  %v6085_v37 = vpack.c.bf16 %v740_v1, %v724_v19  ;;  %v377_v19 = vld [vmem:[%s8111_s2 + $0x68] sm:$0xff]  ;;  %v756_v1 = vld [vmem:[%s8111_s2 + $0xc40] sm:$0xf] }
  0x9b   : > { %8408 = vst [vmem:[#allocation104_spill] sm:$0xff] %v6067_v29  ;;  %v6089_v40 = vpack.c.bf16 %v742_v57, %v726_v27  ;;  %v379_v27 = vld [vmem:[%s8111_s2 + $0x78] sm:$0xff] }
  0x9c   : > { %3849 = vmatpush1.bf16.msra.mxu0 %v6025_v59  ;;  %8407 = vst [vmem:[#allocation103_spill] sm:$0xff] %v6065_v36  ;;  %8410 = vst [vmem:[#allocation106_spill] sm:$0xff] %v6085_v37  ;;  %v395_v57 = vld [vmem:[%s8111_s2 + $0xf8] sm:$0xff] }
  0x9d   : > { %3897 = vmatpush1.bf16.msra.mxu1 %v6029_v45  ;;  %3851 = vmatprep.subr.bf16.mxu0 %v6031_v42  ;;  %8411 = vst [vmem:[#allocation107_spill] sm:$0xff] %v6089_v40  ;;  %v6138_v42 = vpack.c.bf16 %v393_v54, %v377_v19  ;;  %v411_v45 = vld [vmem:[%s8111_s2 + $0x178] sm:$0xff]  ;;  %v408_v19 = vld [vmem:[%s8111_s2 + $0x160] sm:$0xff] }
  0x9e   : > { %3899 = vmatprep.subr.bf16.mxu1 %v6043_v60  ;;  %v425_v60 = vld [vmem:[%s8111_s2 + $0x1e8] sm:$0xff]  ;;  %v427_v59 = vld [vmem:[%s8111_s2 + $0x1f8] sm:$0xff]  ;;  %v424_v54 = vld [vmem:[%s8111_s2 + $0x1e0] sm:$0xff] }
  0xa0   : > { %3853 = vmatpush1.bf16.msra.mxu0 %v6061_v24  ;;  %v409_v24 = vld [vmem:[%s8111_s2 + $0x168] sm:$0xff] }
  0xa1   : > { %3901 = vmatpush1.bf16.msra.mxu1 %v6065_v36  ;;  %3855 = vmatprep.subr.bf16.mxu0 %v6067_v29  ;;  %v392_v29 = vld [vmem:[%s8111_s2 + $0xe0] sm:$0xff]  ;;  %v378_v36 = vld [vmem:[%s8111_s2 + $0x70] sm:$0xff]  ;;  %v6153_v2 = vpack.c.bf16 %v425_v60, %v409_v24  ;;  %v441_v60 = vld [vmem:[%s8111_s2 + $0x268] sm:$0xff] }
  0xa2   : > { %3903 = vmatprep.subr.bf16.mxu1 %v6076_v22  ;;  %v376_v22 = vld [vmem:[%s8111_s2 + $0x60] sm:$0xff]  ;;  %v457_v24 = vld [vmem:[%s8111_s2 + $0x2e8] sm:$0xff] }
  0xa3   : > { %v6148_v20 = vpack.c.bf16 %v392_v29, %v376_v22  ;;  %v6166_v29 = vpack.c.bf16 %v427_v59, %v411_v45  ;;  %v443_v45 = vld [vmem:[%s8111_s2 + $0x278] sm:$0xff]  ;;  %v6187_v22 = vpack.c.bf16 %v424_v54, %v408_v19  ;;  %v458_v54 = vld [vmem:[%s8111_s2 + $0x2f0] sm:$0xff] }
  0xa4   : > { %3857 = vmatpush1.bf16.msra.mxu0 %v6085_v37  ;;  %v394_v37 = vld [vmem:[%s8111_s2 + $0xf0] sm:$0xff]  ;;  %v459_v59 = vld [vmem:[%s8111_s2 + $0x2f8] sm:$0xff] }
  0xa5   : > { %3905 = vmatpush1.bf16.msra.mxu1 %v6089_v40  ;;  %3306 = vmatprep.subr.msk.mxu0 %vm869_vm1, %v757_v11  ;;  %v758_v40 = vld [vmem:[%s8111_s2 + $0xc50] sm:$0xf]  ;;  %v6140_v11 = vpack.c.bf16 %v395_v57, %v379_v27  ;;  %8412 = vst [vmem:[#allocation108_spill] sm:$0xff] %v6166_v29  ;;  %8413 = vst [vmem:[#allocation109_spill] sm:$0xff] %v6187_v22  ;;  %v6205_v19 = vpack.c.bf16 %v459_v59, %v443_v45 }
  0xa6   : > { %3312 = vmatprep.subr.msk.mxu1 %vm869_vm1, %v759_v31  ;;  %v6151_v31 = vpack.c.bf16 %v394_v37, %v378_v36  ;;  %v410_v27 = vld [vmem:[%s8111_s2 + $0x170] sm:$0xff] }
  0xa7   : > { %v426_v36 = vld [vmem:[%s8111_s2 + $0x1f0] sm:$0xff]  ;;  %8414 = vst [vmem:[#allocation110_spill] sm:$0xff] %v6205_v19 }
  0xa8   : > { %3307 = vmatpush1.msk.msra.mxu0 %vm869_vm1, %v756_v1  ;;  %v6191_v37 = vpack.c.bf16 %v426_v36, %v410_v27  ;;  %v440_v1 = vld [vmem:[%s8111_s2 + $0x260] sm:$0xff]  ;;  %v442_v57 = vld [vmem:[%s8111_s2 + $0x270] sm:$0xff]  ;;  %v473_v27 = vld [vmem:[%s8111_s2 + $0x368] sm:$0xff] }
  0xa9   : > { %3313 = vmatpush1.msk.msra.mxu1 %vm869_vm1, %v758_v40  ;;  %1339 = vmatmul.mubr.f32.vlgmr.msra.gmra.mrb[16].mxu0 %v5174_v13  ;;  %v6193_v40 = vpack.c.bf16 %v457_v24, %v441_v60  ;;  %v489_v36 = vld [vmem:[%s8111_s2 + $0x3e8] sm:$0xff]  ;;  %v475_v60 = vld [vmem:[%s8111_s2 + $0x378] sm:$0xff]  ;;  %v6233_v59 = vpack.c.bf16 %v458_v54, %v442_v57 }
  0xaa   : > { %3907 = vmatprep.subr.bf16.mxu0 %v6138_v42  ;;  %3955 = vmatprep.subr.bf16.mxu1 %v6140_v11  ;;  %v491_v24 = vld [vmem:[%s8111_s2 + $0x3f8] sm:$0xff]  ;;  %v505_v57 = vld [vmem:[%s8111_s2 + $0x468] sm:$0xff] }
  0xab   : > { %1428 = vmatmul.mubr.f32.vlgmr.msra.gmra.mrb[16].mxu1 %v5174_v13  ;;  %3909 = vmatpush1.bf16.msra.mxu0 %v6148_v20  ;;  %v456_v13 = vld [vmem:[%s8111_s2 + $0x2e0] sm:$0xff]  ;;  %v521_v54 = vld [vmem:[%s8111_s2 + $0x4e8] sm:$0xff] }
  0xac   : > { %3957 = vmatpush1.bf16.msra.mxu1 %v6151_v31  ;;  %3911 = vmatprep.subr.bf16.mxu0 %v6153_v2  ;;  %v6228_v45 = vpack.c.bf16 %v456_v13, %v440_v1  ;;  %v6247_v1 = vpack.c.bf16 %v491_v24, %v475_v60  ;;  %v490_v13 = vld [vmem:[%s8111_s2 + $0x3f0] sm:$0xff] }
  0xad   : > { %3959 = vmatprep.subr.bf16.mxu1 %v6166_v29  ;;  %3309 = vmatprep.mubr.msk.f32.mxu0 %vm856_vm0, %v5267_v28  ;;  %v6235_v29 = vpack.c.bf16 %v489_v36, %v473_v27  ;;  %v507_v27 = vld [vmem:[%s8111_s2 + $0x478] sm:$0xff] }
  0xae   : > { %3315 = vmatprep.mubr.msk.f32.mxu1 %vm856_vm0, %v5267_v28  ;;  %1345 = vmatmul.mubr.f32.gmra.mrb[18].mxu0 %v5296_v46  ;;  %8415 = vst [vmem:[#allocation111_spill] sm:$0xff] %v6228_v45  ;;  %v472_v28 = vld [vmem:[%s8111_s2 + $0x360] sm:$0xff]  ;;  %8416 = vst [vmem:[#allocation112_spill] sm:$0xff] %v6247_v1  ;;  %v523_v36 = vld [vmem:[%s8111_s2 + $0x4f8] sm:$0xff] }
  0xaf   : > { %3913 = vmatpush1.bf16.msra.mxu0 %v6187_v22  ;;  %1434 = vmatmul.mubr.f32.gmra.mrb[18].mxu1 %v5296_v46  ;;  %v488_v22 = vld [vmem:[%s8111_s2 + $0x3e0] sm:$0xff]  ;;  %v474_v46 = vld [vmem:[%s8111_s2 + $0x370] sm:$0xff] }
  0xb0   : > { %3961 = vmatpush1.bf16.msra.mxu1 %v6191_v37  ;;  %3915 = vmatprep.subr.bf16.mxu0 %v6193_v40  ;;  %v6270_v60 = vpack.c.bf16 %v488_v22, %v472_v28  ;;  %v6275_v24 = vpack.c.bf16 %v490_v13, %v474_v46  ;;  %v6289_v22 = vpack.c.bf16 %v523_v36, %v507_v27  ;;  %v522_v28 = vld [vmem:[%s8111_s2 + $0x4f0] sm:$0xff]  ;;  %v537_v46 = vld [vmem:[%s8111_s2 + $0x568] sm:$0xff] }
  0xb1   : > { %3963 = vmatprep.subr.bf16.mxu1 %v6205_v19  ;;  %3310 = vmatprep.mubr.msk.f32.mxu0 %vm856_vm0, %v5308_v6  ;;  %v6277_v19 = vpack.c.bf16 %v521_v54, %v505_v57  ;;  %v553_v13 = vld [vmem:[%s8111_s2 + $0x5e8] sm:$0xff]  ;;  %v539_v57 = vld [vmem:[%s8111_s2 + $0x578] sm:$0xff] }
  0xb2   : > { %3316 = vmatprep.mubr.msk.f32.mxu1 %vm856_vm0, %v5308_v6  ;;  %1351 = vmatmul.mubr.f32.gmra.mrb[20].mxu0 %v5330_v47  ;;  %8417 = vst [vmem:[#allocation113_spill] sm:$0xff] %v6270_v60  ;;  %8418 = vst [vmem:[#allocation114_spill] sm:$0xff] %v6275_v24  ;;  %v504_v6 = vld [vmem:[%s8111_s2 + $0x460] sm:$0xff]  ;;  %v555_v54 = vld [vmem:[%s8111_s2 + $0x5f8] sm:$0xff] }
  0xb3   : > { %3917 = vmatpush1.bf16.msra.mxu0 %v6228_v45  ;;  %1440 = vmatmul.mubr.f32.gmra.mrb[20].mxu1 %v5330_v47  ;;  %8419 = vst [vmem:[#allocation115_spill] sm:$0xff] %v6277_v19  ;;  %v520_v45 = vld [vmem:[%s8111_s2 + $0x4e0] sm:$0xff]  ;;  %v506_v47 = vld [vmem:[%s8111_s2 + $0x470] sm:$0xff]  ;;  %8420 = vst [vmem:[#allocation116_spill] sm:$0xff] %v6289_v22 }
  0xb4   : > { %3965 = vmatpush1.bf16.msra.mxu1 %v6233_v59  ;;  %3919 = vmatprep.subr.bf16.mxu0 %v6235_v29  ;;  %v6312_v27 = vpack.c.bf16 %v520_v45, %v504_v6  ;;  %v6317_v36 = vpack.c.bf16 %v522_v28, %v506_v47  ;;  %v6331_v45 = vpack.c.bf16 %v555_v54, %v539_v57  ;;  %v554_v6 = vld [vmem:[%s8111_s2 + $0x5f0] sm:$0xff]  ;;  %v569_v47 = vld [vmem:[%s8111_s2 + $0x668] sm:$0xff]  ;;  %v587_v57 = vld [vmem:[%s8111_s2 + $0x6f8] sm:$0xff] }
  0xb5   : > { %3967 = vmatprep.subr.bf16.mxu1 %v6247_v1  ;;  %3311 = vmatprep.mubr.msk.f32.mxu0 %vm856_vm0, %v5356_v55  ;;  %v6319_v1 = vpack.c.bf16 %v553_v13, %v537_v46  ;;  %v585_v28 = vld [vmem:[%s8111_s2 + $0x6e8] sm:$0xff]  ;;  %v571_v13 = vld [vmem:[%s8111_s2 + $0x678] sm:$0xff] }
  0xb6   : > { %3317 = vmatprep.mubr.msk.f32.mxu1 %vm856_vm0, %v5356_v55  ;;  %1357 = vmatmul.mubr.f32.gmra.mrb[22].mxu0 %v5363_v61  ;;  %8421 = vst [vmem:[#allocation117_spill] sm:$0xff] %v6312_v27  ;;  %8422 = vst [vmem:[#allocation118_spill] sm:$0xff] %v6317_v36  ;;  %v536_v55 = vld [vmem:[%s8111_s2 + $0x560] sm:$0xff]  ;;  %v4586_v46 = vld [vmem:[%s5008_s29 + $0x8] sm:$0xff] }
  0xb7   : > { %3921 = vmatpush1.bf16.msra.mxu0 %v6270_v60  ;;  %1446 = vmatmul.mubr.f32.gmra.mrb[22].mxu1 %v5363_v61  ;;  %8423 = vst [vmem:[#allocation119_spill] sm:$0xff] %v6319_v1  ;;  %v552_v60 = vld [vmem:[%s8111_s2 + $0x5e0] sm:$0xff]  ;;  %v538_v61 = vld [vmem:[%s8111_s2 + $0x570] sm:$0xff]  ;;  %8424 = vst [vmem:[#allocation120_spill] sm:$0xff] %v6331_v45 }
  0xb8   : > { %3969 = vmatpush1.bf16.msra.mxu1 %v6275_v24  ;;  %3923 = vmatprep.subr.bf16.mxu0 %v6277_v19  ;;  %v6352_v54 = vpack.c.bf16 %v552_v60, %v536_v55  ;;  %v6358_v19 = vpack.c.bf16 %v585_v28, %v569_v47  ;;  %v568_v24 = vld [vmem:[%s8111_s2 + $0x660] sm:$0xff]  ;;  %v570_v60 = vld [vmem:[%s8111_s2 + $0x670] sm:$0xff]  ;;  %v6370_v55 = vpack.c.bf16 %v587_v57, %v571_v13  ;;  %v617_v47 = vld [vmem:[%s8111_s2 + $0x7e8] sm:$0xff] }
  0xb9   : > { %3971 = vmatprep.subr.bf16.mxu1 %v6289_v22  ;;  %3320 = vmatprep.mubr.msk.f32.mxu0 %vm856_vm0, %v4586_v46  ;;  %v6356_v22 = vpack.c.bf16 %v554_v6, %v538_v61  ;;  %v586_v61 = vld [vmem:[%s8111_s2 + $0x6f0] sm:$0xff]  ;;  %v601_v6 = vld [vmem:[%s8111_s2 + $0x768] sm:$0xff]  ;;  %v603_v28 = vld [vmem:[%s8111_s2 + $0x778] sm:$0xff] }
  0xba   : > { %3326 = vmatprep.mubr.msk.f32.mxu1 %vm856_vm0, %v4586_v46  ;;  %8425 = vst [vmem:[#allocation121_spill] sm:$0xff] %v6352_v54  ;;  %8427 = vst [vmem:[#allocation123_spill] sm:$0xff] %v6358_v19  ;;  %v584_v46 = vld [vmem:[%s8111_s2 + $0x6e0] sm:$0xff]  ;;  %v619_v13 = vld [vmem:[%s8111_s2 + $0x7f8] sm:$0xff] }
  0xbb   : > { %3925 = vmatpush1.bf16.msra.mxu0 %v6312_v27  ;;  %8426 = vst [vmem:[#allocation122_spill] sm:$0xff] %v6356_v22  ;;  %8428 = vst [vmem:[#allocation124_spill] sm:$0xff] %v6370_v55  ;;  %v6388_v57 = vpack.c.bf16 %v584_v46, %v568_v24  ;;  %v616_v27 = vld [vmem:[%s8111_s2 + $0x7e0] sm:$0xff]  ;;  %v602_v24 = vld [vmem:[%s8111_s2 + $0x770] sm:$0xff]  ;;  %v6406_v46 = vpack.c.bf16 %v619_v13, %v603_v28 }
  0xbc   : > { %3973 = vmatpush1.bf16.msra.mxu1 %v6317_v36  ;;  %3927 = vmatprep.subr.bf16.mxu0 %v6319_v1  ;;  %v6394_v1 = vpack.c.bf16 %v617_v47, %v601_v6  ;;  %v600_v36 = vld [vmem:[%s8111_s2 + $0x760] sm:$0xff]  ;;  %v649_v6 = vld [vmem:[%s8111_s2 + $0x8e8] sm:$0xff]  ;;  %v635_v47 = vld [vmem:[%s8111_s2 + $0x878] sm:$0xff] }
  0xbd   : > { %3975 = vmatprep.subr.bf16.mxu1 %v6331_v45  ;;  %8429 = vst [vmem:[#allocation125_spill] sm:$0xff] %v6388_v57  ;;  %v6392_v45 = vpack.c.bf16 %v586_v61, %v570_v60  ;;  %8432 = vst [vmem:[#allocation128_spill] sm:$0xff] %v6406_v46  ;;  %v618_v60 = vld [vmem:[%s8111_s2 + $0x7f0] sm:$0xff]  ;;  %v633_v61 = vld [vmem:[%s8111_s2 + $0x868] sm:$0xff]  ;;  %v6424_v13 = vpack.c.bf16 %v616_v27, %v600_v36 }
  0xbe   : > { %8431 = vst [vmem:[#allocation127_spill] sm:$0xff] %v6394_v1  ;;  %v651_v28 = vld [vmem:[%s8111_s2 + $0x8f8] sm:$0xff]  ;;  %v634_v27 = vld [vmem:[%s8111_s2 + $0x870] sm:$0xff] }
  0xbf   : > { %3929 = vmatpush1.bf16.msra.mxu0 %v6352_v54  ;;  %8430 = vst [vmem:[#allocation126_spill] sm:$0xff] %v6392_v45  ;;  %8433 = vst [vmem:[#allocation129_spill] sm:$0xff] %v6424_v13  ;;  %v648_v54 = vld [vmem:[%s8111_s2 + $0x8e0] sm:$0xff]  ;;  %v6442_v36 = vpack.c.bf16 %v651_v28, %v635_v47  ;;  %v683_v47 = vld [vmem:[%s8111_s2 + $0x9f8] sm:$0xff] }
  0xc0   : > { %3977 = vmatpush1.bf16.msra.mxu1 %v6356_v22  ;;  %3931 = vmatprep.subr.bf16.mxu0 %v6358_v19  ;;  %v6430_v19 = vpack.c.bf16 %v649_v6, %v633_v61  ;;  %v632_v22 = vld [vmem:[%s8111_s2 + $0x860] sm:$0xff]  ;;  %v681_v61 = vld [vmem:[%s8111_s2 + $0x9e8] sm:$0xff]  ;;  %v667_v6 = vld [vmem:[%s8111_s2 + $0x978] sm:$0xff] }
  0xc1   : > { %3979 = vmatprep.subr.bf16.mxu1 %v6370_v55  ;;  %v6428_v55 = vpack.c.bf16 %v618_v60, %v602_v24  ;;  %8436 = vst [vmem:[#allocation132_spill] sm:$0xff] %v6442_v36  ;;  %v650_v24 = vld [vmem:[%s8111_s2 + $0x8f0] sm:$0xff]  ;;  %v665_v60 = vld [vmem:[%s8111_s2 + $0x968] sm:$0xff]  ;;  %v6460_v28 = vpack.c.bf16 %v648_v54, %v632_v22  ;;  %v6478_v54 = vpack.c.bf16 %v683_v47, %v667_v6  ;;  %v715_v6 = vld [vmem:[%s8111_s2 + $0xaf8] sm:$0xff] }
  0xc2   : > { %8435 = vst [vmem:[#allocation131_spill] sm:$0xff] %v6430_v19  ;;  %v666_v22 = vld [vmem:[%s8111_s2 + $0x970] sm:$0xff] }
  0xc3   : > { %3933 = vmatpush1.bf16.msra.mxu0 %v6388_v57  ;;  %8434 = vst [vmem:[#allocation130_spill] sm:$0xff] %v6428_v55  ;;  %8437 = vst [vmem:[#allocation133_spill] sm:$0xff] %v6460_v28  ;;  %v680_v57 = vld [vmem:[%s8111_s2 + $0x9e0] sm:$0xff] }
  0xc4   : > { %3981 = vmatpush1.bf16.msra.mxu1 %v6392_v45  ;;  %3935 = vmatprep.subr.bf16.mxu0 %v6394_v1  ;;  %v6466_v1 = vpack.c.bf16 %v681_v61, %v665_v60  ;;  %v664_v45 = vld [vmem:[%s8111_s2 + $0x960] sm:$0xff]  ;;  %8440 = vst [vmem:[#allocation136_spill] sm:$0xff] %v6478_v54  ;;  %v713_v60 = vld [vmem:[%s8111_s2 + $0xae8] sm:$0xff]  ;;  %v699_v61 = vld [vmem:[%s8111_s2 + $0xa78] sm:$0xff] }
  0xc5   : > { %3983 = vmatprep.subr.bf16.mxu1 %v6406_v46  ;;  %v6464_v46 = vpack.c.bf16 %v650_v24, %v634_v27  ;;  %v682_v27 = vld [vmem:[%s8111_s2 + $0x9f0] sm:$0xff]  ;;  %v697_v24 = vld [vmem:[%s8111_s2 + $0xa68] sm:$0xff]  ;;  %v6496_v47 = vpack.c.bf16 %v680_v57, %v664_v45  ;;  %v6514_v57 = vpack.c.bf16 %v715_v6, %v699_v61  ;;  %v747_v61 = vld [vmem:[%s8111_s2 + $0xbf8] sm:$0xff] }
  0xc6   : > { %8439 = vst [vmem:[#allocation135_spill] sm:$0xff] %v6466_v1  ;;  %v698_v45 = vld [vmem:[%s8111_s2 + $0xa70] sm:$0xff] }
  0xc7   : > { %3937 = vmatpush1.bf16.msra.mxu0 %v6424_v13  ;;  %8438 = vst [vmem:[#allocation134_spill] sm:$0xff] %v6464_v46  ;;  %v712_v13 = vld [vmem:[%s8111_s2 + $0xae0] sm:$0xff] }
  0xc8   : > { %3985 = vmatpush1.bf16.msra.mxu1 %v6428_v55  ;;  %3939 = vmatprep.subr.bf16.mxu0 %v6430_v19  ;;  %v6502_v19 = vpack.c.bf16 %v713_v60, %v697_v24  ;;  %v696_v55 = vld [vmem:[%s8111_s2 + $0xa60] sm:$0xff]  ;;  %v745_v24 = vld [vmem:[%s8111_s2 + $0xbe8] sm:$0xff]  ;;  %v731_v60 = vld [vmem:[%s8111_s2 + $0xb78] sm:$0xff] }
  0xc9   : > { %3987 = vmatprep.subr.bf16.mxu1 %v6442_v36  ;;  %v6500_v36 = vpack.c.bf16 %v682_v27, %v666_v22  ;;  %v714_v22 = vld [vmem:[%s8111_s2 + $0xaf0] sm:$0xff]  ;;  %v729_v27 = vld [vmem:[%s8111_s2 + $0xb68] sm:$0xff]  ;;  %v6532_v6 = vpack.c.bf16 %v712_v13, %v696_v55  ;;  %v6547_v55 = vpack.c.bf16 %v747_v61, %v731_v60  ;;  %v6571_v60 = vld [vmem:[%s8111_s2 + $0xc78] sm:$0xf] }
  0xca   : > { %v730_v13 = vld [vmem:[%s8111_s2 + $0xb70] sm:$0xff]  ;;  %8444 = vst [vmem:[#allocation140_spill] sm:$0xff] %v6571_v60  ;;  %v4587_v61 = vld [vmem:[%s5008_s29] sm:$0xff] }
  0xcb   : > { %3941 = vmatpush1.bf16.msra.mxu0 %v6460_v28  ;;  %v744_v28 = vld [vmem:[%s8111_s2 + $0xbe0] sm:$0xff] }
  0xcc   : > { %3989 = vmatpush1.bf16.msra.mxu1 %v6464_v46  ;;  %3943 = vmatprep.subr.bf16.mxu0 %v6466_v1  ;;  %v6538_v1 = vpack.c.bf16 %v745_v24, %v729_v27  ;;  %v728_v46 = vld [vmem:[%s8111_s2 + $0xb60] sm:$0xff]  ;;  %v6566_v24 = vld [vmem:[%s8111_s2 + $0xc68] sm:$0xf] }
  0xcd   : > { %3991 = vmatprep.subr.bf16.mxu1 %v6478_v54  ;;  %v6536_v54 = vpack.c.bf16 %v714_v22, %v698_v45  ;;  %v746_v45 = vld [vmem:[%s8111_s2 + $0xbf0] sm:$0xff]  ;;  %v6556_v22 = vpack.c.bf16 %v744_v28, %v728_v46  ;;  %8443 = vst [vmem:[#allocation139_spill] sm:$0xff] %v6566_v24  ;;  %v6580_v46 = vld [vmem:[%s8111_s2 + $0xc60] sm:$0xf] }
  0xce   : > { %v6560_v27 = vpack.c.bf16 %v746_v45, %v730_v13  ;;  %8445 = vst [vmem:[#allocation141_spill] sm:$0xff] %v6580_v46  ;;  %v6587_v28 = vld [vmem:[%s8111_s2 + $0xc70] sm:$0xf]  ;;  %v4588_v13 = vld [vmem:[%s5008_s29 + $0x18] sm:$0xff] }
  0xcf   : > { %3945 = vmatpush1.bf16.msra.mxu0 %v6496_v47  ;;  %8441 = vst [vmem:[#allocation137_spill] sm:$0xff] %v6556_v22  ;;  %8446 = vst [vmem:[#allocation142_spill] sm:$0xff] %v6587_v28  ;;  %v4589_v45 = vld [vmem:[%s5008_s29 + $0x10] sm:$0xff] }
  0xd0   : > { %3993 = vmatpush1.bf16.msra.mxu1 %v6500_v36  ;;  %3947 = vmatprep.subr.bf16.mxu0 %v6502_v19  ;;  %8442 = vst [vmem:[#allocation138_spill] sm:$0xff] %v6560_v27 }
  0xd1   : > { %3995 = vmatprep.subr.bf16.mxu1 %v6514_v57 }
  0xd3   : > { %3949 = vmatpush1.bf16.msra.mxu0 %v6532_v6 }
  0xd4   : > { %3997 = vmatpush1.bf16.msra.mxu1 %v6536_v54  ;;  %3951 = vmatprep.subr.bf16.mxu0 %v6538_v1 }
  0xd5   : > { %3999 = vmatprep.subr.bf16.mxu1 %v6547_v55 }
  0xd7   : > { %3953 = vmatpush1.bf16.msra.mxu0 %v6556_v22 }
  0xd8   : > { %4001 = vmatpush1.bf16.msra.mxu1 %v6560_v27  ;;  %3318 = vmatprep.subr.msk.mxu0 %vm869_vm1, %v6566_v24 }
  0xd9   : > { %3324 = vmatprep.subr.msk.mxu1 %vm869_vm1, %v6571_v60  ;;  %v8514_v60 = vld [vmem:[#allocation68_spill] sm:$0xff] }
  0xdb   : > { %3319 = vmatpush1.msk.msra.mxu0 %vm869_vm1, %v6580_v46 }
  0xdc   : > { %3325 = vmatpush1.msk.msra.mxu1 %vm869_vm1, %v6587_v28  ;;  %1517 = vmatmul.mubr.f32.vlgmr.msra.gmra.mrb[24].mxu0 %v4587_v61 }
  0xdd   : > { %1606 = vmatmul.mubr.f32.vlgmr.msra.gmra.mrb[24].mxu1 %v4587_v61  ;;  %4003 = vmatprep.subr.bf16.mxu0 %v4681_v3  ;;  %v4590_v3 = vld [vmem:[%s5008_s29 + $0x28] sm:$0xff] }
  0xde   : > { %4051 = vmatprep.subr.bf16.mxu1 %v4692_v7  ;;  %4005 = vmatpush1.bf16.msra.mxu0 %v4694_v8  ;;  %v4591_v7 = vld [vmem:[%s5008_s29 + $0x20] sm:$0xff]  ;;  %v4592_v8 = vld [vmem:[%s5008_s29 + $0x38] sm:$0xff] }
  0xdf   : > { %4053 = vmatpush1.bf16.msra.mxu1 %v4706_v12  ;;  %3321 = vmatprep.mubr.msk.f32.mxu0 %vm856_vm0, %v4588_v13  ;;  %v4593_v12 = vld [vmem:[%s5008_s29 + $0x30] sm:$0xff] }
  0xe0   : > { %3327 = vmatprep.mubr.msk.f32.mxu1 %vm856_vm0, %v4588_v13  ;;  %1523 = vmatmul.mubr.f32.gmra.mrb[26].mxu0 %v4589_v45  ;;  %v6729_v13 = vld [vmem:[%s6618_s20 + $0x38] sm:$0xff] }
  0xe1   : > { %1612 = vmatmul.mubr.f32.gmra.mrb[26].mxu1 %v4589_v45  ;;  %4007 = vmatprep.subr.bf16.mxu0 %v4719_v16  ;;  %v6627_v16 = vld [vmem:[%s6618_s20 + $0x8] sm:$0xff] }
  0xe2   : > { %4055 = vmatprep.subr.bf16.mxu1 %v4721_v17  ;;  %4009 = vmatpush1.bf16.msra.mxu0 %v4733_v21  ;;  %v8447_v17 = vld [vmem:[#allocation2_spill] sm:$0xff]  ;;  %v8448_v21 = vld [vmem:[#allocation3_spill] sm:$0xff] }
  0xe3   : > { %4057 = vmatpush1.bf16.msra.mxu1 %v4746_v25  ;;  %3322 = vmatprep.mubr.msk.f32.mxu0 %vm856_vm0, %v4590_v3  ;;  %v8449_v25 = vld [vmem:[#allocation4_spill] sm:$0xff]  ;;  %v8468_v45 = vld [vmem:[#allocation23_spill] sm:$0xff] }
  0xe4   : > { %3328 = vmatprep.mubr.msk.f32.mxu1 %vm856_vm0, %v4590_v3  ;;  %1529 = vmatmul.mubr.f32.gmra.mrb[28].mxu0 %v4591_v7 }
  0xe5   : > { %1618 = vmatmul.mubr.f32.gmra.mrb[28].mxu1 %v4591_v7  ;;  %4011 = vmatprep.subr.bf16.mxu0 %v4748_v26  ;;  %v8450_v26 = vld [vmem:[#allocation5_spill] sm:$0xff]  ;;  %v6736_v7 = vld [vmem:[%s6618_s20 + $0x30] sm:$0xff] }
  0xe6   : > { %4059 = vmatprep.subr.bf16.mxu1 %v4759_v30  ;;  %4013 = vmatpush1.bf16.msra.mxu0 %v4771_v34  ;;  %v8451_v30 = vld [vmem:[#allocation6_spill] sm:$0xff]  ;;  %v8452_v34 = vld [vmem:[#allocation7_spill] sm:$0xff] }
  0xe7   : > { %4061 = vmatpush1.bf16.msra.mxu1 %v4784_v38  ;;  %3323 = vmatprep.mubr.msk.f32.mxu0 %vm856_vm0, %v4592_v8  ;;  %v8453_v38 = vld [vmem:[#allocation8_spill] sm:$0xff] }
  0xe8   : > { %3329 = vmatprep.mubr.msk.f32.mxu1 %vm856_vm0, %v4592_v8  ;;  %1535 = vmatmul.mubr.f32.gmra.mrb[30].mxu0 %v4593_v12  ;;  %v8469_v8 = vld [vmem:[#allocation24_spill] sm:$0xff] }
  0xe9   : > { %1624 = vmatmul.mubr.f32.gmra.mrb[30].mxu1 %v4593_v12  ;;  %4015 = vmatprep.subr.bf16.mxu0 %v4786_v39  ;;  %v8454_v39 = vld [vmem:[#allocation9_spill] sm:$0xff] }
  0xea   : > { %4063 = vmatprep.subr.bf16.mxu1 %v4798_v43  ;;  %4017 = vmatpush1.bf16.msra.mxu0 %v4819_v50  ;;  %v8455_v43 = vld [vmem:[#allocation10_spill] sm:$0xff]  ;;  %v8456_v50 = vld [vmem:[#allocation11_spill] sm:$0xff]  ;;  %v8470_v12 = vld [vmem:[#allocation25_spill] sm:$0xff] }
  0xeb   : > { %4065 = vmatpush1.bf16.msra.mxu1 %v4823_v51  ;;  %4019 = vmatprep.subr.bf16.mxu0 %v4825_v52  ;;  %v8457_v51 = vld [vmem:[#allocation12_spill] sm:$0xff]  ;;  %v4594_v52 = vld [vmem:[%s8111_s2 + $0xc08] sm:$0xf] }
  0xec   : > { %4067 = vmatprep.subr.bf16.mxu1 %v4837_v56  ;;  %3332 = vmatprep.mubr.msk.f32.mxu0 %vm856_vm0, %v6627_v16  ;;  %v4595_v56 = vld [vmem:[%s8111_s2 + $0xc18] sm:$0xf] }
  0xed   : > { %3338 = vmatprep.mubr.msk.f32.mxu1 %vm856_vm0, %v6627_v16 }
  0xee   : > { %4021 = vmatpush1.bf16.msra.mxu0 %v4855_v62  ;;  %v6677_v62 = vld [vmem:[%s6618_s20] sm:$0xff] }
  0xef   : > { %4069 = vmatpush1.bf16.msra.mxu1 %v4863_v63  ;;  %4023 = vmatprep.subr.bf16.mxu0 %v4865_v0  ;;  %v4596_v63 = vld [vmem:[%s8111_s2 + $0xc00] sm:$0xf]  ;;  %v4597_v0 = vld [vmem:[%s8111_s2 + $0xc10] sm:$0xf] }
  0xf0   : > { %4071 = vmatprep.subr.bf16.mxu1 %v4877_v5  ;;  %v8458_v5 = vld [vmem:[#allocation13_spill] sm:$0xff] }
  0xf2   : > { %4025 = vmatpush1.bf16.msra.mxu0 %v4896_v14  ;;  %v8459_v14 = vld [vmem:[#allocation14_spill] sm:$0xff] }
  0xf3   : > { %4073 = vmatpush1.bf16.msra.mxu1 %v4900_v15  ;;  %4027 = vmatprep.subr.bf16.mxu0 %v4902_v18  ;;  %v6691_v15 = vld [vmem:[%s6618_s20 + $0x18] sm:$0xff]  ;;  %v8460_v18 = vld [vmem:[#allocation15_spill] sm:$0xff] }
  0xf4   : > { %4075 = vmatprep.subr.bf16.mxu1 %v4914_v23  ;;  %v6696_v23 = vld [vmem:[%s6618_s20 + $0x10] sm:$0xff] }
  0xf6   : > { %4029 = vmatpush1.bf16.msra.mxu0 %v4937_v32  ;;  %v8461_v32 = vld [vmem:[#allocation16_spill] sm:$0xff] }
  0xf7   : > { %4077 = vmatpush1.bf16.msra.mxu1 %v4941_v33  ;;  %4031 = vmatprep.subr.bf16.mxu0 %v4943_v35  ;;  %v8462_v33 = vld [vmem:[#allocation17_spill] sm:$0xff]  ;;  %v8463_v35 = vld [vmem:[#allocation18_spill] sm:$0xff] }
  0xf8   : > { %4079 = vmatprep.subr.bf16.mxu1 %v4955_v41  ;;  %v6707_v41 = vld [vmem:[%s6618_s20 + $0x28] sm:$0xff] }
  0xfa   : > { %4033 = vmatpush1.bf16.msra.mxu0 %v4974_v48  ;;  %v8464_v48 = vld [vmem:[#allocation19_spill] sm:$0xff] }
  0xfb   : > { %4081 = vmatpush1.bf16.msra.mxu1 %v4978_v49  ;;  %4035 = vmatprep.subr.bf16.mxu0 %v4980_v53  ;;  %v6712_v49 = vld [vmem:[%s6618_s20 + $0x20] sm:$0xff]  ;;  %v8465_v53 = vld [vmem:[#allocation20_spill] sm:$0xff] }
  0xfc   : > { %4083 = vmatprep.subr.bf16.mxu1 %v4992_v58  ;;  %v8466_v58 = vld [vmem:[#allocation21_spill] sm:$0xff] }
  0xfe   : > { %4037 = vmatpush1.bf16.msra.mxu0 %v5017_v4 }
  0xff   : > { %4085 = vmatpush1.bf16.msra.mxu1 %v5024_v9  ;;  %4039 = vmatprep.subr.bf16.mxu0 %v5026_v10  ;;  %v8467_v9 = vld [vmem:[#allocation22_spill] sm:$0xff] }
 0x100   : > { %4087 = vmatprep.subr.bf16.mxu1 %v8447_v17  ;;  %v8471_v17 = vld [vmem:[#allocation26_spill] sm:$0xff] }
 0x102   : > { %4041 = vmatpush1.bf16.msra.mxu0 %v8448_v21  ;;  %v8472_v21 = vld [vmem:[#allocation27_spill] sm:$0xff] }
 0x103   : > { %4089 = vmatpush1.bf16.msra.mxu1 %v8449_v25  ;;  %4043 = vmatprep.subr.bf16.mxu0 %v8450_v26  ;;  %v8473_v25 = vld [vmem:[#allocation28_spill] sm:$0xff]  ;;  %v8474_v26 = vld [vmem:[#allocation29_spill] sm:$0xff] }
 0x104   : > { %4091 = vmatprep.subr.bf16.mxu1 %v8451_v30  ;;  %v8475_v30 = vld [vmem:[#allocation30_spill] sm:$0xff] }
 0x106   : > { %4045 = vmatpush1.bf16.msra.mxu0 %v8452_v34 }
 0x107   : > { %4093 = vmatpush1.bf16.msra.mxu1 %v8453_v38  ;;  %4047 = vmatprep.subr.bf16.mxu0 %v8454_v39 }
 0x108   : > { %4095 = vmatprep.subr.bf16.mxu1 %v8455_v43  ;;  %v8476_v43 = vld [vmem:[#allocation31_spill] sm:$0xff] }
 0x10a   : > { %4049 = vmatpush1.bf16.msra.mxu0 %v8456_v50 }
 0x10b   : > { %4097 = vmatpush1.bf16.msra.mxu1 %v8457_v51  ;;  %3330 = vmatprep.subr.msk.mxu0 %vm869_vm1, %v4594_v52  ;;  %v8477_v51 = vld [vmem:[#allocation32_spill] sm:$0xff]  ;;  %v8478_v52 = vld [vmem:[#allocation33_spill] sm:$0xff] }
 0x10c   : > { %3336 = vmatprep.subr.msk.mxu1 %vm869_vm1, %v4595_v56  ;;  %v8479_v56 = vld [vmem:[#allocation34_spill] sm:$0xff] }
 0x10e   : > { %3331 = vmatpush1.msk.msra.mxu0 %vm869_vm1, %v4596_v63 }
 0x10f   : > { %3337 = vmatpush1.msk.msra.mxu1 %vm869_vm1, %v4597_v0  ;;  %1715 = vmatmul.mubr.f32.vlgmr.msra.gmra.mrb[32].mxu0 %v6677_v62 }
 0x110   : > { %4099 = vmatprep.subr.bf16.mxu0 %v8458_v5  ;;  %4147 = vmatprep.subr.bf16.mxu1 %v8459_v14  ;;  %v8480_v14 = vld [vmem:[#allocation35_spill] sm:$0xff] }
 0x111   : > { %1804 = vmatmul.mubr.f32.vlgmr.msra.gmra.mrb[32].mxu1 %v6677_v62  ;;  %4101 = vmatpush1.bf16.msra.mxu0 %v8460_v18 }
 0x112   : > { %4149 = vmatpush1.bf16.msra.mxu1 %v8461_v32  ;;  %4103 = vmatprep.subr.bf16.mxu0 %v8462_v33  ;;  %v8481_v32 = vld [vmem:[#allocation36_spill] sm:$0xff]  ;;  %v8482_v33 = vld [vmem:[#allocation37_spill] sm:$0xff] }
 0x113   : > { %4151 = vmatprep.subr.bf16.mxu1 %v8463_v35  ;;  %3333 = vmatprep.mubr.msk.f32.mxu0 %vm856_vm0, %v6691_v15  ;;  %v8483_v35 = vld [vmem:[#allocation38_spill] sm:$0xff] }
 0x114   : > { %3339 = vmatprep.mubr.msk.f32.mxu1 %vm856_vm0, %v6691_v15  ;;  %1721 = vmatmul.mubr.f32.gmra.mrb[34].mxu0 %v6696_v23 }
 0x115   : > { %4105 = vmatpush1.bf16.msra.mxu0 %v8464_v48  ;;  %1810 = vmatmul.mubr.f32.gmra.mrb[34].mxu1 %v6696_v23 }
 0x116   : > { %4153 = vmatpush1.bf16.msra.mxu1 %v8465_v53  ;;  %4107 = vmatprep.subr.bf16.mxu0 %v8466_v58  ;;  %v6716_v4 = vpop.f32.mrb[0].mxu0 }
 0x117   : > { %4155 = vmatprep.subr.bf16.mxu1 %v8467_v9  ;;  %v6719_v10 = vpop.f32.mrb[1].mxu0  ;;  %3334 = vmatprep.mubr.msk.f32.mxu0 %vm856_vm0, %v6707_v41  ;;  %v8484_v9 = vld [vmem:[#allocation39_spill] sm:$0xff] }
 0x118   : > { %v6723_v61 = vpop.f32.mrb[0].mxu1  ;;  %3340 = vmatprep.mubr.msk.f32.mxu1 %vm856_vm0, %v6707_v41  ;;  %1727 = vmatmul.mubr.f32.gmra.mrb[36].mxu0 %v6712_v49 }
 0x119   : > { %4109 = vmatpush1.bf16.msra.mxu0 %v8468_v45  ;;  %v6732_v3 = vpop.f32.mrb[1].mxu1  ;;  %1816 = vmatmul.mubr.f32.gmra.mrb[36].mxu1 %v6712_v49 }
 0x11a   : > { %4157 = vmatpush1.bf16.msra.mxu1 %v8469_v8  ;;  %4111 = vmatprep.subr.bf16.mxu0 %v8470_v12  ;;  %v8485_v8 = vld [vmem:[#allocation40_spill] sm:$0xff]  ;;  %v8486_v12 = vld [vmem:[#allocation41_spill] sm:$0xff] }
 0x11b   : > { %4159 = vmatprep.subr.bf16.mxu1 %v8471_v17  ;;  %3335 = vmatprep.mubr.msk.f32.mxu0 %vm856_vm0, %v6729_v13  ;;  %v6751_v34 = vpop.f32.mrb[2].mxu0  ;;  %v8487_v17 = vld [vmem:[#allocation42_spill] sm:$0xff] }
 0x11c   : > { %3341 = vmatprep.mubr.msk.f32.mxu1 %vm856_vm0, %v6729_v13  ;;  %1733 = vmatmul.mubr.f32.gmra.mrb[38].mxu0 %v6736_v7  ;;  %v6757_v38 = vpop.f32.mrb[3].mxu0  ;;  %v6759_v39 = vpop.f32.mrb[2].mxu1 }
 0x11d   : > { %4113 = vmatpush1.bf16.msra.mxu0 %v8472_v21  ;;  %1822 = vmatmul.mubr.f32.gmra.mrb[38].mxu1 %v6736_v7  ;;  %v6762_v50 = vpop.f32.mrb[3].mxu1  ;;  %v8488_v21 = vld [vmem:[#allocation43_spill] sm:$0xff] }
 0x11e   : > { %4161 = vmatpush1.bf16.msra.mxu1 %v8473_v25  ;;  %4115 = vmatprep.subr.bf16.mxu0 %v8474_v26  ;;  %v8489_v25 = vld [vmem:[#allocation44_spill] sm:$0xff]  ;;  %v8490_v26 = vld [vmem:[#allocation45_spill] sm:$0xff] }
 0x11f   : > { %4163 = vmatprep.subr.bf16.mxu1 %v8475_v30  ;;  %3344 = vmatprep.mubr.msk.f32.mxu0 %vm856_vm0, %v6627_v16  ;;  %v8491_v30 = vld [vmem:[#allocation46_spill] sm:$0xff] }
 0x120   : > { %3350 = vmatprep.mubr.msk.f32.mxu1 %vm856_vm0, %v6627_v16 }
 0x121   : > { %4117 = vmatpush1.bf16.msra.mxu0 %v8476_v43  ;;  %v8492_v43 = vld [vmem:[#allocation47_spill] sm:$0xff] }
 0x122   : > { %4165 = vmatpush1.bf16.msra.mxu1 %v8477_v51  ;;  %4119 = vmatprep.subr.bf16.mxu0 %v8478_v52  ;;  %v6767_v63 = vpop.f32.mrb[4].mxu0  ;;  %v8493_v51 = vld [vmem:[#allocation48_spill] sm:$0xff]  ;;  %v8494_v52 = vld [vmem:[#allocation49_spill] sm:$0xff] }
 0x123   : > { %4167 = vmatprep.subr.bf16.mxu1 %v8479_v56  ;;  %v6769_v0 = vpop.f32.mrb[5].mxu0  ;;  %v6771_v5 = vpop.f32.mrb[4].mxu1  ;;  %v8495_v56 = vld [vmem:[#allocation50_spill] sm:$0xff] }
 0x124   : > { %v6774_v18 = vpop.f32.mrb[5].mxu1 }
 0x125   : > { %4121 = vmatpush1.bf16.msra.mxu0 %v8480_v14  ;;  %v776_v14 = vlaneseq }
 0x126   : > { %4169 = vmatpush1.bf16.msra.mxu1 %v8481_v32  ;;  %4123 = vmatprep.subr.bf16.mxu0 %v8482_v33  ;;  %v6779_v48 = vpop.f32.mrb[6].mxu0  ;;  %v8496_v32 = vld [vmem:[#allocation51_spill] sm:$0xff]  ;;  %v8497_v33 = vld [vmem:[#allocation52_spill] sm:$0xff] }
 0x127   : > { %4171 = vmatprep.subr.bf16.mxu1 %v8483_v35  ;;  %v6781_v53 = vpop.f32.mrb[7].mxu0  ;;  %v6783_v58 = vpop.f32.mrb[6].mxu1  ;;  %v8498_v35 = vld [vmem:[#allocation53_spill] sm:$0xff] }
 0x128   : > { %v6786_v45 = vpop.f32.mrb[7].mxu1 }
 0x129   : > { %4125 = vmatpush1.bf16.msra.mxu0 %v8484_v9  ;;  %v8499_v9 = vld [vmem:[#allocation54_spill] sm:$0xff] }
 0x12a   : > { %4173 = vmatpush1.bf16.msra.mxu1 %v8485_v8  ;;  %4127 = vmatprep.subr.bf16.mxu0 %v8486_v12  ;;  %v6803_v8 = vshrl.u32 %v776_v14, 7  ;;  %v8501_v12 = vld [vmem:[#allocation55_spill] sm:$0xff]  ;;  %v8506_v14 = vld [vmem:[#allocation60_spill] sm:$0xff] }
 0x12b   : > { %4175 = vmatprep.subr.bf16.mxu1 %v8487_v17  ;;  %v8502_v17 = vld [vmem:[#allocation56_spill] sm:$0xff] }
 0x12c   : > { %8500 = vst [vmem:[#allocation2_spill] sm:$0xff] %v6803_v8 }
 0x12d   : > { %4129 = vmatpush1.bf16.msra.mxu0 %v8488_v21  ;;  %v8503_v21 = vld [vmem:[#allocation57_spill] sm:$0xff] }
 0x12e   : > { %4177 = vmatpush1.bf16.msra.mxu1 %v8489_v25  ;;  %4131 = vmatprep.subr.bf16.mxu0 %v8490_v26  ;;  %v8504_v25 = vld [vmem:[#allocation58_spill] sm:$0xff]  ;;  %v8257_v26 = vsub.s32 0, %v6803_v8 }
 0x12f   : > { %4179 = vmatprep.subr.bf16.mxu1 %v8491_v30  ;;  %v8256_v30 = vsub.s32 1, %v6803_v8 }
 0x131   : > { %4133 = vmatpush1.bf16.msra.mxu0 %v8492_v43  ;;  %v8255_v43 = vsub.s32 2, %v6803_v8 }
 0x132   : > { %4181 = vmatpush1.bf16.msra.mxu1 %v8493_v51  ;;  %4135 = vmatprep.subr.bf16.mxu0 %v8494_v52  ;;  %v8505_v51 = vld [vmem:[#allocation59_spill] sm:$0xff]  ;;  %v772_v52 = vld [vmem:[%s8112_s3] sm:$0xff] }
 0x133   : > { %4183 = vmatprep.subr.bf16.mxu1 %v8495_v56  ;;  %v8254_v56 = vsub.s32 3, %v6803_v8 }
 0x135   : > { %4137 = vmatpush1.bf16.msra.mxu0 %v8496_v32  ;;  %v4598_v32 = vld [vmem:[%s8111_s2 + $0xc28] sm:$0xf] }
 0x136   : > { %4185 = vmatpush1.bf16.msra.mxu1 %v8497_v33  ;;  %4139 = vmatprep.subr.bf16.mxu0 %v8498_v35  ;;  %v4599_v33 = vld [vmem:[%s8111_s2 + $0xc38] sm:$0xf]  ;;  %v6828_v35 = vrot.slane %v772_v52, %v8257_v26  ;;  %v8510_v26 = vld [vmem:[#allocation64_spill] sm:$0xff] }
 0x137   : > { %4187 = vmatprep.subr.bf16.mxu1 %v8499_v9  ;;  %v6832_v9 = vrot.slane %v772_v52, %v8256_v30 }
 0x139   : > { %4141 = vmatpush1.bf16.msra.mxu0 %v8501_v12  ;;  %v6836_v12 = vrot.slane %v772_v52, %v8255_v43  ;;  %v8264_v43 = vsub.s32 7, %v6803_v8  ;;  %v6863_v30 = vadd.f32 %v6719_v10, %v6832_v9  ;;  %v6887_v10 = vadd.f32 %v6757_v38, %v6832_v9  ;;  %v8513_v38 = vld [vmem:[#allocation67_spill] sm:$0xff] }
 0x13a   : > { %4189 = vmatpush1.bf16.msra.mxu1 %v8502_v17  ;;  %4143 = vmatprep.subr.bf16.mxu0 %v8503_v21  ;;  %v4600_v17 = vld [vmem:[%s8111_s2 + $0xc20] sm:$0xf]  ;;  %v6844_v21 = vrot.slane %v772_v52, %v8254_v56  ;;  %v8509_v56 = vld [vmem:[#allocation63_spill] sm:$0xff] }
 0x13b   : > { %4191 = vmatprep.subr.bf16.mxu1 %v8504_v25  ;;  %v4601_v25 = vld [vmem:[%s8111_s2 + $0xc30] sm:$0xf]  ;;  %v6907_v28 = vrot.slane %v772_v52, %v8264_v43 }
 0x13d   : > { %4145 = vmatpush1.bf16.msra.mxu0 %v8505_v51  ;;  %v8258_v51 = vsub.s32 4, %v6803_v8 }
 0x13e   : > { %4193 = vmatpush1.bf16.msra.mxu1 %v8506_v14  ;;  %3342 = vmatprep.subr.msk.mxu0 %vm869_vm1, %v4598_v32  ;;  %v8507_v14 = vld [vmem:[#allocation61_spill] sm:$0xff]  ;;  %v8260_v32 = vsub.s32 6, %v6803_v8 }
 0x13f   : > { %3348 = vmatprep.subr.msk.mxu1 %vm869_vm1, %v4599_v33  ;;  %v8263_v33 = vsub.s32 5, %v6803_v8 }
 0x141   : > { %3343 = vmatpush1.msk.msra.mxu0 %vm869_vm1, %v4600_v17  ;;  %v8508_v17 = vld [vmem:[#allocation62_spill] sm:$0xff] }
 0x142   : > { %3349 = vmatpush1.msk.msra.mxu1 %vm869_vm1, %v4601_v25  ;;  %1893 = vmatmul.mubr.f32.vlgmr.msra.gmra.mrb[40].mxu0 %v6677_v62  ;;  %v985_v25 = vadd.f32 %v6716_v4, %v6828_v35  ;;  %v6883_v4 = vrot.slane %v772_v52, %v8258_v51  ;;  %v8512_v51 = vld [vmem:[#allocation66_spill] sm:$0xff] }
 0x143   : > { %1982 = vmatmul.mubr.f32.vlgmr.msra.gmra.mrb[40].mxu1 %v6677_v62  ;;  %4195 = vmatprep.subr.bf16.mxu0 %v8507_v14  ;;  %v1074_v14 = vadd.f32 %v6723_v61, %v6836_v12  ;;  %v8511_v61 = vld [vmem:[#allocation65_spill] sm:$0xff] }
 0x144   : > { %4243 = vmatprep.subr.bf16.mxu1 %v8508_v17  ;;  %4197 = vmatpush1.bf16.msra.mxu0 %v8509_v56  ;;  %v6872_v56 = vadd.f32 %v6732_v3, %v6844_v21  ;;  %v6876_v17 = vadd.f32 %v6751_v34, %v6828_v35  ;;  %v6893_v3 = vrot.slane %v772_v52, %v8260_v32  ;;  %v2363_v32 = vmax.f32 %v6863_v30, 0.0 }
 0x145   : > { %4245 = vmatpush1.bf16.msra.mxu1 %v8510_v26  ;;  %3345 = vmatprep.mubr.msk.f32.mxu0 %vm856_vm0, %v6691_v15  ;;  %v6897_v34 = vrot.slane %v772_v52, %v8263_v33  ;;  %v6901_v26 = vadd.f32 %v6759_v39, %v6836_v12  ;;  %v2364_v46 = vmax.f32 %v1074_v14, 0.0  ;;  %v6926_v14 = vadd.f32 %v6767_v63, %v6828_v35 }
 0x146   : > { %3351 = vmatprep.mubr.msk.f32.mxu1 %vm856_vm0, %v6691_v15  ;;  %1899 = vmatmul.mubr.f32.gmra.mrb[42].mxu0 %v6696_v23  ;;  %v2365_v39 = vmax.f32 %v6872_v56, 0.0  ;;  %v8515_v56 = vld [vmem:[#allocation69_spill] sm:$0xff] }
 0x147   : > { %1988 = vmatmul.mubr.f32.gmra.mrb[42].mxu1 %v6696_v23  ;;  %4199 = vmatprep.subr.bf16.mxu0 %v8511_v61  ;;  %v2362_v61 = vmax.f32 %v985_v25, 0.0  ;;  %v2379_v25 = vmax.f32 %v6887_v10, 0.0  ;;  %v2380_v8 = vmax.f32 %v6901_v26, 0.0  ;;  %v8516_v10 = vld [vmem:[#allocation70_spill] sm:$0xff]  ;;  %v8517_v26 = vld [vmem:[#allocation71_spill] sm:$0xff] }
 0x148   : > { %4247 = vmatprep.subr.bf16.mxu1 %v8512_v51  ;;  %4201 = vmatpush1.bf16.msra.mxu0 %v8513_v38  ;;  %v2378_v51 = vmax.f32 %v6876_v17, 0.0  ;;  %v6917_v38 = vadd.f32 %v6762_v50, %v6844_v21 }
 0x149   : > { %4249 = vmatpush1.bf16.msra.mxu1 %v8514_v60  ;;  %3346 = vmatprep.mubr.msk.f32.mxu0 %vm856_vm0, %v6707_v41  ;;  %v1162_v33 = vpop.f32.mrb[8].mxu0 }
 0x14a   : > { %3352 = vmatprep.mubr.msk.f32.mxu1 %vm856_vm0, %v6707_v41  ;;  %1905 = vmatmul.mubr.f32.gmra.mrb[44].mxu0 %v6712_v49  ;;  %v1163_v30 = vadd.f32 %v1162_v33, %v6883_v4  ;;  %v1251_v60 = vpop.f32.mrb[8].mxu1  ;;  %v1164_v52 = vpop.f32.mrb[9].mxu0  ;;  %v6935_v33 = vadd.f32 %v6769_v0, %v6832_v9 }
 0x14b   : > { %1994 = vmatmul.mubr.f32.gmra.mrb[44].mxu1 %v6712_v49  ;;  %4203 = vmatprep.subr.bf16.mxu0 %v8515_v56  ;;  %v1252_v50 = vadd.f32 %v1251_v60, %v6893_v3  ;;  %v1165_v17 = vadd.f32 %v1164_v52, %v6897_v34  ;;  %v1253_v43 = vpop.f32.mrb[9].mxu1  ;;  %v6942_v56 = vadd.f32 %v6771_v5, %v6836_v12 }
 0x14c   : > { %4251 = vmatprep.subr.bf16.mxu1 %v5746_v44  ;;  %4205 = vmatpush1.bf16.msra.mxu0 %v8516_v10  ;;  %v2366_v63 = vmax.f32 %v1163_v30, 0.0  ;;  %v1254_v24 = vadd.f32 %v1253_v43, %v6907_v28  ;;  %v6946_v60 = vadd.f32 %v6774_v18, %v6844_v21  ;;  %v2381_v30 = vmax.f32 %v6917_v38, 0.0 }
 0x14d   : > { %4253 = vmatpush1.bf16.msra.mxu1 %v8517_v26  ;;  %v2368_v52 = vmax.f32 %v1252_v50, 0.0  ;;  %3347 = vmatprep.mubr.msk.f32.mxu0 %vm856_vm0, %v6729_v13  ;;  %v2367_v44 = vmax.f32 %v1165_v17, 0.0  ;;  %v1168_v0 = vpop.f32.mrb[10].mxu0  ;;  %v2394_v50 = vmax.f32 %v6926_v14, 0.0 }
 0x14e   : > { %v6952_v10 = vmax.f32 %v2362_v61, %v2366_v63  ;;  %3353 = vmatprep.mubr.msk.f32.mxu1 %vm856_vm0, %v6729_v13  ;;  %v2369_v5 = vmax.f32 %v1254_v24, 0.0  ;;  %1911 = vmatmul.mubr.f32.gmra.mrb[46].mxu0 %v6736_v7  ;;  %v1169_v18 = vadd.f32 %v1168_v0, %v6883_v4  ;;  %v1257_v43 = vpop.f32.mrb[10].mxu1  ;;  %v1170_v26 = vpop.f32.mrb[11].mxu0  ;;  %v8521_v61 = vld [vmem:[#allocation72_spill] sm:$0xff]  ;;  %v8524_v0 = vld [vmem:[#allocation74_spill] sm:$0xff] }
 0x14f   : > { %v6959_v27 = vmax.f32 %v2364_v46, %v2368_v52  ;;  %v6961_v17 = vmax.f32 %v2363_v32, %v2367_v44  ;;  %2000 = vmatmul.mubr.f32.gmra.mrb[46].mxu1 %v6736_v7  ;;  %4207 = vmatprep.subr.bf16.mxu0 %v8521_v61  ;;  %v1258_v38 = vadd.f32 %v1257_v43, %v6893_v3  ;;  %v1259_v63 = vpop.f32.mrb[11].mxu1  ;;  %v2395_v32 = vmax.f32 %v6935_v33, 0.0  ;;  %v8525_v61 = vld [vmem:[#allocation75_spill] sm:$0xff] }
 0x150   : > { %8518 = vst [vmem:[#allocation3_spill] sm:$0xff] %v6952_v10  ;;  %v6966_v24 = vmax.f32 %v2365_v39, %v2369_v5  ;;  %v8523_v10 = vld [vmem:[#allocation73_spill] sm:$0xff]  ;;  %4209 = vmatpush1.bf16.msra.mxu0 %v8524_v0  ;;  %v2382_v22 = vmax.f32 %v1169_v18, 0.0  ;;  %v1171_v14 = vadd.f32 %v1170_v26, %v6897_v34  ;;  %v1260_v46 = vadd.f32 %v1259_v63, %v6907_v28  ;;  %v8526_v39 = vld [vmem:[#allocation76_spill] sm:$0xff] }
 0x151   : > { %8519 = vst [vmem:[#allocation4_spill] sm:$0xff] %v6959_v27  ;;  %8520 = vst [vmem:[#allocation5_spill] sm:$0xff] %v6961_v17  ;;  %4255 = vmatprep.subr.bf16.mxu1 %v8523_v10  ;;  %v2396_v52 = vmax.f32 %v6942_v56, 0.0  ;;  %v2397_v44 = vmax.f32 %v6946_v60, 0.0  ;;  %v2384_v43 = vmax.f32 %v1258_v38, 0.0  ;;  %4211 = vmatprep.subr.bf16.mxu0 %v8526_v39  ;;  %v1174_v5 = vpop.f32.mrb[12].mxu0  ;;  %v1003_v56 = vadd.f32 %v6779_v48, %v6828_v35 }
 0x152   : > { %8522 = vst [vmem:[#allocation6_spill] sm:$0xff] %v6966_v24  ;;  %4257 = vmatpush1.bf16.msra.mxu1 %v8525_v61  ;;  %v6977_v10 = vmax.f32 %v2378_v51, %v2382_v22  ;;  %v2383_v0 = vmax.f32 %v1171_v14, 0.0  ;;  %v2385_v18 = vmax.f32 %v1260_v46, 0.0  ;;  %v8528_v24 = vld [vmem:[#allocation77_spill] sm:$0xff]  ;;  %v1175_v26 = vadd.f32 %v1174_v5, %v6883_v4  ;;  %v1263_v63 = vpop.f32.mrb[12].mxu1  ;;  %v1176_v33 = vpop.f32.mrb[13].mxu0  ;;  %3356 = vmatprep.mubr.msk.f32.mxu0 %vm856_vm0, %v6627_v16 }
 0x153   : > { %4259 = vmatprep.subr.bf16.mxu1 %v8528_v24  ;;  %v6985_v60 = vmax.f32 %v2380_v8, %v2384_v43  ;;  %v1264_v38 = vadd.f32 %v1263_v63, %v6893_v3  ;;  %v1177_v22 = vadd.f32 %v1176_v33, %v6897_v34  ;;  %v1265_v51 = vpop.f32.mrb[13].mxu1  ;;  %3362 = vmatprep.mubr.msk.f32.mxu1 %vm856_vm0, %v6627_v16  ;;  %v8532_v46 = vld [vmem:[#allocation78_spill] sm:$0xff]  ;;  %v8533_v35 = vld [vmem:[#allocation79_spill] sm:$0xff]  ;;  %v8534_v63 = vld [vmem:[#allocation80_spill] sm:$0xff] }
 0x154   : > { %8527 = vst [vmem:[#allocation7_spill] sm:$0xff] %v6977_v10  ;;  %v6991_v24 = vmax.f32 %v2379_v25, %v2383_v0  ;;  %v6993_v14 = vmax.f32 %v2381_v30, %v2385_v18  ;;  %4213 = vmatpush1.bf16.msra.mxu0 %v8532_v46  ;;  %v2398_v61 = vmax.f32 %v1175_v26, 0.0  ;;  %v1266_v39 = vadd.f32 %v1265_v51, %v6907_v28  ;;  %v8536_v26 = vld [vmem:[#allocation81_spill] sm:$0xff]  ;;  %v7788_v10 = vld [vmem:[%s8113_s4 + $0x128] sm:$0xff] }
 0x155   : > { %8529 = vst [vmem:[#allocation8_spill] sm:$0xff] %v6985_v60  ;;  %v1005_v48 = vadd.f32 %v6781_v53, %v6832_v9  ;;  %v1092_v8 = vadd.f32 %v6783_v58, %v6836_v12  ;;  %v2400_v43 = vmax.f32 %v1264_v38, 0.0  ;;  %v2399_v5 = vmax.f32 %v1177_v22, 0.0  ;;  %4215 = vmatprep.subr.bf16.mxu0 %v8534_v63  ;;  %v1180_v25 = vpop.f32.mrb[14].mxu0  ;;  %v7778_v60 = vld [vmem:[%s8113_s4 + $0x28] sm:$0xff]  ;;  %8639 = vst [vmem:[#allocation42_spill] sm:$0xff] %v7788_v10 }
 0x156   : > { %8530 = vst [vmem:[#allocation9_spill] sm:$0xff] %v6991_v24  ;;  %8531 = vst [vmem:[#allocation10_spill] sm:$0xff] %v6993_v14  ;;  %4261 = vmatpush1.bf16.msra.mxu1 %v8533_v35  ;;  %v1094_v30 = vadd.f32 %v6786_v45, %v6844_v21  ;;  %v7005_v0 = vmax.f32 %v2394_v50, %v2398_v61  ;;  %v2401_v18 = vmax.f32 %v1266_v39, 0.0  ;;  %v1269_v9 = vpop.f32.mrb[14].mxu1  ;;  %v1182_v33 = vpop.f32.mrb[15].mxu0  ;;  %v2410_v46 = vmax.f32 %v1003_v56, 0.0 }
 0x157   : > { %4263 = vmatprep.subr.bf16.mxu1 %v8536_v26  ;;  %v1181_v53 = vadd.f32 %v1180_v25, %v6883_v4  ;;  %v7009_v58 = vmax.f32 %v2396_v52, %v2400_v43  ;;  %v7011_v12 = vmax.f32 %v2395_v32, %v2399_v5  ;;  %v1270_v38 = vadd.f32 %v1269_v9, %v6893_v3  ;;  %v1271_v51 = vpop.f32.mrb[15].mxu1  ;;  %v8540_v21 = vld [vmem:[#allocation82_spill] sm:$0xff]  ;;  %v8541_v35 = vld [vmem:[#allocation83_spill] sm:$0xff]  ;;  %v8542_v43 = vld [vmem:[#allocation84_spill] sm:$0xff] }
 0x158   : > { %8535 = vst [vmem:[#allocation11_spill] sm:$0xff] %v7005_v0  ;;  %v1183_v22 = vadd.f32 %v1182_v33, %v6897_v34  ;;  %v7015_v45 = vmax.f32 %v2397_v44, %v2401_v18  ;;  %4217 = vmatpush1.bf16.msra.mxu0 %v8540_v21  ;;  %v1272_v61 = vadd.f32 %v1271_v51, %v6907_v28  ;;  %v2411_v4 = vmax.f32 %v1005_v48, 0.0  ;;  %v8544_v56 = vld [vmem:[#allocation85_spill] sm:$0xff]  ;;  %v8548_v28 = vld [vmem:[#allocation86_spill] sm:$0xff]  ;;  %v8549_v48 = vld [vmem:[#allocation87_spill] sm:$0xff] }
 0x159   : > { %8537 = vst [vmem:[#allocation12_spill] sm:$0xff] %v7009_v58  ;;  %8538 = vst [vmem:[#allocation13_spill] sm:$0xff] %v7011_v12  ;;  %v2414_v50 = vmax.f32 %v1181_v53, 0.0  ;;  %v2412_v39 = vmax.f32 %v1092_v8, 0.0  ;;  %v2416_v52 = vmax.f32 %v1270_v38, 0.0  ;;  %4219 = vmatprep.subr.bf16.mxu0 %v8542_v43  ;;  %v2413_v3 = vmax.f32 %v1094_v30, 0.0 }
 0x15a   : > { %8539 = vst [vmem:[#allocation14_spill] sm:$0xff] %v7015_v45  ;;  %4265 = vmatpush1.bf16.msra.mxu1 %v8541_v35  ;;  %v2415_v32 = vmax.f32 %v1183_v22, 0.0  ;;  %v2417_v34 = vmax.f32 %v1272_v61, 0.0  ;;  %v8550_v8 = vld [vmem:[#allocation88_spill] sm:$0xff]  ;;  %v8551_v18 = vld [vmem:[#allocation89_spill] sm:$0xff]  ;;  %v8552_v30 = vld [vmem:[#allocation90_spill] sm:$0xff] }
 0x15b   : > { %v7021_v5 = vmax.f32 %v2410_v46, %v2414_v50  ;;  %4267 = vmatprep.subr.bf16.mxu1 %v8544_v56  ;;  %v7024_v44 = vmax.f32 %v2412_v39, %v2416_v52  ;;  %v8553_v26 = vld [vmem:[#allocation91_spill] sm:$0xff]  ;;  %v8554_v53 = vld [vmem:[#allocation92_spill] sm:$0xff]  ;;  %v8555_v9 = vld [vmem:[#allocation93_spill] sm:$0xff] }
 0x15c   : > { %v7026_v63 = vmax.f32 %v2411_v4, %v2415_v32  ;;  %v7028_v25 = vmax.f32 %v2413_v3, %v2417_v34  ;;  %4221 = vmatpush1.bf16.msra.mxu0 %v8548_v28  ;;  %v8556_v33 = vld [vmem:[#allocation94_spill] sm:$0xff]  ;;  %v8557_v38 = vld [vmem:[#allocation95_spill] sm:$0xff]  ;;  %v8558_v22 = vld [vmem:[#allocation96_spill] sm:$0xff] }
 0x15d   : > { %8543 = vst [vmem:[#allocation15_spill] sm:$0xff] %v7021_v5  ;;  %8545 = vst [vmem:[#allocation16_spill] sm:$0xff] %v7024_v44  ;;  %4223 = vmatprep.subr.bf16.mxu0 %v8550_v8  ;;  %v8559_v51 = vld [vmem:[#allocation97_spill] sm:$0xff]  ;;  %v8560_v46 = vld [vmem:[#allocation98_spill] sm:$0xff] }
 0x15e   : > { %8546 = vst [vmem:[#allocation17_spill] sm:$0xff] %v7026_v63  ;;  %8547 = vst [vmem:[#allocation18_spill] sm:$0xff] %v7028_v25  ;;  %4269 = vmatpush1.bf16.msra.mxu1 %v8549_v48  ;;  %v8561_v21 = vld [vmem:[#allocation99_spill] sm:$0xff]  ;;  %v8562_v50 = vld [vmem:[#allocation100_spill] sm:$0xff] }
 0x15f   : > { %4271 = vmatprep.subr.bf16.mxu1 %v8551_v18  ;;  %v8563_v61 = vld [vmem:[#allocation101_spill] sm:$0xff]  ;;  %v8564_v4 = vld [vmem:[#allocation102_spill] sm:$0xff]  ;;  %v8565_v39 = vld [vmem:[#allocation103_spill] sm:$0xff] }
 0x160   : > { %4225 = vmatpush1.bf16.msra.mxu0 %v8552_v30  ;;  %v8566_v35 = vld [vmem:[#allocation104_spill] sm:$0xff]  ;;  %v8567_v52 = vld [vmem:[#allocation105_spill] sm:$0xff]  ;;  %v8568_v32 = vld [vmem:[#allocation106_spill] sm:$0xff] }
 0x161   : > { %4227 = vmatprep.subr.bf16.mxu0 %v8554_v53  ;;  %v8569_v43 = vld [vmem:[#allocation107_spill] sm:$0xff]  ;;  %v4603_v34 = vld [vmem:[%s8111_s2 + $0xc58] sm:$0xf]  ;;  %v4604_v56 = vld [vmem:[%s8111_s2 + $0xc40] sm:$0xf] }
 0x162   : > { %4273 = vmatpush1.bf16.msra.mxu1 %v8553_v26  ;;  %v4602_v3 = vld [vmem:[%s8111_s2 + $0xc48] sm:$0xf]  ;;  %v4605_v28 = vld [vmem:[%s8111_s2 + $0xc50] sm:$0xf]  ;;  %v8575_v53 = vld [vmem:[#allocation113_spill] sm:$0xff] }
 0x163   : > { %4275 = vmatprep.subr.bf16.mxu1 %v8555_v9  ;;  %v8570_v48 = vld [vmem:[#allocation108_spill] sm:$0xff]  ;;  %v8573_v8 = vld [vmem:[#allocation111_spill] sm:$0xff]  ;;  %v7718_v25 = vld [vmem:[%s8113_s4 + $0x98] sm:$0xff] }
 0x164   : > { %4229 = vmatpush1.bf16.msra.mxu0 %v8556_v33  ;;  %v8577_v9 = vld [vmem:[#allocation115_spill] sm:$0xff]  ;;  %v8578_v33 = vld [vmem:[#allocation116_spill] sm:$0xff]  ;;  %v7728_v63 = vld [vmem:[%s8113_s4 + $0x198] sm:$0xff] }
 0x165   : > { %4231 = vmatprep.subr.bf16.mxu0 %v8558_v22  ;;  %v7698_v44 = vld [vmem:[%s8113_s4 + $0x8] sm:$0xff]  ;;  %v7738_v58 = vld [vmem:[%s8113_s4 + $0x18] sm:$0xff] }
 0x166   : > { %4277 = vmatpush1.bf16.msra.mxu1 %v8557_v38  ;;  %v7708_v5 = vld [vmem:[%s8113_s4 + $0x108] sm:$0xff]  ;;  %v7748_v0 = vld [vmem:[%s8113_s4 + $0x118] sm:$0xff] }
 0x167   : > { %4279 = vmatprep.subr.bf16.mxu1 %v8559_v51  ;;  %v7758_v45 = vld [vmem:[%s8113_s4 + $0xa8] sm:$0xff]  ;;  %v7814_v24 = vld [vmem:[%s8113_s4 + $0xb8] sm:$0xff] }
 0x168   : > { %4233 = vmatpush1.bf16.msra.mxu0 %v8560_v46  ;;  %v8579_v46 = vld [vmem:[#allocation117_spill] sm:$0xff]  ;;  %v7768_v12 = vld [vmem:[%s8113_s4 + $0x1a8] sm:$0xff] }
 0x169   : > { %4235 = vmatprep.subr.bf16.mxu0 %v8562_v50  ;;  %v8580_v50 = vld [vmem:[#allocation118_spill] sm:$0xff] }
 0x16a   : > { %4281 = vmatpush1.bf16.msra.mxu1 %v8561_v21 }
 0x16b   : > { %4283 = vmatprep.subr.bf16.mxu1 %v8563_v61  ;;  %v8581_v61 = vld [vmem:[#allocation119_spill] sm:$0xff] }
 0x16c   : > { %4237 = vmatpush1.bf16.msra.mxu0 %v8564_v4  ;;  %v8582_v4 = vld [vmem:[#allocation120_spill] sm:$0xff] }
 0x16d   : > { %4239 = vmatprep.subr.bf16.mxu0 %v8566_v35 }
 0x16e   : > { %4285 = vmatpush1.bf16.msra.mxu1 %v8565_v39 }
 0x16f   : > { %4287 = vmatprep.subr.bf16.mxu1 %v8567_v52 }
 0x170   : > { %4241 = vmatpush1.bf16.msra.mxu0 %v8568_v32 }
 0x171   : > { %3354 = vmatprep.subr.msk.mxu0 %vm869_vm1, %v4602_v3  ;;  %v8585_v3 = vld [vmem:[#allocation123_spill] sm:$0xff] }
 0x172   : > { %4289 = vmatpush1.bf16.msra.mxu1 %v8569_v43  ;;  %v8584_v43 = vld [vmem:[#allocation122_spill] sm:$0xff] }
 0x173   : > { %3360 = vmatprep.subr.msk.mxu1 %vm869_vm1, %v4603_v34  ;;  %v8586_v34 = vld [vmem:[#allocation124_spill] sm:$0xff] }
 0x174   : > { %3355 = vmatpush1.msk.msra.mxu0 %vm869_vm1, %v4604_v56  ;;  %v8587_v56 = vld [vmem:[#allocation125_spill] sm:$0xff] }
 0x175   : > { %2071 = vmatmul.mubr.f32.vlgmr.msra.gmra.mrb[48].mxu0 %v6677_v62  ;;  %4291 = vmatprep.subr.bf16.mxu0 %v6138_v42  ;;  %v8571_v42 = vld [vmem:[#allocation109_spill] sm:$0xff] }
 0x176   : > { %3361 = vmatpush1.msk.msra.mxu1 %vm869_vm1, %v4605_v28  ;;  %4293 = vmatpush1.bf16.msra.mxu0 %v6148_v20  ;;  %v8588_v28 = vld [vmem:[#allocation126_spill] sm:$0xff] }
 0x177   : > { %4339 = vmatprep.subr.bf16.mxu1 %v6140_v11  ;;  %2160 = vmatmul.mubr.f32.vlgmr.msra.gmra.mrb[48].mxu1 %v6677_v62 }
 0x178   : > { %4341 = vmatpush1.bf16.msra.mxu1 %v6151_v31  ;;  %4295 = vmatprep.subr.bf16.mxu0 %v6153_v2  ;;  %v8572_v2 = vld [vmem:[#allocation110_spill] sm:$0xff] }
 0x179   : > { %4343 = vmatprep.subr.bf16.mxu1 %v8570_v48  ;;  %3357 = vmatprep.mubr.msk.f32.mxu0 %vm856_vm0, %v6691_v15  ;;  %v8589_v48 = vld [vmem:[#allocation127_spill] sm:$0xff] }
 0x17a   : > { %2077 = vmatmul.mubr.f32.gmra.mrb[50].mxu0 %v6696_v23  ;;  %3363 = vmatprep.mubr.msk.f32.mxu1 %vm856_vm0, %v6691_v15 }
 0x17b   : > { %4297 = vmatpush1.bf16.msra.mxu0 %v8571_v42  ;;  %2166 = vmatmul.mubr.f32.gmra.mrb[50].mxu1 %v6696_v23  ;;  %v8590_v42 = vld [vmem:[#allocation128_spill] sm:$0xff] }
 0x17c   : > { %4345 = vmatpush1.bf16.msra.mxu1 %v6191_v37  ;;  %4299 = vmatprep.subr.bf16.mxu0 %v6193_v40  ;;  %v7085_v20 = vpop.f32.mrb[16].mxu0  ;;  %v8574_v40 = vld [vmem:[#allocation112_spill] sm:$0xff] }
 0x17d   : > { %4347 = vmatprep.subr.bf16.mxu1 %v8572_v2  ;;  %v7088_v11 = vpop.f32.mrb[17].mxu0  ;;  %3358 = vmatprep.mubr.msk.f32.mxu0 %vm856_vm0, %v6707_v41  ;;  %v8591_v2 = vld [vmem:[#allocation129_spill] sm:$0xff] }
 0x17e   : > { %v7092_v31 = vpop.f32.mrb[16].mxu1  ;;  %2083 = vmatmul.mubr.f32.gmra.mrb[52].mxu0 %v6712_v49  ;;  %3364 = vmatprep.mubr.msk.f32.mxu1 %vm856_vm0, %v6707_v41 }
 0x17f   : > { %4301 = vmatpush1.bf16.msra.mxu0 %v8573_v8  ;;  %v7098_v37 = vpop.f32.mrb[17].mxu1  ;;  %2172 = vmatmul.mubr.f32.gmra.mrb[52].mxu1 %v6712_v49  ;;  %v8592_v8 = vld [vmem:[#allocation130_spill] sm:$0xff] }
 0x180   : > { %4349 = vmatpush1.bf16.msra.mxu1 %v6233_v59  ;;  %4303 = vmatprep.subr.bf16.mxu0 %v6235_v29  ;;  %v8576_v59 = vld [vmem:[#allocation114_spill] sm:$0xff] }
 0x181   : > { %4351 = vmatprep.subr.bf16.mxu1 %v8574_v40  ;;  %3359 = vmatprep.mubr.msk.f32.mxu0 %vm856_vm0, %v6729_v13  ;;  %v7106_v18 = vpop.f32.mrb[18].mxu0  ;;  %v8593_v40 = vld [vmem:[#allocation131_spill] sm:$0xff] }
 0x182   : > { %2089 = vmatmul.mubr.f32.gmra.mrb[54].mxu0 %v6736_v7  ;;  %3365 = vmatprep.mubr.msk.f32.mxu1 %vm856_vm0, %v6729_v13  ;;  %v7111_v30 = vpop.f32.mrb[19].mxu0  ;;  %v7113_v26 = vpop.f32.mrb[18].mxu1 }
 0x183   : > { %4305 = vmatpush1.bf16.msra.mxu0 %v8575_v53  ;;  %2178 = vmatmul.mubr.f32.gmra.mrb[54].mxu1 %v6736_v7  ;;  %v7117_v29 = vpop.f32.mrb[19].mxu1  ;;  %v8594_v53 = vld [vmem:[#allocation132_spill] sm:$0xff] }
 0x184   : > { %4353 = vmatpush1.bf16.msra.mxu1 %v8576_v59  ;;  %4307 = vmatprep.subr.bf16.mxu0 %v8577_v9  ;;  %v8595_v59 = vld [vmem:[#allocation133_spill] sm:$0xff]  ;;  %v8596_v9 = vld [vmem:[#allocation134_spill] sm:$0xff] }
 0x185   : > { %4355 = vmatprep.subr.bf16.mxu1 %v8578_v33  ;;  %3368 = vmatprep.mubr.msk.f32.mxu0 %vm856_vm0, %v6627_v16  ;;  %v1352_v38 = vpop.f32.mrb[20].mxu0  ;;  %v8597_v33 = vld [vmem:[#allocation135_spill] sm:$0xff] }
 0x186   : > { %3374 = vmatprep.mubr.msk.f32.mxu1 %vm856_vm0, %v6627_v16  ;;  %v7126_v22 = vpop.f32.mrb[21].mxu0  ;;  %v7128_v51 = vpop.f32.mrb[20].mxu1  ;;  %v8583_v16 = vld [vmem:[#allocation121_spill] sm:$0xff] }
 0x187   : > { %4309 = vmatpush1.bf16.msra.mxu0 %v8579_v46  ;;  %v7131_v21 = vpop.f32.mrb[21].mxu1  ;;  %v8598_v46 = vld [vmem:[#allocation136_spill] sm:$0xff] }
 0x188   : > { %4357 = vmatpush1.bf16.msra.mxu1 %v8580_v50  ;;  %4311 = vmatprep.subr.bf16.mxu0 %v8581_v61  ;;  %v773_v50 = vld [vmem:[%s8112_s3 + $0x8] sm:$0xff]  ;;  %v8599_v61 = vld [vmem:[#allocation137_spill] sm:$0xff] }
 0x189   : > { %4359 = vmatprep.subr.bf16.mxu1 %v8582_v4  ;;  %v7136_v39 = vpop.f32.mrb[22].mxu0 }
 0x18a   : > { %v7138_v35 = vpop.f32.mrb[23].mxu0  ;;  %v7140_v52 = vpop.f32.mrb[22].mxu1 }
 0x18b   : > { %4313 = vmatpush1.bf16.msra.mxu0 %v8583_v16  ;;  %v7143_v32 = vpop.f32.mrb[23].mxu1 }
 0x18c   : > { %4361 = vmatpush1.bf16.msra.mxu1 %v8584_v43  ;;  %4315 = vmatprep.subr.bf16.mxu0 %v8585_v3 }
 0x18d   : > { %4363 = vmatprep.subr.bf16.mxu1 %v8586_v34  ;;  %v8608_v34 = vld [vmem:[#allocation141_spill] sm:$0xff] }
 0x18f   : > { %4317 = vmatpush1.bf16.msra.mxu0 %v8587_v56  ;;  %v8609_v56 = vld [vmem:[#allocation142_spill] sm:$0xff] }
 0x190   : > { %4365 = vmatpush1.bf16.msra.mxu1 %v8588_v28  ;;  %4319 = vmatprep.subr.bf16.mxu0 %v8589_v48 }
 0x191   : > { %4367 = vmatprep.subr.bf16.mxu1 %v8590_v42 }
 0x193   : > { %4321 = vmatpush1.bf16.msra.mxu0 %v8591_v2 }
 0x194   : > { %4369 = vmatpush1.bf16.msra.mxu1 %v8592_v8  ;;  %4323 = vmatprep.subr.bf16.mxu0 %v8593_v40 }
 0x195   : > { %4371 = vmatprep.subr.bf16.mxu1 %v8594_v53 }
 0x197   : > { %4325 = vmatpush1.bf16.msra.mxu0 %v8595_v59 }
 0x198   : > { %4373 = vmatpush1.bf16.msra.mxu1 %v8596_v9  ;;  %4327 = vmatprep.subr.bf16.mxu0 %v8597_v33 }
 0x199   : > { %4375 = vmatprep.subr.bf16.mxu1 %v8598_v46 }
 0x19b   : > { %4329 = vmatpush1.bf16.msra.mxu0 %v6496_v47  ;;  %v8600_v47 = vld [vmem:[#allocation138_spill] sm:$0xff] }
 0x19c   : > { %4377 = vmatpush1.bf16.msra.mxu1 %v6500_v36  ;;  %4331 = vmatprep.subr.bf16.mxu0 %v6502_v19  ;;  %v8601_v36 = vld [vmem:[#allocation139_spill] sm:$0xff]  ;;  %v8602_v19 = vld [vmem:[#allocation2_spill] sm:$0xff] }
 0x19d   : > { %4379 = vmatprep.subr.bf16.mxu1 %v6514_v57  ;;  %v8603_v57 = vsub.s32 0, %v8602_v19  ;;  %v8607_v43 = vsub.s32 3, %v8602_v19  ;;  %v8610_v8 = vsub.s32 4, %v8602_v19 }
 0x19f   : > { %4333 = vmatpush1.bf16.msra.mxu0 %v6532_v6  ;;  %v811_v6 = vrot.slane %v773_v50, %v8603_v57  ;;  %v823_v3 = vrot.slane %v773_v50, %v8607_v43  ;;  %v7205_v40 = vrot.slane %v773_v50, %v8610_v8 }
 0x1a0   : > { %4381 = vmatpush1.bf16.msra.mxu1 %v6536_v54  ;;  %4335 = vmatprep.subr.bf16.mxu0 %v6538_v1  ;;  %v8604_v54 = vsub.s32 1, %v8602_v19  ;;  %v8605_v1 = vld [vmem:[#allocation140_spill] sm:$0xff] }
 0x1a1   : > { %4383 = vmatprep.subr.bf16.mxu1 %v6547_v55  ;;  %v8606_v55 = vsub.s32 2, %v8602_v19  ;;  %v1341_v28 = vadd.f32 %v7085_v20, %v811_v6  ;;  %v7199_v2 = vadd.f32 %v7098_v37, %v823_v3  ;;  %v7208_v20 = vadd.f32 %v7106_v18, %v811_v6 }
 0x1a2   : > { %v815_v4 = vrot.slane %v773_v50, %v8604_v54  ;;  %v7221_v53 = vadd.f32 %v7117_v29, %v823_v3  ;;  %v8612_v18 = vsub.s32 5, %v8602_v19 }
 0x1a3   : > { %4337 = vmatpush1.bf16.msra.mxu0 %v8599_v61  ;;  %v819_v16 = vrot.slane %v773_v50, %v8606_v55  ;;  %v2373_v61 = vmax.f32 %v7199_v2, 0.0 }
 0x1a4   : > { %4385 = vmatpush1.bf16.msra.mxu1 %v8600_v47  ;;  %3366 = vmatprep.subr.msk.mxu0 %vm869_vm1, %v8601_v36  ;;  %v7192_v48 = vadd.f32 %v7088_v11, %v815_v4  ;;  %v7228_v59 = vrot.slane %v773_v50, %v8612_v18  ;;  %v7236_v46 = vadd.f32 %v7126_v22, %v815_v4  ;;  %v2389_v57 = vmax.f32 %v7221_v53, 0.0 }
 0x1a5   : > { %3372 = vmatprep.subr.msk.mxu1 %vm869_vm1, %v8605_v1  ;;  %v1430_v42 = vadd.f32 %v7092_v31, %v819_v16  ;;  %v7214_v11 = vadd.f32 %v7113_v26, %v819_v16  ;;  %v8611_v31 = vsub.s32 6, %v8602_v19  ;;  %v2370_v26 = vmax.f32 %v1341_v28, 0.0 }
 0x1a6   : > { %v2371_v33 = vmax.f32 %v7192_v48, 0.0  ;;  %v7240_v29 = vadd.f32 %v7128_v51, %v819_v16  ;;  %v7249_v47 = vadd.f32 %v7136_v39, %v811_v6  ;;  %v7257_v36 = vadd.f32 %v7138_v35, %v815_v4 }
 0x1a7   : > { %3367 = vmatpush1.msk.msra.mxu0 %vm869_vm1, %v8608_v34  ;;  %v7218_v37 = vrot.slane %v773_v50, %v8611_v31  ;;  %v2388_v51 = vmax.f32 %v7214_v11, 0.0  ;;  %v7263_v39 = vadd.f32 %v7140_v52, %v819_v16  ;;  %v2403_v1 = vmax.f32 %v7236_v46, 0.0 }
 0x1a8   : > { %3373 = vmatpush1.msk.msra.mxu1 %vm869_vm1, %v8609_v56  ;;  %2249 = vmatmul.mubr.f32.vlgmr.msra.gmra.mrb[56].mxu0 %v6677_v62  ;;  %v2404_v55 = vmax.f32 %v7240_v29, 0.0  ;;  %v2418_v16 = vmax.f32 %v7249_v47, 0.0  ;;  %v7280_v28 = vadd.f32 %v7143_v32, %v823_v3  ;;  %v2711_v47 = vld [vmem:[%s8114_s5 + $0x1e8] sm:$0xff] }
 0x1a9   : > { %2338 = vmatmul.mubr.f32.vlgmr.msra.gmra.mrb[56].mxu1 %v6677_v62  ;;  %3369 = vmatprep.mubr.msk.f32.mxu0 %vm856_vm0, %v6691_v15  ;;  %v7211_v62 = vadd.f32 %v7111_v30, %v815_v4  ;;  %v8613_v30 = vsub.s32 7, %v8602_v19  ;;  %v2420_v8 = vmax.f32 %v7263_v39, 0.0  ;;  %v2663_v29 = vld [vmem:[%s8114_s5 + $0x68] sm:$0xff] }
 0x1aa   : > { %3375 = vmatprep.mubr.msk.f32.mxu1 %vm856_vm0, %v6691_v15  ;;  %v7223_v15 = vadd.f32 %v1352_v38, %v811_v6  ;;  %v2372_v38 = vmax.f32 %v1430_v42, 0.0 }
 0x1ab   : > { %v7232_v9 = vrot.slane %v773_v50, %v8613_v30  ;;  %v7246_v50 = vadd.f32 %v7131_v21, %v823_v3  ;;  %v2387_v22 = vmax.f32 %v7211_v62, 0.0 }
 0x1ac   : > { %2255 = vmatmul.mubr.f32.gmra.mrb[58].mxu0 %v6696_v23  ;;  %v2402_v21 = vmax.f32 %v7223_v15, 0.0 }
 0x1ad   : > { %2344 = vmatmul.mubr.f32.gmra.mrb[58].mxu1 %v6696_v23  ;;  %3370 = vmatprep.mubr.msk.f32.mxu0 %vm856_vm0, %v6707_v41  ;;  %v2386_v23 = vmax.f32 %v7208_v20, 0.0  ;;  %v2405_v52 = vmax.f32 %v7246_v50, 0.0 }
 0x1ae   : > { %3376 = vmatprep.mubr.msk.f32.mxu1 %vm856_vm0, %v6707_v41 }
 0x1af   : > { %v1518_v19 = vpop.f32.mrb[24].mxu0 }
 0x1b0   : > { %2261 = vmatmul.mubr.f32.gmra.mrb[60].mxu0 %v6712_v49  ;;  %v1519_v41 = vadd.f32 %v1518_v19, %v7205_v40  ;;  %v1607_v6 = vpop.f32.mrb[24].mxu1  ;;  %v1520_v54 = vpop.f32.mrb[25].mxu0 }
 0x1b1   : > { %2350 = vmatmul.mubr.f32.gmra.mrb[60].mxu1 %v6712_v49  ;;  %v1608_v35 = vadd.f32 %v1607_v6, %v7218_v37  ;;  %3371 = vmatprep.mubr.msk.f32.mxu0 %vm856_vm0, %v6729_v13  ;;  %v1521_v4 = vadd.f32 %v1520_v54, %v7228_v59  ;;  %v1609_v43 = vpop.f32.mrb[25].mxu1  ;;  %v2419_v49 = vmax.f32 %v7257_v36, 0.0  ;;  %v2666_v36 = vld [vmem:[%s8114_s5 + $0x80] sm:$0xff] }
 0x1b2   : > { %v2374_v34 = vmax.f32 %v1519_v41, 0.0  ;;  %3377 = vmatprep.mubr.msk.f32.mxu1 %vm856_vm0, %v6729_v13  ;;  %v1610_v56 = vadd.f32 %v1609_v43, %v7232_v9 }
 0x1b3   : > { %v2376_v48 = vmax.f32 %v1608_v35, 0.0  ;;  %v2375_v42 = vmax.f32 %v1521_v4, 0.0  ;;  %v1524_v2 = vpop.f32.mrb[26].mxu0 }
 0x1b4   : > { %v7283_v20 = vmax.f32 %v2370_v26, %v2374_v34  ;;  %v2377_v62 = vmax.f32 %v1610_v56, 0.0  ;;  %2267 = vmatmul.mubr.f32.gmra.mrb[62].mxu0 %v6736_v7  ;;  %v1525_v11 = vadd.f32 %v1524_v2, %v7205_v40  ;;  %v1613_v13 = vpop.f32.mrb[26].mxu1  ;;  %v1526_v31 = vpop.f32.mrb[27].mxu0 }
 0x1b5   : > { %v7287_v53 = vmax.f32 %v2372_v38, %v2376_v48  ;;  %v7289_v18 = vmax.f32 %v2371_v33, %v2375_v42  ;;  %2356 = vmatmul.mubr.f32.gmra.mrb[62].mxu1 %v6736_v7  ;;  %v1614_v32 = vadd.f32 %v1613_v13, %v7218_v37  ;;  %v1527_v3 = vadd.f32 %v1526_v31, %v7228_v59  ;;  %v1615_v30 = vpop.f32.mrb[27].mxu1 }
 0x1b6   : > { %8614 = vst [vmem:[#allocation19_spill] sm:$0xff] %v7283_v20  ;;  %v7296_v41 = vmax.f32 %v2373_v61, %v2377_v62  ;;  %v2390_v6 = vmax.f32 %v1525_v11, 0.0  ;;  %v1616_v54 = vadd.f32 %v1615_v30, %v7232_v9 }
 0x1b7   : > { %8615 = vst [vmem:[#allocation20_spill] sm:$0xff] %v7287_v53  ;;  %8616 = vst [vmem:[#allocation21_spill] sm:$0xff] %v7289_v18  ;;  %v2392_v33 = vmax.f32 %v1614_v32, 0.0  ;;  %v2391_v35 = vmax.f32 %v1527_v3, 0.0  ;;  %v1530_v4 = vpop.f32.mrb[28].mxu0 }
 0x1b8   : > { %8618 = vst [vmem:[#allocation22_spill] sm:$0xff] %v7296_v41  ;;  %v7303_v43 = vmax.f32 %v2386_v23, %v2390_v6  ;;  %v2393_v34 = vmax.f32 %v1616_v54, 0.0  ;;  %v1531_v56 = vadd.f32 %v1530_v4, %v7205_v40  ;;  %v1619_v48 = vpop.f32.mrb[28].mxu1  ;;  %v1532_v61 = vpop.f32.mrb[29].mxu0  ;;  %v2680_v6 = vld [vmem:[%s8114_s5 + $0xf0] sm:$0xff] }
 0x1b9   : > { %v7308_v62 = vmax.f32 %v2388_v51, %v2392_v33  ;;  %v7310_v11 = vmax.f32 %v2387_v22, %v2391_v35  ;;  %v1620_v13 = vadd.f32 %v1619_v48, %v7218_v37  ;;  %v1533_v31 = vadd.f32 %v1532_v61, %v7228_v59  ;;  %v1621_v32 = vpop.f32.mrb[29].mxu1  ;;  %v2694_v51 = vld [vmem:[%s8114_s5 + $0x160] sm:$0xff] }
 0x1ba   : > { %8619 = vst [vmem:[#allocation23_spill] sm:$0xff] %v7303_v43  ;;  %v7314_v3 = vmax.f32 %v2389_v57, %v2393_v34  ;;  %v2406_v23 = vmax.f32 %v1531_v56, 0.0  ;;  %v1622_v30 = vadd.f32 %v1621_v32, %v7232_v9  ;;  %v7783_v43 = vld [vmem:[%s8113_s4 + $0x120] sm:$0xff] }
 0x1bb   : > { %8621 = vst [vmem:[#allocation24_spill] sm:$0xff] %v7308_v62  ;;  %8622 = vst [vmem:[#allocation25_spill] sm:$0xff] %v7310_v11  ;;  %v2408_v54 = vmax.f32 %v1620_v13, 0.0  ;;  %v2407_v4 = vmax.f32 %v1533_v31, 0.0  ;;  %v1536_v38 = vpop.f32.mrb[30].mxu0  ;;  %v7773_v62 = vld [vmem:[%s8113_s4 + $0x20] sm:$0xff] }
 0x1bc   : > { %8623 = vst [vmem:[#allocation26_spill] sm:$0xff] %v7314_v3  ;;  %v7325_v33 = vmax.f32 %v2402_v21, %v2406_v23  ;;  %v2409_v57 = vmax.f32 %v1622_v30, 0.0  ;;  %v1537_v35 = vadd.f32 %v1536_v38, %v7205_v40  ;;  %v1625_v34 = vpop.f32.mrb[30].mxu1  ;;  %v1538_v56 = vpop.f32.mrb[31].mxu0  ;;  %8637 = vst [vmem:[#allocation40_spill] sm:$0xff] %v7773_v62  ;;  %v7809_v11 = vld [vmem:[%s8113_s4 + $0xb0] sm:$0xff] }
 0x1bd   : > { %v7332_v61 = vmax.f32 %v2404_v55, %v2408_v54  ;;  %v7336_v13 = vmax.f32 %v2403_v1, %v2407_v4  ;;  %v1626_v15 = vadd.f32 %v1625_v34, %v7218_v37  ;;  %v1539_v21 = vadd.f32 %v1538_v56, %v7228_v59  ;;  %v1627_v31 = vpop.f32.mrb[31].mxu1  ;;  %v2651_v34 = vld [vmem:[%s8114_s5 + $0x8] sm:$0xff]  ;;  %v2662_v37 = vld [vmem:[%s8114_s5 + $0x60] sm:$0xff]  ;;  %8638 = vst [vmem:[#allocation41_spill] sm:$0xff] %v7783_v43 }
 0x1be   : > { %8624 = vst [vmem:[#allocation27_spill] sm:$0xff] %v7325_v33  ;;  %v7342_v40 = vmax.f32 %v2405_v52, %v2409_v57  ;;  %v2422_v38 = vmax.f32 %v1537_v35, 0.0  ;;  %v1628_v32 = vadd.f32 %v1627_v31, %v7232_v9  ;;  %v2421_v59 = vmax.f32 %v7280_v28, 0.0  ;;  %v2699_v57 = vld [vmem:[%s8114_s5 + $0x188] sm:$0xff]  ;;  %v2650_v35 = vld [vmem:[%s8114_s5] sm:$0xff]  ;;  %v7743_v33 = vld [vmem:[%s8113_s4 + $0x110] sm:$0xff] }
 0x1bf   : > { %8625 = vst [vmem:[#allocation28_spill] sm:$0xff] %v7332_v61  ;;  %8626 = vst [vmem:[#allocation29_spill] sm:$0xff] %v7336_v13  ;;  %v2424_v55 = vmax.f32 %v1626_v15, 0.0  ;;  %v2423_v23 = vmax.f32 %v1539_v21, 0.0  ;;  %v4388_v15 = vpack.c.bf16 %v2651_v34, %v2650_v35  ;;  %v2682_v21 = vld [vmem:[%s8114_s5 + $0x100] sm:$0xff]  ;;  %v2683_v31 = vld [vmem:[%s8114_s5 + $0x108] sm:$0xff]  ;;  %v4412_v46 = vpack.c.bf16 %v2663_v29, %v2662_v37 }
 0x1c0   : > { %8627 = vst [vmem:[#allocation30_spill] sm:$0xff] %v7342_v40  ;;  %v7354_v50 = vmax.f32 %v2418_v16, %v2422_v38  ;;  %v2425_v1 = vmax.f32 %v1628_v32, 0.0  ;;  %v2668_v38 = vld [vmem:[%s8114_s5 + $0x90] sm:$0xff]  ;;  %v4420_v32 = vpack.c.bf16 %v2683_v31, %v2682_v21  ;;  %v2685_v35 = vld [vmem:[%s8114_s5 + $0x118] sm:$0xff]  ;;  %v2670_v34 = vld [vmem:[%s8114_s5 + $0xa0] sm:$0xff] }
 0x1c1   : > { %v7360_v52 = vmax.f32 %v2420_v8, %v2424_v55  ;;  %v7364_v30 = vmax.f32 %v2419_v49, %v2423_v23  ;;  %v2667_v49 = vld [vmem:[%s8114_s5 + $0x88] sm:$0xff]  ;;  %v2698_v8 = vld [vmem:[%s8114_s5 + $0x180] sm:$0xff]  ;;  %v2669_v55 = vld [vmem:[%s8114_s5 + $0x98] sm:$0xff] }
 0x1c2   : > { %8628 = vst [vmem:[#allocation31_spill] sm:$0xff] %v7354_v50  ;;  %v7366_v54 = vmax.f32 %v2421_v59, %v2425_v1  ;;  %v4386_v4 = vpack.c.bf16 %v2667_v49, %v2666_v36  ;;  %v4418_v56 = vpack.c.bf16 %v2699_v57, %v2698_v8  ;;  %v2700_v23 = vld [vmem:[%s8114_s5 + $0x190] sm:$0xff]  ;;  %v2701_v59 = vld [vmem:[%s8114_s5 + $0x198] sm:$0xff]  ;;  %v4390_v1 = vpack.c.bf16 %v2669_v55, %v2668_v38  ;;  %v2702_v31 = vld [vmem:[%s8114_s5 + $0x1a0] sm:$0xff] }
 0x1c3   : > { %8629 = vst [vmem:[#allocation32_spill] sm:$0xff] %v7360_v52  ;;  %8630 = vst [vmem:[#allocation33_spill] sm:$0xff] %v7364_v30  ;;  %v4422_v36 = vpack.c.bf16 %v2701_v59, %v2700_v23  ;;  %v2652_v49 = vld [vmem:[%s8114_s5 + $0x10] sm:$0xff]  ;;  %v2653_v8 = vld [vmem:[%s8114_s5 + $0x18] sm:$0xff] }
 0x1c4   : > { %8631 = vst [vmem:[#allocation34_spill] sm:$0xff] %v7366_v54  ;;  %4387 = vmatprep.subr.bf16.mxu0 %v4386_v4  ;;  %4419 = vmatprep.subr.bf16.mxu1 %v4418_v56  ;;  %v2684_v4 = vld [vmem:[%s8114_s5 + $0x110] sm:$0xff]  ;;  %v4392_v57 = vpack.c.bf16 %v2653_v8, %v2652_v49  ;;  %v2671_v56 = vld [vmem:[%s8114_s5 + $0xa8] sm:$0xff]  ;;  %v2686_v59 = vld [vmem:[%s8114_s5 + $0x120] sm:$0xff] }
 0x1c5   : > { %4389 = vmatpush3.bf16.msra.mxu0 %v4388_v15  ;;  %4421 = vmatpush3.bf16.msra.mxu1 %v4420_v32  ;;  %v4424_v15 = vpack.c.bf16 %v2685_v35, %v2684_v4  ;;  %v4394_v21 = vpack.c.bf16 %v2671_v56, %v2670_v34  ;;  %v2703_v38 = vld [vmem:[%s8114_s5 + $0x1a8] sm:$0xff]  ;;  %v2654_v32 = vld [vmem:[%s8114_s5 + $0x20] sm:$0xff]  ;;  %v2672_v49 = vld [vmem:[%s8114_s5 + $0xb0] sm:$0xff] }
 0x1c6   : > { %4391 = vmatprep.subr.bf16.mxu0 %v4390_v1  ;;  %4423 = vmatprep.subr.bf16.mxu1 %v4422_v36  ;;  %v4426_v55 = vpack.c.bf16 %v2703_v38, %v2702_v31  ;;  %v2655_v23 = vld [vmem:[%s8114_s5 + $0x28] sm:$0xff]  ;;  %v2673_v8 = vld [vmem:[%s8114_s5 + $0xb8] sm:$0xff]  ;;  %v2704_v4 = vld [vmem:[%s8114_s5 + $0x1b0] sm:$0xff] }
 0x1c7   : > { %v2687_v1 = vld [vmem:[%s8114_s5 + $0x128] sm:$0xff]  ;;  %v4396_v36 = vpack.c.bf16 %v2655_v23, %v2654_v32  ;;  %v4398_v34 = vpack.c.bf16 %v2673_v8, %v2672_v49  ;;  %v2656_v56 = vld [vmem:[%s8114_s5 + $0x30] sm:$0xff]  ;;  %v2657_v31 = vld [vmem:[%s8114_s5 + $0x38] sm:$0xff] }
 0x1c8   : > { %v4428_v35 = vpack.c.bf16 %v2687_v1, %v2686_v59  ;;  %v2674_v32 = vld [vmem:[%s8114_s5 + $0xc0] sm:$0xff]  ;;  %v2675_v23 = vld [vmem:[%s8114_s5 + $0xc8] sm:$0xff]  ;;  %v4400_v1 = vpack.c.bf16 %v2657_v31, %v2656_v56  ;;  %v2708_v56 = vld [vmem:[%s8114_s5 + $0x1d0] sm:$0xff] }
 0x1c9   : > { %4393 = vmatpush3.bf16.msra.mxu0 %v4392_v57  ;;  %4425 = vmatpush3.bf16.msra.mxu1 %v4424_v15  ;;  %v2705_v57 = vld [vmem:[%s8114_s5 + $0x1b8] sm:$0xff]  ;;  %v2688_v15 = vld [vmem:[%s8114_s5 + $0x130] sm:$0xff]  ;;  %v2707_v59 = vld [vmem:[%s8114_s5 + $0x1c8] sm:$0xff]  ;;  %v4402_v8 = vpack.c.bf16 %v2675_v23, %v2674_v32 }
 0x1ca   : > { %4395 = vmatprep.subr.bf16.mxu0 %v4394_v21  ;;  %4427 = vmatprep.subr.bf16.mxu1 %v4426_v55  ;;  %v4430_v38 = vpack.c.bf16 %v2705_v57, %v2704_v4  ;;  %v2689_v21 = vld [vmem:[%s8114_s5 + $0x138] sm:$0xff]  ;;  %v2706_v55 = vld [vmem:[%s8114_s5 + $0x1c0] sm:$0xff]  ;;  %v2659_v57 = vld [vmem:[%s8114_s5 + $0x48] sm:$0xff] }
 0x1cb   : > { %v4432_v49 = vpack.c.bf16 %v2689_v21, %v2688_v15  ;;  %v2658_v4 = vld [vmem:[%s8114_s5 + $0x40] sm:$0xff]  ;;  %v4434_v28 = vpack.c.bf16 %v2707_v59, %v2706_v55  ;;  %v2709_v31 = vld [vmem:[%s8114_s5 + $0x1d8] sm:$0xff]  ;;  %v2660_v32 = vld [vmem:[%s8114_s5 + $0x50] sm:$0xff] }
 0x1cc   : > { %v2690_v16 = vld [vmem:[%s8114_s5 + $0x140] sm:$0xff]  ;;  %v2661_v23 = vld [vmem:[%s8114_s5 + $0x58] sm:$0xff]  ;;  %v4438_v55 = vpack.c.bf16 %v2709_v31, %v2708_v56  ;;  %v2692_v59 = vld [vmem:[%s8114_s5 + $0x150] sm:$0xff] }
 0x1cd   : > { %4397 = vmatpush3.bf16.msra.mxu0 %v4396_v36  ;;  %4429 = vmatpush3.bf16.msra.mxu1 %v4428_v35  ;;  %v2691_v36 = vld [vmem:[%s8114_s5 + $0x148] sm:$0xff]  ;;  %v2676_v35 = vld [vmem:[%s8114_s5 + $0xd0] sm:$0xff]  ;;  %v2681_v29 = vld [vmem:[%s8114_s5 + $0xf8] sm:$0xff] }
 0x1ce   : > { %4399 = vmatprep.subr.bf16.mxu0 %v4398_v34  ;;  %4431 = vmatprep.subr.bf16.mxu1 %v4430_v38  ;;  %v2677_v34 = vld [vmem:[%s8114_s5 + $0xd8] sm:$0xff]  ;;  %v4404_v38 = vpack.c.bf16 %v2659_v57, %v2658_v4  ;;  %v4436_v15 = vpack.c.bf16 %v2691_v36, %v2690_v16  ;;  %v4408_v16 = vpack.c.bf16 %v2661_v23, %v2660_v32  ;;  %v2712_v37 = vld [vmem:[%s8114_s5 + $0x1f0] sm:$0xff]  ;;  %v7703_v50 = vld [vmem:[%s8113_s4 + $0x100] sm:$0xff] }
 0x1cf   : > { %v4406_v21 = vpack.c.bf16 %v2677_v34, %v2676_v35  ;;  %v7713_v54 = vld [vmem:[%s8113_s4 + $0x90] sm:$0xff]  ;;  %v7753_v40 = vld [vmem:[%s8113_s4 + $0xa0] sm:$0xff] }
 0x1d0   : > { %v7723_v30 = vld [vmem:[%s8113_s4 + $0x190] sm:$0xff]  ;;  %v7763_v13 = vld [vmem:[%s8113_s4 + $0x1a0] sm:$0xff] }
 0x1d1   : > { %4401 = vmatpush3.bf16.msra.mxu0 %v4400_v1  ;;  %4433 = vmatpush3.bf16.msra.mxu1 %v4432_v49  ;;  %v2693_v1 = vld [vmem:[%s8114_s5 + $0x158] sm:$0xff]  ;;  %v7733_v61 = vld [vmem:[%s8113_s4 + $0x10] sm:$0xff]  ;;  %8636 = vst [vmem:[#allocation39_spill] sm:$0xff] %v7763_v13 }
 0x1d2   : > { %4403 = vmatprep.subr.bf16.mxu0 %v4402_v8  ;;  %4435 = vmatprep.subr.bf16.mxu1 %v4434_v28  ;;  %v4440_v49 = vpack.c.bf16 %v2693_v1, %v2692_v59  ;;  %v2678_v1 = vld [vmem:[%s8114_s5 + $0xe0] sm:$0xff] }
 0x1d5   : > { %4405 = vmatpush3.bf16.msra.mxu0 %v4404_v38  ;;  %4437 = vmatpush3.bf16.msra.mxu1 %v4436_v15 }
 0x1d6   : > { %4407 = vmatprep.subr.bf16.mxu0 %v4406_v21  ;;  %4439 = vmatprep.subr.bf16.mxu1 %v4438_v55 }
 0x1d9   : > { %4409 = vmatpush3.bf16.msra.mxu0 %v4408_v16  ;;  %4441 = vmatpush3.bf16.msra.mxu1 %v4440_v49  ;;  %v2679_v16 = vld [vmem:[%s8114_s5 + $0xe8] sm:$0xff]  ;;  %v2710_v49 = vld [vmem:[%s8114_s5 + $0x1e0] sm:$0xff] }
 0x1da   : > { %v4410_v39 = vpack.c.bf16 %v2679_v16, %v2678_v1  ;;  %v4442_v9 = vpack.c.bf16 %v2711_v47, %v2710_v49  ;;  %v2695_v1 = vld [vmem:[%s8114_s5 + $0x168] sm:$0xff]  ;;  %v4414_v47 = vpack.c.bf16 %v2681_v29, %v2680_v6  ;;  %v2697_v6 = vld [vmem:[%s8114_s5 + $0x178] sm:$0xff]  ;;  %v2602_v29 = vld [vmem:[%s8113_s4 + $0x80] sm:$0xff] }
 0x1db   : > { %v4444_v16 = vpack.c.bf16 %v2695_v1, %v2694_v51  ;;  %v2713_v51 = vld [vmem:[%s8114_s5 + $0x1f8] sm:$0xff]  ;;  %v2696_v1 = vld [vmem:[%s8114_s5 + $0x170] sm:$0xff] }
 0x1dc   : > { %4411 = vmatprep.subr.bf16.mxu0 %v4410_v39  ;;  %4443 = vmatprep.subr.bf16.mxu1 %v4442_v9  ;;  %v2665_v9 = vld [vmem:[%s8114_s5 + $0x78] sm:$0xff]  ;;  %v4446_v39 = vpack.c.bf16 %v2713_v51, %v2712_v37  ;;  %v2603_v37 = vld [vmem:[%s8113_s4 + $0x88] sm:$0xff]  ;;  %v2634_v51 = vld [vmem:[%s8113_s4 + $0x180] sm:$0xff] }
 0x1dd   : > { %4413 = vmatpush3.bf16.msra.mxu0 %v4412_v46  ;;  %4445 = vmatpush3.bf16.msra.mxu1 %v4444_v16  ;;  %v2664_v46 = vld [vmem:[%s8114_s5 + $0x70] sm:$0xff]  ;;  %v4448_v16 = vpack.c.bf16 %v2697_v6, %v2696_v1 }
 0x1de   : > { %v4416_v49 = vpack.c.bf16 %v2665_v9, %v2664_v46  ;;  %4415 = vmatprep.subr.bf16.mxu0 %v4414_v47  ;;  %4447 = vmatprep.subr.bf16.mxu1 %v4446_v39  ;;  %v4450_v46 = vpack.c.bf16 %v2603_v37, %v2602_v29  ;;  %v2635_v47 = vld [vmem:[%s8113_s4 + $0x188] sm:$0xff] }
 0x1df   : > { %v4482_v9 = vpack.c.bf16 %v2635_v47, %v2634_v51 }
 0x1e1   : > { %4417 = vmatpush3.bf16.msra.mxu0 %v4416_v49  ;;  %4449 = vmatpush3.bf16.msra.mxu1 %v4448_v16 }
 0x1e2   : > { %v7520_v8 = vpop.f32.mrb[32].mxu0  ;;  %4451 = vmatprep.subr.bf16.mxu0 %v4450_v46  ;;  %4483 = vmatprep.subr.bf16.mxu1 %v4482_v9 }
 0x1e3   : > { %v7522_v4 = vpop.f32.mrb[33].mxu0  ;;  %v2426_v49 = vmax.f32 %v7520_v8, 0.0 }
 0x1e4   : > { %v7524_v28 = vpop.f32.mrb[32].mxu1  ;;  %v2427_v22 = vmax.f32 %v7522_v4, 0.0 }
 0x1e5   : > { %v7526_v57 = vpop.f32.mrb[33].mxu1  ;;  %v2428_v19 = vmax.f32 %v7524_v28, 0.0 }
 0x1e6   : > { %v2429_v37 = vmax.f32 %v7526_v57, 0.0 }
 0x1e7   : > { %v7528_v36 = vpop.f32.mrb[34].mxu0 }
 0x1e8   : > { %v7530_v35 = vpop.f32.mrb[35].mxu0  ;;  %v7532_v34 = vpop.f32.mrb[34].mxu1  ;;  %v2442_v9 = vmax.f32 %v7528_v36, 0.0 }
 0x1e9   : > { %v7534_v56 = vpop.f32.mrb[35].mxu1 }
 0x1eb   : > { %v7536_v31 = vpop.f32.mrb[36].mxu0 }
 0x1ec   : > { %v7538_v38 = vpop.f32.mrb[37].mxu0  ;;  %v7540_v15 = vpop.f32.mrb[36].mxu1 }
 0x1ed   : > { %v7542_v21 = vpop.f32.mrb[37].mxu1 }
 0x1ef   : > { %v7544_v32 = vpop.f32.mrb[38].mxu0 }
 0x1f0   : > { %v7546_v23 = vpop.f32.mrb[39].mxu0  ;;  %v7548_v55 = vpop.f32.mrb[38].mxu1 }
 0x1f1   : > { %v7550_v59 = vpop.f32.mrb[39].mxu1 }
 0x215   : > { %v1894_v39 = vpop.f32.mrb[40].mxu0 }
 0x216   : > { %v2430_v1 = vmax.f32 %v1894_v39, 0.0  ;;  %v1983_v6 = vpop.f32.mrb[40].mxu1  ;;  %v1896_v48 = vpop.f32.mrb[41].mxu0 }
 0x217   : > { %v2432_v2 = vmax.f32 %v1983_v6, 0.0  ;;  %v2431_v16 = vmax.f32 %v1896_v48, 0.0  ;;  %v1985_v29 = vpop.f32.mrb[41].mxu1  ;;  %v2443_v48 = vmax.f32 %v7530_v35, 0.0  ;;  %v2444_v6 = vmax.f32 %v7532_v34, 0.0 }
 0x218   : > { %v7616_v7 = vmax.f32 %v2426_v49, %v2430_v1  ;;  %v2433_v51 = vmax.f32 %v1985_v29, 0.0 }
 0x219   : > { %v7618_v46 = vmax.f32 %v2428_v19, %v2432_v2  ;;  %v7620_v47 = vmax.f32 %v2427_v22, %v2431_v16  ;;  %v1900_v8 = vpop.f32.mrb[42].mxu0  ;;  %v2445_v19 = vmax.f32 %v7534_v56, 0.0 }
 0x21a   : > { %v7623_v39 = vmax.f32 %v2429_v37, %v2433_v51  ;;  %v2446_v4 = vmax.f32 %v1900_v8, 0.0  ;;  %v1989_v52 = vpop.f32.mrb[42].mxu1  ;;  %v1902_v28 = vpop.f32.mrb[43].mxu0  ;;  %v2458_v37 = vmax.f32 %v7536_v31, 0.0 }
 0x21b   : > { %v2448_v57 = vmax.f32 %v1989_v52, 0.0  ;;  %v2447_v49 = vmax.f32 %v1902_v28, 0.0  ;;  %v1991_v1 = vpop.f32.mrb[43].mxu1  ;;  %v2459_v52 = vmax.f32 %v7538_v38, 0.0  ;;  %v2460_v28 = vmax.f32 %v7540_v15, 0.0 }
 0x21c   : > { %v7628_v2 = vmax.f32 %v2442_v9, %v2446_v4  ;;  %v2449_v22 = vmax.f32 %v1991_v1, 0.0 }
 0x21d   : > { %v7630_v16 = vmax.f32 %v2444_v6, %v2448_v57  ;;  %v7632_v36 = vmax.f32 %v2443_v48, %v2447_v49  ;;  %v1906_v29 = vpop.f32.mrb[44].mxu0  ;;  %v2461_v6 = vmax.f32 %v7542_v21, 0.0 }
 0x21e   : > { %v7635_v51 = vmax.f32 %v2445_v19, %v2449_v22  ;;  %v2462_v35 = vmax.f32 %v1906_v29, 0.0  ;;  %v1995_v8 = vpop.f32.mrb[44].mxu1  ;;  %v1908_v34 = vpop.f32.mrb[45].mxu0  ;;  %v2474_v19 = vmax.f32 %v7544_v32, 0.0 }
 0x21f   : > { %v2464_v56 = vmax.f32 %v1995_v8, 0.0  ;;  %v2463_v9 = vmax.f32 %v1908_v34, 0.0  ;;  %v1997_v4 = vpop.f32.mrb[45].mxu1  ;;  %v2475_v8 = vmax.f32 %v7546_v23, 0.0  ;;  %v2476_v34 = vmax.f32 %v7548_v55, 0.0 }
 0x220   : > { %v7640_v57 = vmax.f32 %v2458_v37, %v2462_v35  ;;  %v2465_v48 = vmax.f32 %v1997_v4, 0.0 }
 0x221   : > { %v7642_v49 = vmax.f32 %v2460_v28, %v2464_v56  ;;  %v7644_v31 = vmax.f32 %v2459_v52, %v2463_v9  ;;  %v1912_v1 = vpop.f32.mrb[46].mxu0  ;;  %v2477_v28 = vmax.f32 %v7550_v59, 0.0 }
 0x222   : > { %v7647_v22 = vmax.f32 %v2461_v6, %v2465_v48  ;;  %v2478_v38 = vmax.f32 %v1912_v1, 0.0  ;;  %v2001_v29 = vpop.f32.mrb[46].mxu1  ;;  %v1914_v15 = vpop.f32.mrb[47].mxu0 }
 0x223   : > { %v2480_v21 = vmax.f32 %v2001_v29, 0.0  ;;  %v2479_v37 = vmax.f32 %v1914_v15, 0.0  ;;  %v2003_v35 = vpop.f32.mrb[47].mxu1 }
 0x224   : > { %v7652_v56 = vmax.f32 %v2474_v19, %v2478_v38  ;;  %v2481_v52 = vmax.f32 %v2003_v35, 0.0 }
 0x225   : > { %v7654_v9 = vmax.f32 %v2476_v34, %v2480_v21  ;;  %v7656_v32 = vmax.f32 %v2475_v8, %v2479_v37 }
 0x226   : > { %8632 = vst [vmem:[#allocation35_spill] sm:$0xff] %v7652_v56  ;;  %v7658_v4 = vmax.f32 %v2477_v28, %v2481_v52  ;;  %v7693_v52 = vld [vmem:[%s8113_s4] sm:$0xff] }
 0x227   : > { %8633 = vst [vmem:[#allocation36_spill] sm:$0xff] %v7654_v9  ;;  %8634 = vst [vmem:[#allocation37_spill] sm:$0xff] %v7656_v32 }
 0x228   : > { %8635 = vst [vmem:[#allocation38_spill] sm:$0xff] %v7658_v4 }
 0x248   : > { %v2072_v6 = vpop.f32.mrb[48].mxu0 }
 0x249   : > { %v7660_v48 = vpop.f32.mrb[49].mxu0  ;;  %v2434_v27 = vmax.f32 %v2072_v6, 0.0 }
 0x24a   : > { %v7662_v23 = vpop.f32.mrb[48].mxu1  ;;  %v2435_v42 = vmax.f32 %v7660_v48, 0.0 }
 0x24b   : > { %v7664_v55 = vpop.f32.mrb[49].mxu1  ;;  %v2436_v18 = vmax.f32 %v7662_v23, 0.0 }
 0x24c   : > { %v2437_v32 = vmax.f32 %v7664_v55, 0.0 }
 0x24d   : > { %v7666_v1 = vpop.f32.mrb[50].mxu0 }
 0x24e   : > { %v7668_v29 = vpop.f32.mrb[51].mxu0  ;;  %v7670_v59 = vpop.f32.mrb[50].mxu1  ;;  %v2450_v13 = vmax.f32 %v7666_v1, 0.0 }
 0x24f   : > { %v7672_v19 = vpop.f32.mrb[51].mxu1  ;;  %v2451_v26 = vmax.f32 %v7668_v29, 0.0  ;;  %v2452_v48 = vmax.f32 %v7670_v59, 0.0 }
 0x250   : > { %v2453_v29 = vmax.f32 %v7672_v19, 0.0 }
 0x251   : > { %v7674_v38 = vpop.f32.mrb[52].mxu0 }
 0x252   : > { %v7676_v15 = vpop.f32.mrb[53].mxu0  ;;  %v7678_v8 = vpop.f32.mrb[52].mxu1 }
 0x253   : > { %v7680_v34 = vpop.f32.mrb[53].mxu1 }
 0x255   : > { %v7682_v21 = vpop.f32.mrb[54].mxu0 }
 0x256   : > { %v7684_v37 = vpop.f32.mrb[55].mxu0  ;;  %v7686_v35 = vpop.f32.mrb[54].mxu1 }
 0x257   : > { %v7688_v28 = vpop.f32.mrb[55].mxu1 }
 0x27b   : > { %v2250_v53 = vpop.f32.mrb[56].mxu0 }
 0x27c   : > { %v2438_v14 = vmax.f32 %v2250_v53, 0.0  ;;  %v2339_v41 = vpop.f32.mrb[56].mxu1  ;;  %v2252_v20 = vpop.f32.mrb[57].mxu0 }
 0x27d   : > { %v2440_v17 = vmax.f32 %v2339_v41, 0.0  ;;  %v2439_v4 = vmax.f32 %v2252_v20, 0.0  ;;  %v2341_v9 = vpop.f32.mrb[57].mxu1 }
 0x27e   : > { %v2554_v56 = vmax.f32 %v2434_v27, %v2438_v14  ;;  %v2441_v6 = vmax.f32 %v2341_v9, 0.0 }
 0x27f   : > { %v2556_v62 = vmax.f32 %v2436_v18, %v2440_v17  ;;  %v2555_v3 = vmax.f32 %v2435_v42, %v2439_v4  ;;  %v2256_v43 = vpop.f32.mrb[58].mxu0  ;;  %v2466_v4 = vmax.f32 %v7674_v38, 0.0  ;;  %v8640_v38 = vpack.c.bf16 %v7698_v44, %v7693_v52 }
 0x280   : > { %v2570_v41 = vmax.f32 %v7616_v7, %v2554_v56  ;;  %v2557_v20 = vmax.f32 %v2437_v32, %v2441_v6  ;;  %v2454_v23 = vmax.f32 %v2256_v43, 0.0  ;;  %v2345_v10 = vpop.f32.mrb[58].mxu1  ;;  %v2258_v55 = vpop.f32.mrb[59].mxu0  ;;  %v2467_v7 = vmax.f32 %v7676_v15, 0.0 }
 0x281   : > { %v2572_v27 = vmax.f32 %v7618_v46, %v2556_v62  ;;  %v2456_v14 = vmax.f32 %v2345_v10, 0.0  ;;  %v2455_v9 = vmax.f32 %v2258_v55, 0.0  ;;  %v2347_v53 = vpop.f32.mrb[59].mxu1  ;;  %v2571_v1 = vmax.f32 %v7620_v47, %v2555_v3 }
 0x282   : > { %v2558_v17 = vmax.f32 %v2450_v13, %v2454_v23  ;;  %v2457_v18 = vmax.f32 %v2347_v53, 0.0  ;;  %v2573_v42 = vmax.f32 %v7623_v39, %v2557_v20  ;;  %v2468_v10 = vmax.f32 %v7678_v8, 0.0 }
 0x283   : > { %v2560_v43 = vmax.f32 %v2452_v48, %v2456_v14  ;;  %v2559_v56 = vmax.f32 %v2451_v26, %v2455_v9  ;;  %v2262_v32 = vpop.f32.mrb[60].mxu0  ;;  %2778 = vmatprep.mubr.f32.mxu0 %v2571_v1  ;;  %v2469_v8 = vmax.f32 %v7680_v34, 0.0  ;;  %v8641_v48 = vpack.c.bf16 %v7708_v5, %v7703_v50 }
 0x284   : > { %v2561_v62 = vmax.f32 %v2453_v29, %v2457_v18  ;;  %v2470_v46 = vmax.f32 %v2262_v32, 0.0  ;;  %v2351_v59 = vpop.f32.mrb[60].mxu1  ;;  %2863 = vmatprep.mubr.f32.mxu1 %v2573_v42  ;;  %v2264_v3 = vpop.f32.mrb[61].mxu0  ;;  %2779 = vmatmul.mubr.f32.vlgmr.msra.gmra.mrb[64].mxu0 %v2570_v41  ;;  %v2574_v13 = vmax.f32 %v7628_v2, %v2558_v17  ;;  %v8642_v41 = vpack.c.bf16 %v7718_v25, %v7713_v54  ;;  %v8649_v42 = vld [vmem:[#allocation35_spill] sm:$0xff]  ;;  %v8652_v32 = vld [vmem:[#allocation37_spill] sm:$0xff] }
 0x285   : > { %v2472_v47 = vmax.f32 %v2351_v59, 0.0  ;;  %v2471_v39 = vmax.f32 %v2264_v3, 0.0  ;;  %v2353_v19 = vpop.f32.mrb[61].mxu1  ;;  %2864 = vmatmul.mubr.f32.vlgmr.msra.gmra.mrb[64].mxu1 %v2572_v27  ;;  %4453 = vmatpush3.bf16.msra.mxu0 %v8640_v38  ;;  %v2575_v26 = vmax.f32 %v7632_v36, %v2559_v56  ;;  %v2576_v15 = vmax.f32 %v7630_v16, %v2560_v43  ;;  %v8650_v43 = vld [vmem:[#allocation40_spill] sm:$0xff]  ;;  %v2642_v3 = vld [vmem:[%s8113_s4 + $0x1c0] sm:$0xff] }
 0x286   : > { %v2562_v6 = vmax.f32 %v2466_v4, %v2470_v46  ;;  %v2473_v53 = vmax.f32 %v2353_v19, 0.0  ;;  %4485 = vmatpush3.bf16.msra.mxu1 %v8641_v48  ;;  %v2577_v2 = vmax.f32 %v7635_v51, %v2561_v62  ;;  %4455 = vmatprep.subr.bf16.mxu0 %v8642_v41  ;;  %v2482_v44 = vmax.f32 %v7682_v21, 0.0  ;;  %v2640_v21 = vld [vmem:[%s8113_s4 + $0x1b0] sm:$0xff]  ;;  %v8657_v38 = vld [vmem:[#allocation38_spill] sm:$0xff] }
 0x287   : > { %v2483_v36 = vmax.f32 %v7684_v37, 0.0  ;;  %v2564_v52 = vmax.f32 %v2468_v10, %v2472_v47  ;;  %v2563_v16 = vmax.f32 %v2467_v7, %v2471_v39  ;;  %v2268_v20 = vpop.f32.mrb[62].mxu0  ;;  %2783 = vmatprep.mubr.f32.mxu0 %v2575_v26  ;;  %v8643_v34 = vpack.c.bf16 %v7728_v63, %v7723_v30  ;;  %v2641_v37 = vld [vmem:[%s8113_s4 + $0x1b8] sm:$0xff]  ;;  %v2610_v7 = vld [vmem:[%s8113_s4 + $0xc0] sm:$0xff]  ;;  %v8653_v62 = vld [vmem:[#allocation36_spill] sm:$0xff] }
 0x288   : > { %v2484_v5 = vmax.f32 %v7686_v35, 0.0  ;;  %v2565_v50 = vmax.f32 %v2469_v8, %v2473_v53  ;;  %v2486_v51 = vmax.f32 %v2268_v20, 0.0  ;;  %v2357_v23 = vpop.f32.mrb[62].mxu1  ;;  %2868 = vmatprep.mubr.f32.mxu1 %v2577_v2  ;;  %v2270_v25 = vpop.f32.mrb[63].mxu0  ;;  %2784 = vmatmul.mubr.f32.gmra.mrb[66].mxu0 %v2574_v13  ;;  %v2578_v54 = vmax.f32 %v7640_v57, %v2562_v6  ;;  %v2643_v13 = vld [vmem:[%s8113_s4 + $0x1c8] sm:$0xff]  ;;  %v8654_v47 = vld [vmem:[#allocation42_spill] sm:$0xff] }
 0x289   : > { %4487 = vmatprep.subr.bf16.mxu1 %v8643_v34  ;;  %v2488_v63 = vmax.f32 %v2357_v23, 0.0  ;;  %v2487_v30 = vmax.f32 %v2270_v25, 0.0  ;;  %v2359_v55 = vpop.f32.mrb[63].mxu1  ;;  %2869 = vmatmul.mubr.f32.gmra.mrb[66].mxu1 %v2576_v15  ;;  %v8644_v35 = vpack.c.bf16 %v7738_v58, %v7733_v61  ;;  %v2579_v27 = vmax.f32 %v7644_v31, %v2563_v16  ;;  %v2592_v58 = vld [vmem:[%s8113_s4 + $0x30] sm:$0xff]  ;;  %v2593_v61 = vld [vmem:[%s8113_s4 + $0x38] sm:$0xff]  ;;  %v2594_v8 = vld [vmem:[%s8113_s4 + $0x40] sm:$0xff] }
 0x28a   : > { %v2580_v57 = vmax.f32 %v7642_v49, %v2564_v52  ;;  %v2485_v14 = vmax.f32 %v7688_v28, 0.0  ;;  %v2566_v9 = vmax.f32 %v2482_v44, %v2486_v51  ;;  %v2489_v1 = vmax.f32 %v2359_v55, 0.0  ;;  %v8655_v39 = vld [vmem:[#allocation41_spill] sm:$0xff]  ;;  %v2595_v6 = vld [vmem:[%s8113_s4 + $0x48] sm:$0xff]  ;;  %v2626_v53 = vld [vmem:[%s8113_s4 + $0x140] sm:$0xff] }
 0x28b   : > { %4457 = vmatpush3.bf16.msra.mxu0 %v8644_v35  ;;  %v8645_v29 = vpack.c.bf16 %v7748_v0, %v7743_v33  ;;  %v2581_v17 = vmax.f32 %v7647_v22, %v2565_v50  ;;  %v8646_v18 = vpack.c.bf16 %v7758_v45, %v7753_v40  ;;  %v2568_v49 = vmax.f32 %v2484_v5, %v2488_v63  ;;  %v8647_v0 = vld [vmem:[#allocation39_spill] sm:$0xff]  ;;  %v2624_v45 = vld [vmem:[%s8113_s4 + $0x130] sm:$0xff]  ;;  %v2625_v40 = vld [vmem:[%s8113_s4 + $0x138] sm:$0xff] }
 0x28c   : > { %v2567_v31 = vmax.f32 %v2483_v36, %v2487_v30  ;;  %2788 = vmatprep.mubr.f32.mxu0 %v2579_v27  ;;  %v8648_v33 = vpack.c.bf16 %v7768_v12, %v8647_v0  ;;  %v4494_v22 = vpack.c.bf16 %v2641_v37, %v2640_v21  ;;  %v2569_v28 = vmax.f32 %v2485_v14, %v2489_v1  ;;  %v2611_v12 = vld [vmem:[%s8113_s4 + $0xc8] sm:$0xff]  ;;  %v2613_v2 = vld [vmem:[%s8113_s4 + $0xd8] sm:$0xff]  ;;  %v2644_v44 = vld [vmem:[%s8113_s4 + $0x1d0] sm:$0xff] }
 0x28d   : > { %4489 = vmatpush3.bf16.msra.mxu1 %v8645_v29  ;;  %4459 = vmatprep.subr.bf16.mxu0 %v8646_v18  ;;  %v2582_v4 = vmax.f32 %v8649_v42, %v2566_v9  ;;  %v8651_v56 = vpack.c.bf16 %v7778_v60, %v8650_v43  ;;  %v2584_v46 = vmax.f32 %v8653_v62, %v2568_v49  ;;  %v2645_v36 = vld [vmem:[%s8113_s4 + $0x1d8] sm:$0xff]  ;;  %v2596_v51 = vld [vmem:[%s8113_s4 + $0x50] sm:$0xff]  ;;  %v8663_v21 = vld [vmem:[#allocation22_spill] sm:$0xff] }
 0x28e   : > { %4491 = vmatprep.subr.bf16.mxu1 %v8648_v33  ;;  %2873 = vmatprep.mubr.f32.mxu1 %v2581_v17  ;;  %v2583_v10 = vmax.f32 %v8652_v32, %v2567_v31  ;;  %v4464_v59 = vpack.c.bf16 %v2593_v61, %v2592_v58  ;;  %v8656_v19 = vpack.c.bf16 %v8654_v47, %v8655_v39  ;;  %v8659_v16 = vld [vmem:[#allocation5_spill] sm:$0xff]  ;;  %v2628_v25 = vld [vmem:[%s8113_s4 + $0x150] sm:$0xff]  ;;  %v2614_v55 = vld [vmem:[%s8113_s4 + $0xe0] sm:$0xff] }
 0x28f   : > { %2789 = vmatmul.mubr.f32.gmra.mrb[68].mxu0 %v2578_v54  ;;  %2874 = vmatmul.mubr.f32.gmra.mrb[68].mxu1 %v2580_v57  ;;  %v2585_v60 = vmax.f32 %v8657_v38, %v2569_v28  ;;  %v8658_v26 = vpack.c.bf16 %v7814_v24, %v7809_v11  ;;  %v4496_v15 = vpack.c.bf16 %v2625_v40, %v2624_v45  ;;  %v2627_v24 = vld [vmem:[%s8113_s4 + $0x148] sm:$0xff]  ;;  %v2612_v11 = vld [vmem:[%s8113_s4 + $0xd0] sm:$0xff]  ;;  %v8660_v20 = vld [vmem:[#allocation21_spill] sm:$0xff] }
 0x290   : > { %4461 = vmatpush3.bf16.msra.mxu0 %v8651_v56  ;;  %2793 = vmatprep.mubr.f32.mxu0 %v2583_v10  ;;  %v4466_v48 = vpack.c.bf16 %v2611_v12, %v2610_v7  ;;  %v4498_v41 = vpack.c.bf16 %v2643_v13, %v2642_v3  ;;  %v4468_v52 = vpack.c.bf16 %v2595_v6, %v2594_v8  ;;  %v2597_v23 = vld [vmem:[%s8113_s4 + $0x58] sm:$0xff]  ;;  %v8662_v54 = vld [vmem:[#allocation6_spill] sm:$0xff]  ;;  %v2615_v35 = vld [vmem:[%s8113_s4 + $0xe8] sm:$0xff] }
 0x291   : > { %4493 = vmatpush3.bf16.msra.mxu1 %v8656_v19  ;;  %4463 = vmatprep.subr.bf16.mxu0 %v8658_v26  ;;  %v8661_v34 = vmax.f32 %v8659_v16, %v8660_v20  ;;  %v4500_v5 = vpack.c.bf16 %v2627_v24, %v2626_v53  ;;  %v4470_v50 = vpack.c.bf16 %v2613_v2, %v2612_v11  ;;  %v2629_v30 = vld [vmem:[%s8113_s4 + $0x158] sm:$0xff]  ;;  %v2646_v27 = vld [vmem:[%s8113_s4 + $0x1e0] sm:$0xff]  ;;  %v2647_v57 = vld [vmem:[%s8113_s4 + $0x1e8] sm:$0xff] }
 0x292   : > { %4495 = vmatprep.subr.bf16.mxu1 %v4494_v22  ;;  %2878 = vmatprep.mubr.f32.mxu1 %v2585_v60  ;;  %v8664_v37 = vmax.f32 %v8662_v54, %v8663_v21  ;;  %v4502_v63 = vpack.c.bf16 %v2645_v36, %v2644_v44  ;;  %v4472_v14 = vpack.c.bf16 %v2597_v23, %v2596_v51  ;;  %v2598_v29 = vld [vmem:[%s8113_s4 + $0x60] sm:$0xff]  ;;  %v2599_v17 = vld [vmem:[%s8113_s4 + $0x68] sm:$0xff]  ;;  %v2616_v49 = vld [vmem:[%s8113_s4 + $0xf0] sm:$0xff] }
 0x293   : > { %2794 = vmatmul.mubr.f32.gmra.mrb[70].mxu0 %v2582_v4  ;;  %2879 = vmatmul.mubr.f32.gmra.mrb[70].mxu1 %v2584_v46  ;;  %v4504_v9 = vpack.c.bf16 %v2629_v30, %v2628_v25  ;;  %v4474_v1 = vpack.c.bf16 %v2615_v35, %v2614_v55  ;;  %v2630_v18 = vld [vmem:[%s8113_s4 + $0x160] sm:$0xff]  ;;  %v4506_v58 = vpack.c.bf16 %v2647_v57, %v2646_v27  ;;  %v2631_v61 = vld [vmem:[%s8113_s4 + $0x168] sm:$0xff]  ;;  %v2617_v31 = vld [vmem:[%s8113_s4 + $0xf8] sm:$0xff] }
 0x294   : > { %4465 = vmatpush3.bf16.msra.mxu0 %v4464_v59  ;;  %2948 = vmatprep.mubr.f32.mxu0 %v8661_v34  ;;  %v2648_v0 = vld [vmem:[%s8113_s4 + $0x1f0] sm:$0xff]  ;;  %v2649_v33 = vld [vmem:[%s8113_s4 + $0x1f8] sm:$0xff]  ;;  %v4476_v22 = vpack.c.bf16 %v2599_v17, %v2598_v29  ;;  %v4508_v45 = vpack.c.bf16 %v2631_v61, %v2630_v18  ;;  %v4478_v40 = vpack.c.bf16 %v2617_v31, %v2616_v49  ;;  %v8665_v32 = vld [vmem:[#allocation3_spill] sm:$0xff] }
 0x295   : > { %4497 = vmatpush3.bf16.msra.mxu1 %v4496_v15  ;;  %3033 = vmatprep.mubr.f32.mxu1 %v8664_v37  ;;  %v2600_v28 = vld [vmem:[%s8113_s4 + $0x70] sm:$0xff]  ;;  %v2601_v42 = vld [vmem:[%s8113_s4 + $0x78] sm:$0xff]  ;;  %v4510_v4 = vpack.c.bf16 %v2649_v33, %v2648_v0  ;;  %v8666_v10 = vld [vmem:[#allocation19_spill] sm:$0xff] }
 0x296   : > { %4467 = vmatprep.subr.bf16.mxu0 %v4466_v48  ;;  %4499 = vmatprep.subr.bf16.mxu1 %v4498_v41  ;;  %v2632_v7 = vld [vmem:[%s8113_s4 + $0x170] sm:$0xff]  ;;  %v2633_v12 = vld [vmem:[%s8113_s4 + $0x178] sm:$0xff]  ;;  %v4480_v43 = vpack.c.bf16 %v2601_v42, %v2600_v28  ;;  %v8667_v62 = vmax.f32 %v8665_v32, %v8666_v10  ;;  %v8674_v19 = vld [vmem:[#allocation10_spill] sm:$0xff] }
 0x297   : > { %v4512_v56 = vpack.c.bf16 %v2633_v12, %v2632_v7  ;;  %v8668_v46 = vld [vmem:[#allocation4_spill] sm:$0xff]  ;;  %v8671_v13 = vld [vmem:[#allocation9_spill] sm:$0xff]  ;;  %v8675_v38 = vld [vmem:[#allocation26_spill] sm:$0xff] }
 0x298   : > { %4469 = vmatpush3.bf16.msra.mxu0 %v4468_v52  ;;  %v8669_v59 = vld [vmem:[#allocation20_spill] sm:$0xff]  ;;  %v8672_v47 = vld [vmem:[#allocation25_spill] sm:$0xff]  ;;  %v8676_v60 = vmax.f32 %v8674_v19, %v8675_v38  ;;  %v8677_v26 = vld [vmem:[#allocation7_spill] sm:$0xff] }
 0x299   : > { %4501 = vmatpush3.bf16.msra.mxu1 %v4500_v5  ;;  %4471 = vmatprep.subr.bf16.mxu0 %v4470_v50  ;;  %v8670_v3 = vmax.f32 %v8668_v46, %v8669_v59  ;;  %v8673_v39 = vmax.f32 %v8671_v13, %v8672_v47  ;;  %v8678_v15 = vld [vmem:[#allocation23_spill] sm:$0xff]  ;;  %v8680_v6 = vld [vmem:[#allocation8_spill] sm:$0xff]  ;;  %v8683_v24 = vld [vmem:[#allocation13_spill] sm:$0xff] }
 0x29a   : > { %4503 = vmatprep.subr.bf16.mxu1 %v4502_v63  ;;  %v8679_v8 = vmax.f32 %v8677_v26, %v8678_v15  ;;  %v8681_v53 = vld [vmem:[#allocation24_spill] sm:$0xff]  ;;  %v8684_v11 = vld [vmem:[#allocation29_spill] sm:$0xff]  ;;  %v8686_v41 = vld [vmem:[#allocation14_spill] sm:$0xff] }
 0x29b   : > { %v8682_v48 = vmax.f32 %v8680_v6, %v8681_v53  ;;  %v8685_v2 = vmax.f32 %v8683_v24, %v8684_v11  ;;  %v8687_v44 = vld [vmem:[#allocation30_spill] sm:$0xff]  ;;  %v8689_v52 = vld [vmem:[#allocation11_spill] sm:$0xff]  ;;  %v8692_v34 = vld [vmem:[#allocation12_spill] sm:$0xff] }
 0x29c   : > { %4473 = vmatpush3.bf16.msra.mxu0 %v4472_v14  ;;  %v8688_v36 = vmax.f32 %v8686_v41, %v8687_v44  ;;  %v8690_v16 = vld [vmem:[#allocation27_spill] sm:$0xff]  ;;  %v8693_v5 = vld [vmem:[#allocation28_spill] sm:$0xff]  ;;  %v8695_v51 = vld [vmem:[#allocation17_spill] sm:$0xff] }
 0x29d   : > { %4505 = vmatpush3.bf16.msra.mxu1 %v4504_v9  ;;  %4475 = vmatprep.subr.bf16.mxu0 %v4474_v1  ;;  %v8691_v20 = vmax.f32 %v8689_v52, %v8690_v16  ;;  %v8694_v50 = vmax.f32 %v8692_v34, %v8693_v5  ;;  %v8696_v23 = vld [vmem:[#allocation33_spill] sm:$0xff]  ;;  %v8698_v54 = vld [vmem:[#allocation18_spill] sm:$0xff]  ;;  %v8701_v63 = vld [vmem:[#allocation15_spill] sm:$0xff] }
 0x29e   : > { %4507 = vmatprep.subr.bf16.mxu1 %v4506_v58  ;;  %v8697_v25 = vmax.f32 %v8695_v51, %v8696_v23  ;;  %v8699_v21 = vld [vmem:[#allocation34_spill] sm:$0xff]  ;;  %v8702_v30 = vld [vmem:[#allocation31_spill] sm:$0xff]  ;;  %v8704_v35 = vld [vmem:[#allocation16_spill] sm:$0xff] }
 0x29f   : > { %v8700_v37 = vmax.f32 %v8698_v54, %v8699_v21  ;;  %v8703_v55 = vmax.f32 %v8701_v63, %v8702_v30  ;;  %v8705_v27 = vld [vmem:[#allocation32_spill] sm:$0xff]  ;;  %v3089_v14 = vld [vmem:[%s8116_s7] sm:$0xff]  ;;  %v3090_v9 = vld [vmem:[%s8116_s7 + $0x8] sm:$0xff] }
 0x2a0   : > { %4477 = vmatpush3.bf16.msra.mxu0 %v4476_v22  ;;  %v8706_v57 = vmax.f32 %v8704_v35, %v8705_v27  ;;  %v4514_v1 = vpack.c.bf16 %v3090_v9, %v3089_v14  ;;  %v3091_v29 = vld [vmem:[%s8116_s7 + $0x10] sm:$0xff]  ;;  %v3092_v17 = vld [vmem:[%s8116_s7 + $0x18] sm:$0xff]  ;;  %v3093_v58 = vld [vmem:[%s8116_s7 + $0x20] sm:$0xff] }
 0x2a1   : > { %4509 = vmatpush3.bf16.msra.mxu1 %v4508_v45  ;;  %4479 = vmatprep.subr.bf16.mxu0 %v4478_v40  ;;  %v4518_v18 = vpack.c.bf16 %v3092_v17, %v3091_v29  ;;  %v3094_v61 = vld [vmem:[%s8116_s7 + $0x28] sm:$0xff]  ;;  %v3095_v31 = vld [vmem:[%s8116_s7 + $0x30] sm:$0xff]  ;;  %v3096_v0 = vld [vmem:[%s8116_s7 + $0x38] sm:$0xff] }
 0x2a2   : > { %4511 = vmatprep.subr.bf16.mxu1 %v4510_v4  ;;  %v4522_v49 = vpack.c.bf16 %v3094_v61, %v3093_v58  ;;  %v4526_v33 = vpack.c.bf16 %v3096_v0, %v3095_v31  ;;  %v3097_v22 = vld [vmem:[%s8116_s7 + $0x40] sm:$0xff]  ;;  %v3098_v45 = vld [vmem:[%s8116_s7 + $0x48] sm:$0xff]  ;;  %v3099_v28 = vld [vmem:[%s8116_s7 + $0x50] sm:$0xff] }
 0x2a3   : > { %v4530_v40 = vpack.c.bf16 %v3098_v45, %v3097_v22  ;;  %v3100_v42 = vld [vmem:[%s8116_s7 + $0x58] sm:$0xff]  ;;  %v3101_v7 = vld [vmem:[%s8116_s7 + $0x60] sm:$0xff]  ;;  %v3102_v12 = vld [vmem:[%s8116_s7 + $0x68] sm:$0xff] }
 0x2a4   : > { %4481 = vmatpush3.bf16.msra.mxu0 %v4480_v43  ;;  %v4534_v4 = vpack.c.bf16 %v3100_v42, %v3099_v28  ;;  %v4538_v43 = vpack.c.bf16 %v3102_v12, %v3101_v7  ;;  %v3104_v32 = vld [vmem:[%s8116_s7 + $0x78] sm:$0xff] }
 0x2a5   : > { %4513 = vmatpush3.bf16.msra.mxu1 %v4512_v56  ;;  %4515 = vmatprep.subr.bf16.mxu0 %v4514_v1  ;;  %v3103_v56 = vld [vmem:[%s8116_s7 + $0x70] sm:$0xff] }
 0x2a6   : > { %4546 = vmatprep.subr.bf16.mxu1 %v4514_v1  ;;  %v4542_v10 = vpack.c.bf16 %v3104_v32, %v3103_v56 }
 0x2a7   : > { %2949 = vmatmul.mubr.f32.vlgmr.msra.gmra.mrb[72].mxu0 %v8667_v62 }
 0x2a8   : > { %3034 = vmatmul.mubr.f32.vlgmr.msra.gmra.mrb[72].mxu1 %v8670_v3  ;;  %2953 = vmatprep.mubr.f32.mxu0 %v8673_v39 }
 0x2a9   : > { %3038 = vmatprep.mubr.f32.mxu1 %v8676_v60  ;;  %4517 = vmatpush3.bf16.msra.mxu0 %v4514_v1 }
 0x2aa   : > { %4554 = vmatpush3.bf16.msra.mxu1 %v4514_v1  ;;  %4519 = vmatprep.subr.bf16.mxu0 %v4518_v18 }
 0x2ab   : > { %2954 = vmatmul.mubr.f32.gmra.mrb[74].mxu0 %v8679_v8  ;;  %4547 = vmatprep.subr.bf16.mxu1 %v4518_v18 }
 0x2ac   : > { %3039 = vmatmul.mubr.f32.gmra.mrb[74].mxu1 %v8682_v48  ;;  %2958 = vmatprep.mubr.f32.mxu0 %v8685_v2 }
 0x2ad   : > { %3043 = vmatprep.mubr.f32.mxu1 %v8688_v36  ;;  %4521 = vmatpush3.bf16.msra.mxu0 %v4518_v18 }
 0x2ae   : > { %4555 = vmatpush3.bf16.msra.mxu1 %v4518_v18  ;;  %4523 = vmatprep.subr.bf16.mxu0 %v4522_v49 }
 0x2af   : > { %2959 = vmatmul.mubr.f32.gmra.mrb[76].mxu0 %v8691_v20  ;;  %4548 = vmatprep.subr.bf16.mxu1 %v4522_v49 }
 0x2b0   : > { %3044 = vmatmul.mubr.f32.gmra.mrb[76].mxu1 %v8694_v50  ;;  %2963 = vmatprep.mubr.f32.mxu0 %v8697_v25 }
 0x2b1   : > { %3048 = vmatprep.mubr.f32.mxu1 %v8700_v37  ;;  %4525 = vmatpush3.bf16.msra.mxu0 %v4522_v49 }
 0x2b2   : > { %4556 = vmatpush3.bf16.msra.mxu1 %v4522_v49  ;;  %4527 = vmatprep.subr.bf16.mxu0 %v4526_v33 }
 0x2b3   : > { %2964 = vmatmul.mubr.f32.gmra.mrb[78].mxu0 %v8703_v55  ;;  %4549 = vmatprep.subr.bf16.mxu1 %v4526_v33  ;;  %v3378_v55 = vld [vmem:[%s8115_s6] ss:$0 sm:$0xff] }
 0x2b4   : > { %3049 = vmatmul.mubr.f32.gmra.mrb[78].mxu1 %v8706_v57 }
 0x2b5   : > { %4529 = vmatpush3.bf16.msra.mxu0 %v4526_v33 }
 0x2b6   : > { %4557 = vmatpush3.bf16.msra.mxu1 %v4526_v33  ;;  %4531 = vmatprep.subr.bf16.mxu0 %v4530_v40 }
 0x2b7   : > { %4550 = vmatprep.subr.bf16.mxu1 %v4530_v40 }
 0x2b9   : > { %4533 = vmatpush3.bf16.msra.mxu0 %v4530_v40 }
 0x2ba   : > { %4558 = vmatpush3.bf16.msra.mxu1 %v4530_v40  ;;  %4535 = vmatprep.subr.bf16.mxu0 %v4534_v4 }
 0x2bb   : > { %4551 = vmatprep.subr.bf16.mxu1 %v4534_v4 }
 0x2bd   : > { %4537 = vmatpush3.bf16.msra.mxu0 %v4534_v4 }
 0x2be   : > { %4559 = vmatpush3.bf16.msra.mxu1 %v4534_v4  ;;  %4539 = vmatprep.subr.bf16.mxu0 %v4538_v43 }
 0x2bf   : > { %4552 = vmatprep.subr.bf16.mxu1 %v4538_v43 }
 0x2c1   : > { %4541 = vmatpush3.bf16.msra.mxu0 %v4538_v43 }
 0x2c2   : > { %4560 = vmatpush3.bf16.msra.mxu1 %v4538_v43  ;;  %4543 = vmatprep.subr.bf16.mxu0 %v4542_v10 }
 0x2c3   : > { %4553 = vmatprep.subr.bf16.mxu1 %v4542_v10 }
 0x2c5   : > { %4545 = vmatpush3.bf16.msra.mxu0 %v4542_v10 }
 0x2c6   : > { %4561 = vmatpush3.bf16.msra.mxu1 %v4542_v10 }
 0x357   : > { %v3416_v62 = vpop.f32.mrb[64].mxu0 }
 0x358   : > { %v3460_v46 = vpop.f32.mrb[64].mxu1  ;;  %v3417_v59 = vpop.f32.mrb[65].mxu0 }
 0x359   : > { %v3418_v3 = vadd.f32 %v3417_v59, %v3416_v62  ;;  %v3461_v13 = vpop.f32.mrb[65].mxu1 }
 0x35a   : > { %v3462_v47 = vadd.f32 %v3461_v13, %v3460_v46 }
 0x35b   : > { %v3419_v39 = vpop.f32.mrb[66].mxu0 }
 0x35c   : > { %v2866_v19 = vadd.f32 %v3462_v47, %v3418_v3  ;;  %v3463_v38 = vpop.f32.mrb[66].mxu1  ;;  %v3420_v60 = vpop.f32.mrb[67].mxu0 }
 0x35d   : > { %v3421_v26 = vadd.f32 %v3420_v60, %v3419_v39  ;;  %v3464_v15 = vpop.f32.mrb[67].mxu1 }
 0x35e   : > { %v3465_v8 = vadd.f32 %v3464_v15, %v3463_v38 }
 0x360   : > { %v2871_v53 = vadd.f32 %v3465_v8, %v3421_v26 }
 0x362   : > { %v3422_v6 = vpop.f32.mrb[68].mxu0  ;;  %v3466_v48 = vpop.f32.mrb[68].mxu1 }
 0x363   : > { %v3423_v24 = vpop.f32.mrb[69].mxu0  ;;  %v3467_v2 = vpop.f32.mrb[69].mxu1 }
 0x364   : > { %v3424_v11 = vadd.f32 %v3423_v24, %v3422_v6  ;;  %v3468_v41 = vadd.f32 %v3467_v2, %v3466_v48 }
 0x366   : > { %v3425_v44 = vpop.f32.mrb[70].mxu0  ;;  %v2876_v36 = vadd.f32 %v3468_v41, %v3424_v11  ;;  %v3469_v52 = vpop.f32.mrb[70].mxu1 }
 0x367   : > { %v3426_v16 = vpop.f32.mrb[71].mxu0  ;;  %v3470_v34 = vpop.f32.mrb[71].mxu1 }
 0x368   : > { %v3427_v20 = vadd.f32 %v3426_v16, %v3425_v44  ;;  %v3471_v5 = vadd.f32 %v3470_v34, %v3469_v52 }
 0x36a   : > { %v2881_v50 = vadd.f32 %v3471_v5, %v3427_v20 }
 0x37a   : > { %v3504_v51 = vpop.f32.mrb[72].mxu0 }
 0x37b   : > { %v3548_v23 = vpop.f32.mrb[72].mxu1  ;;  %v3505_v25 = vpop.f32.mrb[73].mxu0 }
 0x37c   : > { %v3506_v54 = vadd.f32 %v3505_v25, %v3504_v51  ;;  %v3549_v21 = vpop.f32.mrb[73].mxu1 }
 0x37d   : > { %v3550_v37 = vadd.f32 %v3549_v21, %v3548_v23 }
 0x37e   : > { %v2951_v63 = vadd.f32 %v3506_v54, %v2866_v19  ;;  %v3507_v30 = vpop.f32.mrb[74].mxu0 }
 0x37f   : > { %v3551_v35 = vpop.f32.mrb[74].mxu1  ;;  %v3508_v27 = vpop.f32.mrb[75].mxu0 }
 0x380   : > { %v3036_v57 = vadd.f32 %v3550_v37, %v2951_v63  ;;  %v3509_v14 = vadd.f32 %v3508_v27, %v3507_v30  ;;  %v3552_v9 = vpop.f32.mrb[75].mxu1 }
 0x381   : > { %v3553_v1 = vadd.f32 %v3552_v9, %v3551_v35 }
 0x382   : > { %v3061_v29 = vadd.f32 %v3378_v55, %v3036_v57  ;;  %v2956_v17 = vadd.f32 %v3509_v14, %v2871_v53  ;;  %v3510_v18 = vpop.f32.mrb[76].mxu0 }
 0x383   : > { %v3554_v58 = vpop.f32.mrb[76].mxu1  ;;  %v3511_v61 = vpop.f32.mrb[77].mxu0 }
 0x384   : > { %v3065_v49 = vsub.f32 0.0, %v3061_v29  ;;  %v3041_v31 = vadd.f32 %v3553_v1, %v2956_v17  ;;  %v3512_v0 = vadd.f32 %v3511_v61, %v3510_v18  ;;  %v3555_v33 = vpop.f32.mrb[77].mxu1 }
 0x385   : > { %v3556_v22 = vadd.f32 %v3555_v33, %v3554_v58 }
 0x386   : > { %v3069_v45 = vmul.f32 1.442695, %v3065_v49  ;;  %v3062_v40 = vadd.f32 %v3378_v55, %v3041_v31  ;;  %v2961_v28 = vadd.f32 %v3512_v0, %v2876_v36  ;;  %v3513_v42 = vpop.f32.mrb[78].mxu0  ;;  %v3379_v36 = vld [vmem:[%s8117_s8] ss:$0 sm:$0xff] }
 0x387   : > { %v3557_v4 = vpop.f32.mrb[78].mxu1  ;;  %v3514_v7 = vpop.f32.mrb[79].mxu0 }
 0x388   : > { %4570 = vpow2.f32 %v3069_v45  ;;  %v3066_v12 = vsub.f32 0.0, %v3062_v40  ;;  %v3046_v43 = vadd.f32 %v3556_v22, %v2961_v28  ;;  %v3515_v56 = vadd.f32 %v3514_v7, %v3513_v42  ;;  %v3558_v32 = vpop.f32.mrb[79].mxu1 }
 0x389   : > { %v3559_v10 = vadd.f32 %v3558_v32, %v3557_v4 }
 0x38a   : > { %v3071_v62 = vmul.f32 1.442695, %v3066_v12  ;;  %v3063_v46 = vadd.f32 %v3378_v55, %v3046_v43  ;;  %v2966_v59 = vadd.f32 %v3515_v56, %v2881_v50 }
 0x38c   : > { %4572 = vpow2.f32 %v3071_v62  ;;  %v3067_v3 = vsub.f32 0.0, %v3063_v46  ;;  %v3051_v13 = vadd.f32 %v3559_v10, %v2966_v59 }
 0x38e   : > { %v3073_v47 = vmul.f32 1.442695, %v3067_v3  ;;  %v3064_v39 = vadd.f32 %v3378_v55, %v3051_v13 }
 0x390   : > { %4574 = vpow2.f32 %v3073_v47  ;;  %v3068_v19 = vsub.f32 0.0, %v3064_v39 }
 0x392   : > { %v4571_v38 = vpop.eup %4570  ;;  %v3075_v60 = vmul.f32 1.442695, %v3068_v19 }
 0x393   : > { %v3077_v26 = vadd.f32 1.0, %v4571_v38 }
 0x394   : > { %4576 = vpow2.f32 %v3075_v60 }
 0x395   : > { %4578 = vrcp.f32 %v3077_v26 }
 0x396   : > { %v4573_v15 = vpop.eup %4572 }
 0x397   : > { %v3078_v8 = vadd.f32 1.0, %v4573_v15 }
 0x399   : > { %4580 = vrcp.f32 %v3078_v8 }
 0x39a   : > { %v4575_v6 = vpop.eup %4574 }
 0x39b   : > { %v3079_v53 = vadd.f32 1.0, %v4575_v6 }
 0x39d   : > { %4582 = vrcp.f32 %v3079_v53 }
 0x39e   : > { %v4577_v48 = vpop.eup %4576 }
 0x39f   : > { %v4579_v24 = vpop.eup %4578  ;;  %v3080_v11 = vadd.f32 1.0, %v4577_v48 }
 0x3a0   : > { %3612 = vmatprep.mubr.f32.mxu0 %v4579_v24 }
 0x3a1   : > { %4584 = vrcp.f32 %v3080_v11 }
 0x3a3   : > { %v4581_v2 = vpop.eup %4580 }
 0x3a4   : > { %3613 = vmatmul.mubr.f32.vlgmr.msra.gmra.mrb[80].mxu0 %v4581_v2 }
 0x3a7   : > { %v4583_v41 = vpop.eup %4582 }
 0x3a8   : > { %3615 = vmatprep.mubr.f32.mxu1 %v4583_v41 }
 0x3ab   : > { %v4585_v44 = vpop.eup %4584 }
 0x3ac   : > { %3616 = vmatmul.mubr.f32.vlgmr.msra.gmra.mrb[80].mxu1 %v4585_v44 }
 0x477   : > { %v3614_v52 = vpop.f32.mrb[80].mxu0 }
 0x478   : > { %v3178_v16 = vpop.f32.mrb[81].mxu0  ;;  %v3184_v34 = vadd.f32 %v3614_v52, %v3379_v36 }
 0x479   : > { %v3179_v20 = vadd.f32 %v3379_v36, %v3178_v16 }
 0x47a   : > { %3198 = vst [vmem:[%s362_s14 + $0x8] sm:$0xff] %v3184_v34 }
 0x47b   : > { %3197 = vst [vmem:[%s362_s14] sm:$0xff] %v3179_v20 }
 0x47f   : > { %v3617_v5 = vpop.f32.mrb[80].mxu1 }
 0x480   : > { %v3188_v50 = vpop.f32.mrb[81].mxu1  ;;  %v3194_v23 = vadd.f32 %v3617_v5, %v3379_v36 }
 0x481   : > { %v3189_v51 = vadd.f32 %v3379_v36, %v3188_v50 }
 0x482   : > { %3200 = vst [vmem:[%s362_s14 + $0x18] sm:$0xff] %v3194_v23 }
 0x483   : > { %3199 = vst [vmem:[%s362_s14 + $0x10] sm:$0xff] %v3189_v51 }
 0x484 PF: > { %s19_s30 = sadd.s32 1, %s4612_s30  }
 0x485   : > { %p16_p4 = scmp.ge.s32.totalorder %s19_s30, 4  }
 0x487   :  { %18 = sbr.rel (!%p16_p4) target bundleno = 1 (0x1), region = 89 }

</bundles_post_ra>
